<compile_context>
chip_gen: v6e
topology: v6e:2x2x1
jax: 0.10.0
libtpu: 0.0.40
codegen_flags: <defaults>
</compile_context>

<pallas_src>
from math import gcd

import jax
import jax.numpy as jnp
from jax import lax
from jax.experimental import pallas as pl
from jax.experimental.pallas import tpu as pltpu

LANE = 128       # lane width: hidden / gate / logit padding target
MXU_ROWS = 256   # target M rows for the hoisted input-projection matmul


def _round_up(x, m):
    return ((x + m - 1) // m) * m


def _pow2_div(n):
    p = 1
    while n % (2 * p) == 0:
        p *= 2
    return p


def _choose_batch_block(B):
    """Single block for small batches; otherwise the largest divisor of B that is a
    multiple of 8 and <= 256 (lets the leading 'parallel' axis shard across TCs)."""
    if B <= 256:
        return B
    for blk in range(256, 7, -1):
        if B % blk == 0 and blk % 8 == 0:
            return blk
    return B


def _choose_t_chunk(T, desired):
    """Largest chunk <= desired (searching down to desired//2) minimising padded steps."""
    desired = max(1, min(desired, T))
    lo = max(1, desired // 2)
    best, best_pad = desired, (-T) % desired
    for cand in range(desired, lo - 1, -1):
        pad = (-T) % cand
        if pad < best_pad:
            best, best_pad = cand, pad
            if pad == 0:
                break
    return best


def _align_t_chunk(t_chunk, b_blk):
    """Make t_chunk * b_blk a multiple of 8 so the 2-D vecs block satisfies the (8,128)
    sublane constraint (padded timesteps are masked inside the kernel)."""
    m = 8 // gcd(b_blk, 8)
    return _round_up(t_chunk, m)


def _pack_gate_weights(w, in_dim_p, H, Hp):
    """w: [4H, in_dim] (PyTorch gate order i,f,g,o) -> [in_dim_p, 4*Hp]; each gate's columns
    start at a 128-lane boundary; padded rows/cols are zero so the padded hidden lanes stay
    exactly zero through the recurrence."""
    in_dim = w.shape[1]
    out = jnp.zeros((in_dim_p, 4 * Hp), jnp.float32)
    for g in range(4):
        blk = jnp.transpose(w[g * H:(g + 1) * H, :]).astype(jnp.float32)   # [in_dim, H]
        out = out.at[:in_dim, g * Hp:g * Hp + H].set(blk)
    return out


def _make_kernel(*, t_chunk, b_blk, e_dim, hp, seq_len, inv_t, skew, need_mask, vecs_2d):
    chunk_rows = t_chunk * b_blk
    rows_hint = _pow2_div(chunk_rows)
    b_hint = _pow2_div(b_blk)
    unroll = min(8, t_chunk)

    def kernel(vecs_ref, wih_ref, whh_ref, bias_ref, wout_ref, bout_ref,
               logits_ref, h_ref, c_ref, s_ref, xg_ref):
        # vecs_ref : one time chunk of embedded tokens (orig dtype; bf16 cast in-kernel)
        # wih_ref  : [E, 4*Hp]  bf16   (gate-lane-aligned W_ih^T)
        # whh_ref  : [Hp, 4*Hp] bf16   (gate-lane-aligned W_hh^T)
        # bias_ref : [1, 4*Hp]  f32    (b_ih + b_hh)
        # wout_ref : [Hp, Lp]   f32 ;  bout_ref : [1, Lp] f32
        # logits_ref: [b_blk, Lp] f32  (written on the last grid step)
        # h/c/s_ref: [b_blk, Hp] f32   VMEM scratch carried across grid steps
        # xg_ref   : [(1|2)*chunk_rows, 4*Hp] f32  precomputed input-gate projections
        t_idx = pl.program_id(1)
        n_steps = pl.num_programs(1)

        @pl.when(t_idx == 0)
        def _init():
            h_ref[...] = jnp.zeros_like(h_ref)
            c_ref[...] = jnp.zeros_like(c_ref)
            s_ref[...] = jnp.zeros_like(s_ref)

        if skew:
            proj_slot = lax.rem(t_idx, 2)          # chunk projected this step
            rec_slot = lax.rem(t_idx + 1, 2)       # chunk recursed this step (t_idx - 1)
            rec_chunk = t_idx - 1
        else:
            proj_slot = 0
            rec_slot = 0
            rec_chunk = t_idx

        def projection():
            # Hoisted input projection: one MXU-filling [chunk_rows, E] @ [E, 4Hp] bf16
            # matmul per chunk with f32 accumulation; bias folded in once per chunk.
            if vecs_2d:
                x2d = vecs_ref[...]
            else:
                x2d = vecs_ref[...].reshape(chunk_rows, e_dim)
            xg = (jnp.dot(x2d.astype(jnp.bfloat16), wih_ref[...],
                          preferred_element_type=jnp.float32) + bias_ref[...])
            base = proj_slot * chunk_rows
            if rows_hint >= 8:
                base = pl.multiple_of(base, rows_hint)
            xg_ref[pl.ds(base, chunk_rows), :] = xg

        def recurrence():
            rec_base = rec_slot * chunk_rows
            chunk_t0 = rec_chunk * t_chunk

            def step(lt, carry):
                h, c, s = carry
                row = rec_base + lt * b_blk
                if b_hint >= 8:
                    row = pl.multiple_of(row, b_hint)
                gates = (xg_ref[pl.ds(row, b_blk), :]
                         + jnp.dot(h.astype(jnp.bfloat16), whh_ref[...],
                                   preferred_element_type=jnp.float32))
                # Gate slices are 128-lane aligned views; PyTorch gate order i, f, g, o.
                i_g = jax.nn.sigmoid(gates[:, 0 * hp:1 * hp])
                f_g = jax.nn.sigmoid(gates[:, 1 * hp:2 * hp])
                g_g = jnp.tanh(gates[:, 2 * hp:3 * hp])
                o_g = jax.nn.sigmoid(gates[:, 3 * hp:4 * hp])
                c_new = f_g * c + i_g * g_g
                h_new = o_g * jnp.tanh(c_new)
                if need_mask:
                    # Freeze the state and skip the h-sum for padded / pipeline-fill steps
                    # (also protects against garbage in ragged / uninitialised xg rows).
                    g_t = chunk_t0 + lt
                    valid = jnp.logical_and(g_t >= 0, g_t < seq_len)
                    c_new = jnp.where(valid, c_new, c)
                    h_new = jnp.where(valid, h_new, h)
                    s = s + jnp.where(valid, h_new, jnp.zeros_like(h_new))
                else:
                    s = s + h_new
                return h_new, c_new, s

            h, c, s = lax.fori_loop(0, t_chunk, step,
                                    (h_ref[...], c_ref[...], s_ref[...]),
                                    unroll=unroll)
            h_ref[...] = h
            c_ref[...] = c
            s_ref[...] = s

        if skew:
            # Recurrence (chunk t-1, xg written on the previous grid step) is emitted first
            # so the independent projection for chunk t can be interleaved into its serial
            # latency gaps by the scheduler.
            recurrence()
            projection()
        else:
            projection()
            recurrence()

        @pl.when(t_idx == n_steps - 1)
        def _finalize():
            mean_h = s_ref[...] * inv_t                               # mean over time (true T)
            logits_ref[...] = (jnp.dot(mean_h, wout_ref[...],
                                       preferred_element_type=jnp.float32)
                               + bout_ref[...])                       # lane-dense store

    return kernel


def lstm_mean_sentiment(vecs, w_ih, w_hh, b_ih, b_hh, w_out, b_out, *, t_chunk=None):
    """vecs: [T, B, E] (time-major). PyTorch-shaped params:
       w_ih [4H, E], w_hh [4H, H], b_ih/b_hh [4H], w_out [L, H], b_out [L]."""
    T, B, E = vecs.shape
    H = w_hh.shape[1]
    L = w_out.shape[0]

    Hp = _round_up(H, LANE)
    Lp = _round_up(L, LANE)

    b_blk = _choose_batch_block(B)
    n_b = B // b_blk
    itemsize = jnp.dtype(vecs.dtype).itemsize

    # Time chunk: MXU-filling projection (M ~ 256 rows) while the xg scratch plus the
    # double-buffered vecs block stays well inside VMEM.
    if t_chunk is None:
        desired = max(1, -(-MXU_ROWS // b_blk))
        per_row_bytes = 2 * 4 * Hp * 4 + 2 * E * itemsize          # 2 xg slots + 2 vecs bufs
        budget_rows = max(b_blk, (24 * 1024 * 1024) // max(1, per_row_bytes))
        desired = min(desired, max(1, budget_rows // b_blk))
        t_chunk = _choose_t_chunk(T, desired)
    else:
        t_chunk = max(1, min(int(t_chunk), T))
    t_chunk = _align_t_chunk(t_chunk, b_blk)

    n_t = -(-T // t_chunk)                       # number of time chunks (last may be ragged)
    Tp = n_t * t_chunk
    skew = n_t >= 2                              # pipeline projection(t) with recurrence(t-1)
    need_mask = skew or (Tp != T)
    n_slots = 2 if skew else 1
    n_time_steps = n_t + (1 if skew else 0)
    chunk_rows = t_chunk * b_blk

    # --- parameter packing (per-gate 128-lane aligned, zero padded) ---
    wih_p = _pack_gate_weights(jnp.asarray(w_ih), E, H, Hp).astype(jnp.bfloat16)   # [E, 4Hp]
    whh_p = _pack_gate_weights(jnp.asarray(w_hh), Hp, H, Hp).astype(jnp.bfloat16)  # [Hp, 4Hp]

    b_comb = (jnp.asarray(b_ih) + jnp.asarray(b_hh)).astype(jnp.float32)
    b_p = jnp.zeros((1, 4 * Hp), jnp.float32)
    for g in range(4):
        b_p = b_p.at[0, g * Hp:g * Hp + H].set(b_comb[g * H:(g + 1) * H])

    wout_p = jnp.zeros((Hp, Lp), jnp.float32).at[:H, :L].set(
        jnp.transpose(jnp.asarray(w_out)).astype(jnp.float32))
    bout_p = jnp.zeros((1, Lp), jnp.float32).at[0, :L].set(
        jnp.asarray(b_out).astype(jnp.float32))

    # vecs is fed as-is: no batch/time/E padding and no dtype copy in the wrapper.
    vecs_2d = n_b == 1
    if vecs_2d:
        vecs_in = jnp.reshape(vecs, (T * B, E))                     # contiguous reshape
        vecs_spec_shape = (chunk_rows, E)
        if skew:
            vecs_map = lambda b, t: (jnp.minimum(t, n_t - 1), 0)
        else:
            vecs_map = lambda b, t: (t, 0)
    else:
        vecs_in = vecs
        vecs_spec_shape = (t_chunk, b_blk, E)
        if skew:
            vecs_map = lambda b, t: (jnp.minimum(t, n_t - 1), b, 0)
        else:
            vecs_map = lambda b, t: (t, b, 0)

    kernel = _make_kernel(t_chunk=t_chunk, b_blk=b_blk, e_dim=E, hp=Hp,
                          seq_len=T, inv_t=1.0 / float(T), skew=skew,
                          need_mask=need_mask, vecs_2d=vecs_2d)

    grid = (n_b, n_time_steps)

    # VMEM budget computed from the actual buffer sizes (consts counted double-buffered
    # as a conservative upper bound in case pl.Buffered(1) is unavailable).
    vecs_bytes = 2 * chunk_rows * E * itemsize
    const_bytes = (E * 4 * Hp * 2 + Hp * 4 * Hp * 2 + 4 * Hp * 4 + Hp * Lp * 4 + Lp * 4)
    xg_bytes = n_slots * chunk_rows * 4 * Hp * 4
    state_bytes = 3 * b_blk * Hp * 4
    out_bytes = 2 * b_blk * Lp * 4
    vmem_bytes = vecs_bytes + 2 * const_bytes + xg_bytes + state_bytes + out_bytes
    vmem_limit = int(min(64 * 1024 * 1024, max(16 * 1024 * 1024, int(vmem_bytes * 1.5))))

    flops = int(2 * n_b * n_time_steps * chunk_rows * E * 4 * Hp       # input projection
                + 2 * n_b * n_time_steps * chunk_rows * Hp * 4 * Hp    # recurrent projection
                + 2 * B * Hp * Lp)                                     # output head
    transcendentals = int(5 * n_b * n_time_steps * chunk_rows * Hp)
    bytes_accessed = int(T * B * E * itemsize
                         + (E + Hp) * 4 * Hp * 2
                         + (4 * Hp + Hp * Lp + Lp) * 4
                         + B * Lp * 4)

    def build_call(single_buffer_consts):
        const_kw = {"pipeline_mode": pl.Buffered(1)} if single_buffer_consts else {}
        in_specs = [
            pl.BlockSpec(vecs_spec_shape, vecs_map),                          # vecs chunk
            pl.BlockSpec((E, 4 * Hp), lambda b, t: (0, 0), **const_kw),       # W_ih^T
            pl.BlockSpec((Hp, 4 * Hp), lambda b, t: (0, 0), **const_kw),      # W_hh^T
            pl.BlockSpec((1, 4 * Hp), lambda b, t: (0, 0), **const_kw),       # bias
            pl.BlockSpec((Hp, Lp), lambda b, t: (0, 0), **const_kw),          # W_out^T
            pl.BlockSpec((1, Lp), lambda b, t: (0, 0), **const_kw),           # b_out
        ]
        grid_spec = pltpu.PrefetchScalarGridSpec(
            num_scalar_prefetch=0,
            grid=grid,
            in_specs=in_specs,
            out_specs=pl.BlockSpec((b_blk, Lp), lambda b, t: (b, 0)),
            scratch_shapes=[
                pltpu.VMEM((b_blk, Hp), jnp.float32),                         # h
                pltpu.VMEM((b_blk, Hp), jnp.float32),                         # c
                pltpu.VMEM((b_blk, Hp), jnp.float32),                         # sum(h_t)
                pltpu.VMEM((n_slots * chunk_rows, 4 * Hp), jnp.float32),      # xg slots
            ],
        )
        return pl.pallas_call(
            kernel,
            out_shape=jax.ShapeDtypeStruct((B, Lp), jnp.float32),
            grid_spec=grid_spec,
            compiler_params=pltpu.CompilerParams(
                dimension_semantics=("parallel", "arbitrary"),
                vmem_limit_bytes=vmem_limit),
            cost_estimate=pl.CostEstimate(
                flops=flops, transcendentals=transcendentals,
                bytes_accessed=bytes_accessed),
        )

    try:
        logits_p = build_call(True)(vecs_in, wih_p, whh_p, b_p, wout_p, bout_p)
    except Exception:
        # Fallback if pl.Buffered(1) is not supported by this jax build.
        logits_p = build_call(False)(vecs_in, wih_p, whh_p, b_p, wout_p, bout_p)

    return logits_p[:, :L]


def reference_forward(vecs, w_ih, w_hh, b_ih, b_hh, w_out, b_out):
    """Pure-JAX reference with the same numerics (bf16 matmul operands, f32 acc/state)."""
    T, B, E = vecs.shape
    H = w_hh.shape[1]
    wih = jnp.transpose(w_ih).astype(jnp.bfloat16)
    whh = jnp.transpose(w_hh).astype(jnp.bfloat16)
    b = (b_ih + b_hh).astype(jnp.float32)
    vb = vecs.astype(jnp.bfloat16)
    h = jnp.zeros((B, H), jnp.float32)
    c = jnp.zeros((B, H), jnp.float32)
    s = jnp.zeros((B, H), jnp.float32)
    for t in range(T):
        xg = jnp.dot(vb[t], wih, preferred_element_type=jnp.float32) + b
        gates = xg + jnp.dot(h.astype(jnp.bfloat16), whh, preferred_element_type=jnp.float32)
        i = jax.nn.sigmoid(gates[:, 0:H])
        f = jax.nn.sigmoid(gates[:, H:2 * H])
        g = jnp.tanh(gates[:, 2 * H:3 * H])
        o = jax.nn.sigmoid(gates[:, 3 * H:4 * H])
        c = f * c + i * g
        h = o * jnp.tanh(c)
        s = s + h
    return (s / T) @ jnp.transpose(w_out).astype(jnp.float32) + b_out.astype(jnp.float32)


if __name__ == "__main__":
    def run_case(case_id, T, B, V, E, H, L, t_chunk=None):
        key = jax.random.fold_in(jax.random.PRNGKey(0), case_id)
        k_emb, k_idx, k1, k2, k3, k4, k5, k6 = jax.random.split(key, 8)

        # Embedding table (padding_idx=1 row zeroed, like nn.Embedding(padding_idx=1)).
        embed = jax.random.normal(k_emb, (V, E), jnp.float32)
        embed = embed.at[1].set(0.0)
        text = jax.random.randint(k_idx, (T, B), 0, V, dtype=jnp.int32)   # [T, B] time-major

        scale = 1.0 / jnp.sqrt(jnp.float32(H))
        w_ih = jax.random.uniform(k1, (4 * H, E), jnp.float32, -scale, scale)
        w_hh = jax.random.uniform(k2, (4 * H, H), jnp.float32, -scale, scale)
        b_ih = jax.random.uniform(k3, (4 * H,), jnp.float32, -scale, scale)
        b_hh = jax.random.uniform(k4, (4 * H,), jnp.float32, -scale, scale)
        w_out = jax.random.uniform(k5, (L, H), jnp.float32, -scale, scale)
        b_out = jax.random.uniform(k6, (L,), jnp.float32, -scale, scale)

        vecs = jnp.take(embed, text, axis=0)        # [T, B, E] embedding lookup (glue)

        logits = lstm_mean_sentiment(vecs, w_ih, w_hh, b_ih, b_hh, w_out, b_out,
                                     t_chunk=t_chunk)
        logits = jax.block_until_ready(logits)

        ref = reference_forward(vecs, w_ih, w_hh, b_ih, b_hh, w_out, b_out)
        assert logits.shape == (B, L)
        err = float(jnp.max(jnp.abs(logits - ref)))
        assert err < 2e-3, f"case {case_id}: max abs err {err}"

    # Case 1: single-chunk path (T divisible by the chunk, no masking, no skew).
    run_case(0, T=8, B=2, V=100, E=16, H=32, L=2)
    # Case 2: multi-chunk skewed pipeline + ragged masked tail (T=13 not chunk-divisible),
    #         odd batch (B=3) and padded hidden lanes (H=8 -> 128).
    run_case(1, T=13, B=3, V=50, E=20, H=8, L=3, t_chunk=4)

    print("KERNEL_OK")
</pallas_src>

<mosaic_0001>
module attributes {stable_mosaic.version = 11 : i64} {
  func.func @kernel(%arg0: i32, %arg1: i32, %arg2: memref<16x16xf32, #tpu.memory_space<vmem>>, %arg3: memref<16x512xbf16, #tpu.memory_space<vmem>>, %arg4: memref<128x512xbf16, #tpu.memory_space<vmem>>, %arg5: memref<1x512xf32, #tpu.memory_space<vmem>>, %arg6: memref<128x128xf32, #tpu.memory_space<vmem>>, %arg7: memref<1x128xf32, #tpu.memory_space<vmem>>, %arg8: memref<2x128xf32, #tpu.memory_space<vmem>>, %arg9: memref<2x128xf32, #tpu.memory_space<vmem>>, %arg10: memref<2x128xf32, #tpu.memory_space<vmem>>, %arg11: memref<2x128xf32, #tpu.memory_space<vmem>>, %arg12: memref<16x512xf32, #tpu.memory_space<vmem>>) attributes {dimension_semantics = [#tpu.dimension_semantics<parallel>, #tpu.dimension_semantics<arbitrary>], iteration_bounds = array<i64: 1, 1>, scalar_prefetch = 0 : i64, scratch_operands = 4 : i64, tpu.core_type = #tpu.core_type<tc>, window_params = [{transform_indices = @transform_0, window_bounds = array<i64: 16, 16>}, {pipeline_mode = #tpu.pipeline_mode<synchronous>, transform_indices = @transform_1, window_bounds = array<i64: 16, 512>}, {pipeline_mode = #tpu.pipeline_mode<synchronous>, transform_indices = @transform_2, window_bounds = array<i64: 128, 512>}, {pipeline_mode = #tpu.pipeline_mode<synchronous>, transform_indices = @transform_3, window_bounds = array<i64: 1, 512>}, {pipeline_mode = #tpu.pipeline_mode<synchronous>, transform_indices = @transform_4, window_bounds = array<i64: 128, 128>}, {pipeline_mode = #tpu.pipeline_mode<synchronous>, transform_indices = @transform_5, window_bounds = array<i64: 1, 128>}, {transform_indices = @transform_6, window_bounds = array<i64: 2, 128>}]} {
    %c0_i32 = arith.constant 0 : i32
    %0 = arith.cmpi eq, %arg1, %c0_i32 : i32
    %1 = arith.extui %0 : i1 to i32
    %c0_i32_0 = arith.constant 0 : i32
    %2 = arith.cmpi ne, %1, %c0_i32_0 : i32
    scf.if %2 {
      %cst_95 = arith.constant 0.000000e+00 : f32
      %294 = vector.broadcast %cst_95 : f32 to vector<2x128xf32>
      %c0_96 = arith.constant 0 : index
      %c0_97 = arith.constant 0 : index
      %295 = vector.load %arg9[%c0_96, %c0_97] : memref<2x128xf32, #tpu.memory_space<vmem>>, vector<2x128xf32>
      tpu.vector_store %arg9[%c0_96, %c0_97], %294 {strides = array<i32>} : memref<2x128xf32, #tpu.memory_space<vmem>>, vector<2x128xf32>,
      %cst_98 = arith.constant 0.000000e+00 : f32
      %296 = vector.broadcast %cst_98 : f32 to vector<2x128xf32>
      %c0_99 = arith.constant 0 : index
      %c0_100 = arith.constant 0 : index
      %297 = vector.load %arg10[%c0_99, %c0_100] : memref<2x128xf32, #tpu.memory_space<vmem>>, vector<2x128xf32>
      tpu.vector_store %arg10[%c0_99, %c0_100], %296 {strides = array<i32>} : memref<2x128xf32, #tpu.memory_space<vmem>>, vector<2x128xf32>,
      %cst_101 = arith.constant 0.000000e+00 : f32
      %298 = vector.broadcast %cst_101 : f32 to vector<2x128xf32>
      %c0_102 = arith.constant 0 : index
      %c0_103 = arith.constant 0 : index
      %299 = vector.load %arg11[%c0_102, %c0_103] : memref<2x128xf32, #tpu.memory_space<vmem>>, vector<2x128xf32>
      tpu.vector_store %arg11[%c0_102, %c0_103], %298 {strides = array<i32>} : memref<2x128xf32, #tpu.memory_space<vmem>>, vector<2x128xf32>,
    } else {
    }
    %c0 = arith.constant 0 : index
    %c0_1 = arith.constant 0 : index
    %3 = vector.load %arg2[%c0, %c0_1] : memref<16x16xf32, #tpu.memory_space<vmem>>, vector<16x16xf32>
    %4 = arith.truncf %3 : vector<16x16xf32> to vector<16x16xbf16>
    %c0_2 = arith.constant 0 : index
    %c0_3 = arith.constant 0 : index
    %5 = vector.load %arg3[%c0_2, %c0_3] : memref<16x512xbf16, #tpu.memory_space<vmem>>, vector<16x512xbf16>
    %cst = arith.constant dense<0.000000e+00> : vector<16x512xf32>
    %6 = tpu.matmul %4, %5, %cst {dimension_numbers = #tpu.dot_dimension_numbers<[1], [0], [0], [1], [0, 0, 1, 1], [], []>} : vector<16x16xbf16>, vector<16x512xbf16>, vector<16x512xf32> -> vector<16x512xf32>
    %c0_4 = arith.constant 0 : index
    %c0_5 = arith.constant 0 : index
    %7 = vector.load %arg5[%c0_4, %c0_5] : memref<1x512xf32, #tpu.memory_space<vmem>>, vector<1x512xf32>
    %8 = vector.broadcast %7 : vector<1x512xf32> to vector<16x512xf32>
    %9 = arith.addf %6, %8 : vector<16x512xf32>
    %c0_i32_6 = arith.constant 0 : i32
    %10 = tpu.assume_multiple %c0_i32_6, 16 : i32
    %11 = arith.index_cast %10 : i32 to index
    %c0_7 = arith.constant 0 : index
    %12 = vector.load %arg12[%11, %c0_7] : memref<16x512xf32, #tpu.memory_space<vmem>>, vector<16x512xf32>
    tpu.vector_store %arg12[%11, %c0_7], %9 {strides = array<i32>} : memref<16x512xf32, #tpu.memory_space<vmem>>, vector<16x512xf32>,
    %c0_8 = arith.constant 0 : index
    %c0_9 = arith.constant 0 : index
    %13 = vector.load %arg9[%c0_8, %c0_9] : memref<2x128xf32, #tpu.memory_space<vmem>>, vector<2x128xf32>
    %c0_10 = arith.constant 0 : index
    %c0_11 = arith.constant 0 : index
    %14 = vector.load %arg10[%c0_10, %c0_11] : memref<2x128xf32, #tpu.memory_space<vmem>>, vector<2x128xf32>
    %c0_12 = arith.constant 0 : index
    %c0_13 = arith.constant 0 : index
    %15 = vector.load %arg11[%c0_12, %c0_13] : memref<2x128xf32, #tpu.memory_space<vmem>>, vector<2x128xf32>
    %c0_i32_14 = arith.constant 0 : i32
    %c2_i32 = arith.constant 2 : i32
    %16 = arith.muli %c0_i32_14, %c2_i32 : i32
    %c0_i32_15 = arith.constant 0 : i32
    %17 = arith.addi %c0_i32_15, %16 : i32
    %18 = arith.index_cast %17 : i32 to index
    %c0_16 = arith.constant 0 : index
    %19 = vector.load %arg12[%18, %c0_16] : memref<16x512xf32, #tpu.memory_space<vmem>>, vector<2x512xf32>
    %20 = arith.truncf %13 : vector<2x128xf32> to vector<2x128xbf16>
    %c0_17 = arith.constant 0 : index
    %c0_18 = arith.constant 0 : index
    %21 = vector.load %arg4[%c0_17, %c0_18] : memref<128x512xbf16, #tpu.memory_space<vmem>>, vector<128x512xbf16>
    %cst_19 = arith.constant dense<0.000000e+00> : vector<2x512xf32>
    %22 = tpu.matmul %20, %21, %cst_19 {dimension_numbers = #tpu.dot_dimension_numbers<[1], [0], [0], [1], [0, 0, 1, 1], [], []>} : vector<2x128xbf16>, vector<128x512xbf16>, vector<2x512xf32> -> vector<2x512xf32>
    %23 = arith.addf %19, %22 : vector<2x512xf32>
    %24 = vector.extract_strided_slice %23 {offsets = [0, 0], sizes = [2, 128], strides = [1, 1]} : vector<2x512xf32> to vector<2x128xf32>
    %25 = arith.negf %24 : vector<2x128xf32>
    %26 = math.exp %25 : vector<2x128xf32>
    %cst_20 = arith.constant 1.000000e+00 : f32
    %27 = vector.broadcast %cst_20 : f32 to vector<2x128xf32>
    %28 = arith.addf %27, %26 : vector<2x128xf32>
    %29 = arith.divf %27, %28 : vector<2x128xf32>
    %30 = vector.extract_strided_slice %23 {offsets = [0, 128], sizes = [2, 128], strides = [1, 1]} : vector<2x512xf32> to vector<2x128xf32>
    %31 = arith.negf %30 : vector<2x128xf32>
    %32 = math.exp %31 : vector<2x128xf32>
    %cst_21 = arith.constant 1.000000e+00 : f32
    %33 = vector.broadcast %cst_21 : f32 to vector<2x128xf32>
    %34 = arith.addf %33, %32 : vector<2x128xf32>
    %35 = arith.divf %33, %34 : vector<2x128xf32>
    %36 = vector.extract_strided_slice %23 {offsets = [0, 256], sizes = [2, 128], strides = [1, 1]} : vector<2x512xf32> to vector<2x128xf32>
    %37 = math.tanh %36 : vector<2x128xf32>
    %38 = vector.extract_strided_slice %23 {offsets = [0, 384], sizes = [2, 128], strides = [1, 1]} : vector<2x512xf32> to vector<2x128xf32>
    %39 = arith.negf %38 : vector<2x128xf32>
    %40 = math.exp %39 : vector<2x128xf32>
    %cst_22 = arith.constant 1.000000e+00 : f32
    %41 = vector.broadcast %cst_22 : f32 to vector<2x128xf32>
    %42 = arith.addf %41, %40 : vector<2x128xf32>
    %43 = arith.divf %41, %42 : vector<2x128xf32>
    %44 = arith.mulf %35, %14 : vector<2x128xf32>
    %45 = arith.mulf %29, %37 : vector<2x128xf32>
    %46 = arith.addf %44, %45 : vector<2x128xf32>
    %47 = math.tanh %46 : vector<2x128xf32>
    %48 = arith.mulf %43, %47 : vector<2x128xf32>
    %49 = arith.addf %15, %48 : vector<2x128xf32>
    %c1_i32 = arith.constant 1 : i32
    %c2_i32_23 = arith.constant 2 : i32
    %50 = arith.muli %c1_i32, %c2_i32_23 : i32
    %c0_i32_24 = arith.constant 0 : i32
    %51 = arith.addi %c0_i32_24, %50 : i32
    %52 = arith.index_cast %51 : i32 to index
    %c0_25 = arith.constant 0 : index
    %53 = vector.load %arg12[%52, %c0_25] : memref<16x512xf32, #tpu.memory_space<vmem>>, vector<2x512xf32>
    %54 = arith.truncf %48 : vector<2x128xf32> to vector<2x128xbf16>
    %c0_26 = arith.constant 0 : index
    %c0_27 = arith.constant 0 : index
    %55 = vector.load %arg4[%c0_26, %c0_27] : memref<128x512xbf16, #tpu.memory_space<vmem>>, vector<128x512xbf16>
    %cst_28 = arith.constant dense<0.000000e+00> : vector<2x512xf32>
    %56 = tpu.matmul %54, %55, %cst_28 {dimension_numbers = #tpu.dot_dimension_numbers<[1], [0], [0], [1], [0, 0, 1, 1], [], []>} : vector<2x128xbf16>, vector<128x512xbf16>, vector<2x512xf32> -> vector<2x512xf32>
    %57 = arith.addf %53, %56 : vector<2x512xf32>
    %58 = vector.extract_strided_slice %57 {offsets = [0, 0], sizes = [2, 128], strides = [1, 1]} : vector<2x512xf32> to vector<2x128xf32>
    %59 = arith.negf %58 : vector<2x128xf32>
    %60 = math.exp %59 : vector<2x128xf32>
    %cst_29 = arith.constant 1.000000e+00 : f32
    %61 = vector.broadcast %cst_29 : f32 to vector<2x128xf32>
    %62 = arith.addf %61, %60 : vector<2x128xf32>
    %63 = arith.divf %61, %62 : vector<2x128xf32>
    %64 = vector.extract_strided_slice %57 {offsets = [0, 128], sizes = [2, 128], strides = [1, 1]} : vector<2x512xf32> to vector<2x128xf32>
    %65 = arith.negf %64 : vector<2x128xf32>
    %66 = math.exp %65 : vector<2x128xf32>
    %cst_30 = arith.constant 1.000000e+00 : f32
    %67 = vector.broadcast %cst_30 : f32 to vector<2x128xf32>
    %68 = arith.addf %67, %66 : vector<2x128xf32>
    %69 = arith.divf %67, %68 : vector<2x128xf32>
    %70 = vector.extract_strided_slice %57 {offsets = [0, 256], sizes = [2, 128], strides = [1, 1]} : vector<2x512xf32> to vector<2x128xf32>
    %71 = math.tanh %70 : vector<2x128xf32>
    %72 = vector.extract_strided_slice %57 {offsets = [0, 384], sizes = [2, 128], strides = [1, 1]} : vector<2x512xf32> to vector<2x128xf32>
    %73 = arith.negf %72 : vector<2x128xf32>
    %74 = math.exp %73 : vector<2x128xf32>
    %cst_31 = arith.constant 1.000000e+00 : f32
    %75 = vector.broadcast %cst_31 : f32 to vector<2x128xf32>
    %76 = arith.addf %75, %74 : vector<2x128xf32>
    %77 = arith.divf %75, %76 : vector<2x128xf32>
    %78 = arith.mulf %69, %46 : vector<2x128xf32>
    %79 = arith.mulf %63, %71 : vector<2x128xf32>
    %80 = arith.addf %78, %79 : vector<2x128xf32>
    %81 = math.tanh %80 : vector<2x128xf32>
    %82 = arith.mulf %77, %81 : vector<2x128xf32>
    %83 = arith.addf %49, %82 : vector<2x128xf32>
    %c2_i32_32 = arith.constant 2 : i32
    %c2_i32_33 = arith.constant 2 : i32
    %84 = arith.muli %c2_i32_32, %c2_i32_33 : i32
    %c0_i32_34 = arith.constant 0 : i32
    %85 = arith.addi %c0_i32_34, %84 : i32
    %86 = arith.index_cast %85 : i32 to index
    %c0_35 = arith.constant 0 : index
    %87 = vector.load %arg12[%86, %c0_35] : memref<16x512xf32, #tpu.memory_space<vmem>>, vector<2x512xf32>
    %88 = arith.truncf %82 : vector<2x128xf32> to vector<2x128xbf16>
    %c0_36 = arith.constant 0 : index
    %c0_37 = arith.constant 0 : index
    %89 = vector.load %arg4[%c0_36, %c0_37] : memref<128x512xbf16, #tpu.memory_space<vmem>>, vector<128x512xbf16>
    %cst_38 = arith.constant dense<0.000000e+00> : vector<2x512xf32>
    %90 = tpu.matmul %88, %89, %cst_38 {dimension_numbers = #tpu.dot_dimension_numbers<[1], [0], [0], [1], [0, 0, 1, 1], [], []>} : vector<2x128xbf16>, vector<128x512xbf16>, vector<2x512xf32> -> vector<2x512xf32>
    %91 = arith.addf %87, %90 : vector<2x512xf32>
    %92 = vector.extract_strided_slice %91 {offsets = [0, 0], sizes = [2, 128], strides = [1, 1]} : vector<2x512xf32> to vector<2x128xf32>
    %93 = arith.negf %92 : vector<2x128xf32>
    %94 = math.exp %93 : vector<2x128xf32>
    %cst_39 = arith.constant 1.000000e+00 : f32
    %95 = vector.broadcast %cst_39 : f32 to vector<2x128xf32>
    %96 = arith.addf %95, %94 : vector<2x128xf32>
    %97 = arith.divf %95, %96 : vector<2x128xf32>
    %98 = vector.extract_strided_slice %91 {offsets = [0, 128], sizes = [2, 128], strides = [1, 1]} : vector<2x512xf32> to vector<2x128xf32>
    %99 = arith.negf %98 : vector<2x128xf32>
    %100 = math.exp %99 : vector<2x128xf32>
    %cst_40 = arith.constant 1.000000e+00 : f32
    %101 = vector.broadcast %cst_40 : f32 to vector<2x128xf32>
    %102 = arith.addf %101, %100 : vector<2x128xf32>
    %103 = arith.divf %101, %102 : vector<2x128xf32>
    %104 = vector.extract_strided_slice %91 {offsets = [0, 256], sizes = [2, 128], strides = [1, 1]} : vector<2x512xf32> to vector<2x128xf32>
    %105 = math.tanh %104 : vector<2x128xf32>
    %106 = vector.extract_strided_slice %91 {offsets = [0, 384], sizes = [2, 128], strides = [1, 1]} : vector<2x512xf32> to vector<2x128xf32>
    %107 = arith.negf %106 : vector<2x128xf32>
    %108 = math.exp %107 : vector<2x128xf32>
    %cst_41 = arith.constant 1.000000e+00 : f32
    %109 = vector.broadcast %cst_41 : f32 to vector<2x128xf32>
    %110 = arith.addf %109, %108 : vector<2x128xf32>
    %111 = arith.divf %109, %110 : vector<2x128xf32>
    %112 = arith.mulf %103, %80 : vector<2x128xf32>
    %113 = arith.mulf %97, %105 : vector<2x128xf32>
    %114 = arith.addf %112, %113 : vector<2x128xf32>
    %115 = math.tanh %114 : vector<2x128xf32>
    %116 = arith.mulf %111, %115 : vector<2x128xf32>
    %117 = arith.addf %83, %116 : vector<2x128xf32>
    %c3_i32 = arith.constant 3 : i32
    %c2_i32_42 = arith.constant 2 : i32
    %118 = arith.muli %c3_i32, %c2_i32_42 : i32
    %c0_i32_43 = arith.constant 0 : i32
    %119 = arith.addi %c0_i32_43, %118 : i32
    %120 = arith.index_cast %119 : i32 to index
    %c0_44 = arith.constant 0 : index
    %121 = vector.load %arg12[%120, %c0_44] : memref<16x512xf32, #tpu.memory_space<vmem>>, vector<2x512xf32>
    %122 = arith.truncf %116 : vector<2x128xf32> to vector<2x128xbf16>
    %c0_45 = arith.constant 0 : index
    %c0_46 = arith.constant 0 : index
    %123 = vector.load %arg4[%c0_45, %c0_46] : memref<128x512xbf16, #tpu.memory_space<vmem>>, vector<128x512xbf16>
    %cst_47 = arith.constant dense<0.000000e+00> : vector<2x512xf32>
    %124 = tpu.matmul %122, %123, %cst_47 {dimension_numbers = #tpu.dot_dimension_numbers<[1], [0], [0], [1], [0, 0, 1, 1], [], []>} : vector<2x128xbf16>, vector<128x512xbf16>, vector<2x512xf32> -> vector<2x512xf32>
    %125 = arith.addf %121, %124 : vector<2x512xf32>
    %126 = vector.extract_strided_slice %125 {offsets = [0, 0], sizes = [2, 128], strides = [1, 1]} : vector<2x512xf32> to vector<2x128xf32>
    %127 = arith.negf %126 : vector<2x128xf32>
    %128 = math.exp %127 : vector<2x128xf32>
    %cst_48 = arith.constant 1.000000e+00 : f32
    %129 = vector.broadcast %cst_48 : f32 to vector<2x128xf32>
    %130 = arith.addf %129, %128 : vector<2x128xf32>
    %131 = arith.divf %129, %130 : vector<2x128xf32>
    %132 = vector.extract_strided_slice %125 {offsets = [0, 128], sizes = [2, 128], strides = [1, 1]} : vector<2x512xf32> to vector<2x128xf32>
    %133 = arith.negf %132 : vector<2x128xf32>
    %134 = math.exp %133 : vector<2x128xf32>
    %cst_49 = arith.constant 1.000000e+00 : f32
    %135 = vector.broadcast %cst_49 : f32 to vector<2x128xf32>
    %136 = arith.addf %135, %134 : vector<2x128xf32>
    %137 = arith.divf %135, %136 : vector<2x128xf32>
    %138 = vector.extract_strided_slice %125 {offsets = [0, 256], sizes = [2, 128], strides = [1, 1]} : vector<2x512xf32> to vector<2x128xf32>
    %139 = math.tanh %138 : vector<2x128xf32>
    %140 = vector.extract_strided_slice %125 {offsets = [0, 384], sizes = [2, 128], strides = [1, 1]} : vector<2x512xf32> to vector<2x128xf32>
    %141 = arith.negf %140 : vector<2x128xf32>
    %142 = math.exp %141 : vector<2x128xf32>
    %cst_50 = arith.constant 1.000000e+00 : f32
    %143 = vector.broadcast %cst_50 : f32 to vector<2x128xf32>
    %144 = arith.addf %143, %142 : vector<2x128xf32>
    %145 = arith.divf %143, %144 : vector<2x128xf32>
    %146 = arith.mulf %137, %114 : vector<2x128xf32>
    %147 = arith.mulf %131, %139 : vector<2x128xf32>
    %148 = arith.addf %146, %147 : vector<2x128xf32>
    %149 = math.tanh %148 : vector<2x128xf32>
    %150 = arith.mulf %145, %149 : vector<2x128xf32>
    %151 = arith.addf %117, %150 : vector<2x128xf32>
    %c4_i32 = arith.constant 4 : i32
    %c2_i32_51 = arith.constant 2 : i32
    %152 = arith.muli %c4_i32, %c2_i32_51 : i32
    %c0_i32_52 = arith.constant 0 : i32
    %153 = arith.addi %c0_i32_52, %152 : i32
    %154 = arith.index_cast %153 : i32 to index
    %c0_53 = arith.constant 0 : index
    %155 = vector.load %arg12[%154, %c0_53] : memref<16x512xf32, #tpu.memory_space<vmem>>, vector<2x512xf32>
    %156 = arith.truncf %150 : vector<2x128xf32> to vector<2x128xbf16>
    %c0_54 = arith.constant 0 : index
    %c0_55 = arith.constant 0 : index
    %157 = vector.load %arg4[%c0_54, %c0_55] : memref<128x512xbf16, #tpu.memory_space<vmem>>, vector<128x512xbf16>
    %cst_56 = arith.constant dense<0.000000e+00> : vector<2x512xf32>
    %158 = tpu.matmul %156, %157, %cst_56 {dimension_numbers = #tpu.dot_dimension_numbers<[1], [0], [0], [1], [0, 0, 1, 1], [], []>} : vector<2x128xbf16>, vector<128x512xbf16>, vector<2x512xf32> -> vector<2x512xf32>
    %159 = arith.addf %155, %158 : vector<2x512xf32>
    %160 = vector.extract_strided_slice %159 {offsets = [0, 0], sizes = [2, 128], strides = [1, 1]} : vector<2x512xf32> to vector<2x128xf32>
    %161 = arith.negf %160 : vector<2x128xf32>
    %162 = math.exp %161 : vector<2x128xf32>
    %cst_57 = arith.constant 1.000000e+00 : f32
    %163 = vector.broadcast %cst_57 : f32 to vector<2x128xf32>
    %164 = arith.addf %163, %162 : vector<2x128xf32>
    %165 = arith.divf %163, %164 : vector<2x128xf32>
    %166 = vector.extract_strided_slice %159 {offsets = [0, 128], sizes = [2, 128], strides = [1, 1]} : vector<2x512xf32> to vector<2x128xf32>
    %167 = arith.negf %166 : vector<2x128xf32>
    %168 = math.exp %167 : vector<2x128xf32>
    %cst_58 = arith.constant 1.000000e+00 : f32
    %169 = vector.broadcast %cst_58 : f32 to vector<2x128xf32>
    %170 = arith.addf %169, %168 : vector<2x128xf32>
    %171 = arith.divf %169, %170 : vector<2x128xf32>
    %172 = vector.extract_strided_slice %159 {offsets = [0, 256], sizes = [2, 128], strides = [1, 1]} : vector<2x512xf32> to vector<2x128xf32>
    %173 = math.tanh %172 : vector<2x128xf32>
    %174 = vector.extract_strided_slice %159 {offsets = [0, 384], sizes = [2, 128], strides = [1, 1]} : vector<2x512xf32> to vector<2x128xf32>
    %175 = arith.negf %174 : vector<2x128xf32>
    %176 = math.exp %175 : vector<2x128xf32>
    %cst_59 = arith.constant 1.000000e+00 : f32
    %177 = vector.broadcast %cst_59 : f32 to vector<2x128xf32>
    %178 = arith.addf %177, %176 : vector<2x128xf32>
    %179 = arith.divf %177, %178 : vector<2x128xf32>
    %180 = arith.mulf %171, %148 : vector<2x128xf32>
    %181 = arith.mulf %165, %173 : vector<2x128xf32>
    %182 = arith.addf %180, %181 : vector<2x128xf32>
    %183 = math.tanh %182 : vector<2x128xf32>
    %184 = arith.mulf %179, %183 : vector<2x128xf32>
    %185 = arith.addf %151, %184 : vector<2x128xf32>
    %c5_i32 = arith.constant 5 : i32
    %c2_i32_60 = arith.constant 2 : i32
    %186 = arith.muli %c5_i32, %c2_i32_60 : i32
    %c0_i32_61 = arith.constant 0 : i32
    %187 = arith.addi %c0_i32_61, %186 : i32
    %188 = arith.index_cast %187 : i32 to index
    %c0_62 = arith.constant 0 : index
    %189 = vector.load %arg12[%188, %c0_62] : memref<16x512xf32, #tpu.memory_space<vmem>>, vector<2x512xf32>
    %190 = arith.truncf %184 : vector<2x128xf32> to vector<2x128xbf16>
    %c0_63 = arith.constant 0 : index
    %c0_64 = arith.constant 0 : index
    %191 = vector.load %arg4[%c0_63, %c0_64] : memref<128x512xbf16, #tpu.memory_space<vmem>>, vector<128x512xbf16>
    %cst_65 = arith.constant dense<0.000000e+00> : vector<2x512xf32>
    %192 = tpu.matmul %190, %191, %cst_65 {dimension_numbers = #tpu.dot_dimension_numbers<[1], [0], [0], [1], [0, 0, 1, 1], [], []>} : vector<2x128xbf16>, vector<128x512xbf16>, vector<2x512xf32> -> vector<2x512xf32>
    %193 = arith.addf %189, %192 : vector<2x512xf32>
    %194 = vector.extract_strided_slice %193 {offsets = [0, 0], sizes = [2, 128], strides = [1, 1]} : vector<2x512xf32> to vector<2x128xf32>
    %195 = arith.negf %194 : vector<2x128xf32>
    %196 = math.exp %195 : vector<2x128xf32>
    %cst_66 = arith.constant 1.000000e+00 : f32
    %197 = vector.broadcast %cst_66 : f32 to vector<2x128xf32>
    %198 = arith.addf %197, %196 : vector<2x128xf32>
    %199 = arith.divf %197, %198 : vector<2x128xf32>
    %200 = vector.extract_strided_slice %193 {offsets = [0, 128], sizes = [2, 128], strides = [1, 1]} : vector<2x512xf32> to vector<2x128xf32>
    %201 = arith.negf %200 : vector<2x128xf32>
    %202 = math.exp %201 : vector<2x128xf32>
    %cst_67 = arith.constant 1.000000e+00 : f32
    %203 = vector.broadcast %cst_67 : f32 to vector<2x128xf32>
    %204 = arith.addf %203, %202 : vector<2x128xf32>
    %205 = arith.divf %203, %204 : vector<2x128xf32>
    %206 = vector.extract_strided_slice %193 {offsets = [0, 256], sizes = [2, 128], strides = [1, 1]} : vector<2x512xf32> to vector<2x128xf32>
    %207 = math.tanh %206 : vector<2x128xf32>
    %208 = vector.extract_strided_slice %193 {offsets = [0, 384], sizes = [2, 128], strides = [1, 1]} : vector<2x512xf32> to vector<2x128xf32>
    %209 = arith.negf %208 : vector<2x128xf32>
    %210 = math.exp %209 : vector<2x128xf32>
    %cst_68 = arith.constant 1.000000e+00 : f32
    %211 = vector.broadcast %cst_68 : f32 to vector<2x128xf32>
    %212 = arith.addf %211, %210 : vector<2x128xf32>
    %213 = arith.divf %211, %212 : vector<2x128xf32>
    %214 = arith.mulf %205, %182 : vector<2x128xf32>
    %215 = arith.mulf %199, %207 : vector<2x128xf32>
    %216 = arith.addf %214, %215 : vector<2x128xf32>
    %217 = math.tanh %216 : vector<2x128xf32>
    %218 = arith.mulf %213, %217 : vector<2x128xf32>
    %219 = arith.addf %185, %218 : vector<2x128xf32>
    %c6_i32 = arith.constant 6 : i32
    %c2_i32_69 = arith.constant 2 : i32
    %220 = arith.muli %c6_i32, %c2_i32_69 : i32
    %c0_i32_70 = arith.constant 0 : i32
    %221 = arith.addi %c0_i32_70, %220 : i32
    %222 = arith.index_cast %221 : i32 to index
    %c0_71 = arith.constant 0 : index
    %223 = vector.load %arg12[%222, %c0_71] : memref<16x512xf32, #tpu.memory_space<vmem>>, vector<2x512xf32>
    %224 = arith.truncf %218 : vector<2x128xf32> to vector<2x128xbf16>
    %c0_72 = arith.constant 0 : index
    %c0_73 = arith.constant 0 : index
    %225 = vector.load %arg4[%c0_72, %c0_73] : memref<128x512xbf16, #tpu.memory_space<vmem>>, vector<128x512xbf16>
    %cst_74 = arith.constant dense<0.000000e+00> : vector<2x512xf32>
    %226 = tpu.matmul %224, %225, %cst_74 {dimension_numbers = #tpu.dot_dimension_numbers<[1], [0], [0], [1], [0, 0, 1, 1], [], []>} : vector<2x128xbf16>, vector<128x512xbf16>, vector<2x512xf32> -> vector<2x512xf32>
    %227 = arith.addf %223, %226 : vector<2x512xf32>
    %228 = vector.extract_strided_slice %227 {offsets = [0, 0], sizes = [2, 128], strides = [1, 1]} : vector<2x512xf32> to vector<2x128xf32>
    %229 = arith.negf %228 : vector<2x128xf32>
    %230 = math.exp %229 : vector<2x128xf32>
    %cst_75 = arith.constant 1.000000e+00 : f32
    %231 = vector.broadcast %cst_75 : f32 to vector<2x128xf32>
    %232 = arith.addf %231, %230 : vector<2x128xf32>
    %233 = arith.divf %231, %232 : vector<2x128xf32>
    %234 = vector.extract_strided_slice %227 {offsets = [0, 128], sizes = [2, 128], strides = [1, 1]} : vector<2x512xf32> to vector<2x128xf32>
    %235 = arith.negf %234 : vector<2x128xf32>
    %236 = math.exp %235 : vector<2x128xf32>
    %cst_76 = arith.constant 1.000000e+00 : f32
    %237 = vector.broadcast %cst_76 : f32 to vector<2x128xf32>
    %238 = arith.addf %237, %236 : vector<2x128xf32>
    %239 = arith.divf %237, %238 : vector<2x128xf32>
    %240 = vector.extract_strided_slice %227 {offsets = [0, 256], sizes = [2, 128], strides = [1, 1]} : vector<2x512xf32> to vector<2x128xf32>
    %241 = math.tanh %240 : vector<2x128xf32>
    %242 = vector.extract_strided_slice %227 {offsets = [0, 384], sizes = [2, 128], strides = [1, 1]} : vector<2x512xf32> to vector<2x128xf32>
    %243 = arith.negf %242 : vector<2x128xf32>
    %244 = math.exp %243 : vector<2x128xf32>
    %cst_77 = arith.constant 1.000000e+00 : f32
    %245 = vector.broadcast %cst_77 : f32 to vector<2x128xf32>
    %246 = arith.addf %245, %244 : vector<2x128xf32>
    %247 = arith.divf %245, %246 : vector<2x128xf32>
    %248 = arith.mulf %239, %216 : vector<2x128xf32>
    %249 = arith.mulf %233, %241 : vector<2x128xf32>
    %250 = arith.addf %248, %249 : vector<2x128xf32>
    %251 = math.tanh %250 : vector<2x128xf32>
    %252 = arith.mulf %247, %251 : vector<2x128xf32>
    %253 = arith.addf %219, %252 : vector<2x128xf32>
    %c7_i32 = arith.constant 7 : i32
    %c2_i32_78 = arith.constant 2 : i32
    %254 = arith.muli %c7_i32, %c2_i32_78 : i32
    %c0_i32_79 = arith.constant 0 : i32
    %255 = arith.addi %c0_i32_79, %254 : i32
    %256 = arith.index_cast %255 : i32 to index
    %c0_80 = arith.constant 0 : index
    %257 = vector.load %arg12[%256, %c0_80] : memref<16x512xf32, #tpu.memory_space<vmem>>, vector<2x512xf32>
    %258 = arith.truncf %252 : vector<2x128xf32> to vector<2x128xbf16>
    %c0_81 = arith.constant 0 : index
    %c0_82 = arith.constant 0 : index
    %259 = vector.load %arg4[%c0_81, %c0_82] : memref<128x512xbf16, #tpu.memory_space<vmem>>, vector<128x512xbf16>
    %cst_83 = arith.constant dense<0.000000e+00> : vector<2x512xf32>
    %260 = tpu.matmul %258, %259, %cst_83 {dimension_numbers = #tpu.dot_dimension_numbers<[1], [0], [0], [1], [0, 0, 1, 1], [], []>} : vector<2x128xbf16>, vector<128x512xbf16>, vector<2x512xf32> -> vector<2x512xf32>
    %261 = arith.addf %257, %260 : vector<2x512xf32>
    %262 = vector.extract_strided_slice %261 {offsets = [0, 0], sizes = [2, 128], strides = [1, 1]} : vector<2x512xf32> to vector<2x128xf32>
    %263 = arith.negf %262 : vector<2x128xf32>
    %264 = math.exp %263 : vector<2x128xf32>
    %cst_84 = arith.constant 1.000000e+00 : f32
    %265 = vector.broadcast %cst_84 : f32 to vector<2x128xf32>
    %266 = arith.addf %265, %264 : vector<2x128xf32>
    %267 = arith.divf %265, %266 : vector<2x128xf32>
    %268 = vector.extract_strided_slice %261 {offsets = [0, 128], sizes = [2, 128], strides = [1, 1]} : vector<2x512xf32> to vector<2x128xf32>
    %269 = arith.negf %268 : vector<2x128xf32>
    %270 = math.exp %269 : vector<2x128xf32>
    %cst_85 = arith.constant 1.000000e+00 : f32
    %271 = vector.broadcast %cst_85 : f32 to vector<2x128xf32>
    %272 = arith.addf %271, %270 : vector<2x128xf32>
    %273 = arith.divf %271, %272 : vector<2x128xf32>
    %274 = vector.extract_strided_slice %261 {offsets = [0, 256], sizes = [2, 128], strides = [1, 1]} : vector<2x512xf32> to vector<2x128xf32>
    %275 = math.tanh %274 : vector<2x128xf32>
    %276 = vector.extract_strided_slice %261 {offsets = [0, 384], sizes = [2, 128], strides = [1, 1]} : vector<2x512xf32> to vector<2x128xf32>
    %277 = arith.negf %276 : vector<2x128xf32>
    %278 = math.exp %277 : vector<2x128xf32>
    %cst_86 = arith.constant 1.000000e+00 : f32
    %279 = vector.broadcast %cst_86 : f32 to vector<2x128xf32>
    %280 = arith.addf %279, %278 : vector<2x128xf32>
    %281 = arith.divf %279, %280 : vector<2x128xf32>
    %282 = arith.mulf %273, %250 : vector<2x128xf32>
    %283 = arith.mulf %267, %275 : vector<2x128xf32>
    %284 = arith.addf %282, %283 : vector<2x128xf32>
    %285 = math.tanh %284 : vector<2x128xf32>
    %286 = arith.mulf %281, %285 : vector<2x128xf32>
    %287 = arith.addf %253, %286 : vector<2x128xf32>
    %c8_i32 = arith.constant 8 : i32
    %c0_87 = arith.constant 0 : index
    %c0_88 = arith.constant 0 : index
    %288 = vector.load %arg9[%c0_87, %c0_88] : memref<2x128xf32, #tpu.memory_space<vmem>>, vector<2x128xf32>
    tpu.vector_store %arg9[%c0_87, %c0_88], %286 {strides = array<i32>} : memref<2x128xf32, #tpu.memory_space<vmem>>, vector<2x128xf32>,
    %c0_89 = arith.constant 0 : index
    %c0_90 = arith.constant 0 : index
    %289 = vector.load %arg10[%c0_89, %c0_90] : memref<2x128xf32, #tpu.memory_space<vmem>>, vector<2x128xf32>
    tpu.vector_store %arg10[%c0_89, %c0_90], %284 {strides = array<i32>} : memref<2x128xf32, #tpu.memory_space<vmem>>, vector<2x128xf32>,
    %c0_91 = arith.constant 0 : index
    %c0_92 = arith.constant 0 : index
    %290 = vector.load %arg11[%c0_91, %c0_92] : memref<2x128xf32, #tpu.memory_space<vmem>>, vector<2x128xf32>
    tpu.vector_store %arg11[%c0_91, %c0_92], %287 {strides = array<i32>} : memref<2x128xf32, #tpu.memory_space<vmem>>, vector<2x128xf32>,
    %c0_i32_93 = arith.constant 0 : i32
    %291 = arith.cmpi eq, %arg1, %c0_i32_93 : i32
    %292 = arith.extui %291 : i1 to i32
    %c0_i32_94 = arith.constant 0 : i32
    %293 = arith.cmpi ne, %292, %c0_i32_94 : i32
    scf.if %293 {
      %c0_95 = arith.constant 0 : index
      %c0_96 = arith.constant 0 : index
      %294 = vector.load %arg11[%c0_95, %c0_96] : memref<2x128xf32, #tpu.memory_space<vmem>>, vector<2x128xf32>
      %cst_97 = arith.constant 1.250000e-01 : f32
      %295 = vector.broadcast %cst_97 : f32 to vector<2x128xf32>
      %296 = arith.mulf %294, %295 : vector<2x128xf32>
      %c0_98 = arith.constant 0 : index
      %c0_99 = arith.constant 0 : index
      %297 = vector.load %arg6[%c0_98, %c0_99] : memref<128x128xf32, #tpu.memory_space<vmem>>, vector<128x128xf32>
      %cst_100 = arith.constant dense<0.000000e+00> : vector<2x128xf32>
      %298 = tpu.matmul %296, %297, %cst_100 {dimension_numbers = #tpu.dot_dimension_numbers<[1], [0], [0], [1], [0, 0, 1, 1], [], []>} : vector<2x128xf32>, vector<128x128xf32>, vector<2x128xf32> -> vector<2x128xf32>
      %c0_101 = arith.constant 0 : index
      %c0_102 = arith.constant 0 : index
      %299 = vector.load %arg7[%c0_101, %c0_102] : memref<1x128xf32, #tpu.memory_space<vmem>>, vector<1x128xf32>
      %300 = vector.broadcast %299 : vector<1x128xf32> to vector<2x128xf32>
      %301 = arith.addf %298, %300 : vector<2x128xf32>
      %c0_103 = arith.constant 0 : index
      %c0_104 = arith.constant 0 : index
      %302 = vector.load %arg8[%c0_103, %c0_104] : memref<2x128xf32, #tpu.memory_space<vmem>>, vector<2x128xf32>
      tpu.vector_store %arg8[%c0_103, %c0_104], %301 {strides = array<i32>} : memref<2x128xf32, #tpu.memory_space<vmem>>, vector<2x128xf32>,
    } else {
    }
    return
  }
  func.func @transform_0(%arg0: i32, %arg1: i32) -> (i32, i32) {
    %c0_i32 = arith.constant 0 : i32
    %c0_i32_0 = arith.constant 0 : i32
    return %arg1, %c0_i32 : i32, i32
  }
  func.func @transform_1(%arg0: i32, %arg1: i32) -> (i32, i32) {
    %c0_i32 = arith.constant 0 : i32
    %c0_i32_0 = arith.constant 0 : i32
    %c0_i32_1 = arith.constant 0 : i32
    return %c0_i32, %c0_i32_0 : i32, i32
  }
  func.func @transform_2(%arg0: i32, %arg1: i32) -> (i32, i32) {
    %c0_i32 = arith.constant 0 : i32
    %c0_i32_0 = arith.constant 0 : i32
    %c0_i32_1 = arith.constant 0 : i32
    return %c0_i32, %c0_i32_0 : i32, i32
  }
  func.func @transform_3(%arg0: i32, %arg1: i32) -> (i32, i32) {
    %c0_i32 = arith.constant 0 : i32
    %c0_i32_0 = arith.constant 0 : i32
    %c0_i32_1 = arith.constant 0 : i32
    return %c0_i32, %c0_i32_0 : i32, i32
  }
  func.func @transform_4(%arg0: i32, %arg1: i32) -> (i32, i32) {
    %c0_i32 = arith.constant 0 : i32
    %c0_i32_0 = arith.constant 0 : i32
    %c0_i32_1 = arith.constant 0 : i32
    return %c0_i32, %c0_i32_0 : i32, i32
  }
  func.func @transform_5(%arg0: i32, %arg1: i32) -> (i32, i32) {
    %c0_i32 = arith.constant 0 : i32
    %c0_i32_0 = arith.constant 0 : i32
    %c0_i32_1 = arith.constant 0 : i32
    return %c0_i32, %c0_i32_0 : i32, i32
  }
  func.func @transform_6(%arg0: i32, %arg1: i32) -> (i32, i32) {
    %c0_i32 = arith.constant 0 : i32
    %c0_i32_0 = arith.constant 0 : i32
    return %arg0, %c0_i32 : i32, i32
  }
}

module attributes {stable_mosaic.version = 11 : i64} {
  func.func @kernel(%arg0: i32, %arg1: i32, %arg2: memref<16x16xf32, #tpu.memory_space<vmem>>, %arg3: memref<16x512xbf16, #tpu.memory_space<vmem>>, %arg4: memref<128x512xbf16, #tpu.memory_space<vmem>>, %arg5: memref<1x512xf32, #tpu.memory_space<vmem>>, %arg6: memref<128x128xf32, #tpu.memory_space<vmem>>, %arg7: memref<1x128xf32, #tpu.memory_space<vmem>>, %arg8: memref<2x128xf32, #tpu.memory_space<vmem>>, %arg9: memref<2x128xf32, #tpu.memory_space<vmem>>, %arg10: memref<2x128xf32, #tpu.memory_space<vmem>>, %arg11: memref<2x128xf32, #tpu.memory_space<vmem>>, %arg12: memref<16x512xf32, #tpu.memory_space<vmem>>) attributes {dimension_semantics = [#tpu.dimension_semantics<parallel>, #tpu.dimension_semantics<arbitrary>], iteration_bounds = array<i64: 1, 1>, scalar_prefetch = 0 : i64, scratch_operands = 4 : i64, tpu.core_type = #tpu.core_type<tc>, window_params = [{transform_indices = @transform_0, window_bounds = array<i64: 16, 16>}, {pipeline_mode = #tpu.pipeline_mode<synchronous>, transform_indices = @transform_1, window_bounds = array<i64: 16, 512>}, {pipeline_mode = #tpu.pipeline_mode<synchronous>, transform_indices = @transform_2, window_bounds = array<i64: 128, 512>}, {pipeline_mode = #tpu.pipeline_mode<synchronous>, transform_indices = @transform_3, window_bounds = array<i64: 1, 512>}, {pipeline_mode = #tpu.pipeline_mode<synchronous>, transform_indices = @transform_4, window_bounds = array<i64: 128, 128>}, {pipeline_mode = #tpu.pipeline_mode<synchronous>, transform_indices = @transform_5, window_bounds = array<i64: 1, 128>}, {transform_indices = @transform_6, window_bounds = array<i64: 2, 128>}]} {
    %c0_i32 = arith.constant 0 : i32
    %0 = arith.cmpi eq, %arg1, %c0_i32 : i32
    %1 = arith.extui %0 : i1 to i32
    %c0_i32_0 = arith.constant 0 : i32
    %2 = arith.cmpi ne, %1, %c0_i32_0 : i32
    scf.if %2 {
      %cst_95 = arith.constant 0.000000e+00 : f32
      %294 = vector.broadcast %cst_95 : f32 to vector<2x128xf32>
      %c0_96 = arith.constant 0 : index
      %c0_97 = arith.constant 0 : index
      %295 = vector.load %arg9[%c0_96, %c0_97] : memref<2x128xf32, #tpu.memory_space<vmem>>, vector<2x128xf32>
      tpu.vector_store %arg9[%c0_96, %c0_97], %294 {strides = array<i32>} : memref<2x128xf32, #tpu.memory_space<vmem>>, vector<2x128xf32>,
      %cst_98 = arith.constant 0.000000e+00 : f32
      %296 = vector.broadcast %cst_98 : f32 to vector<2x128xf32>
      %c0_99 = arith.constant 0 : index
      %c0_100 = arith.constant 0 : index
      %297 = vector.load %arg10[%c0_99, %c0_100] : memref<2x128xf32, #tpu.memory_space<vmem>>, vector<2x128xf32>
      tpu.vector_store %arg10[%c0_99, %c0_100], %296 {strides = array<i32>} : memref<2x128xf32, #tpu.memory_space<vmem>>, vector<2x128xf32>,
      %cst_101 = arith.constant 0.000000e+00 : f32
      %298 = vector.broadcast %cst_101 : f32 to vector<2x128xf32>
      %c0_102 = arith.constant 0 : index
      %c0_103 = arith.constant 0 : index
      %299 = vector.load %arg11[%c0_102, %c0_103] : memref<2x128xf32, #tpu.memory_space<vmem>>, vector<2x128xf32>
      tpu.vector_store %arg11[%c0_102, %c0_103], %298 {strides = array<i32>} : memref<2x128xf32, #tpu.memory_space<vmem>>, vector<2x128xf32>,
    } else {
    }
    %c0 = arith.constant 0 : index
    %c0_1 = arith.constant 0 : index
    %3 = vector.load %arg2[%c0, %c0_1] : memref<16x16xf32, #tpu.memory_space<vmem>>, vector<16x16xf32>
    %4 = arith.truncf %3 : vector<16x16xf32> to vector<16x16xbf16>
    %c0_2 = arith.constant 0 : index
    %c0_3 = arith.constant 0 : index
    %5 = vector.load %arg3[%c0_2, %c0_3] : memref<16x512xbf16, #tpu.memory_space<vmem>>, vector<16x512xbf16>
    %cst = arith.constant dense<0.000000e+00> : vector<16x512xf32>
    %6 = tpu.matmul %4, %5, %cst {dimension_numbers = #tpu.dot_dimension_numbers<[1], [0], [0], [1], [0, 0, 1, 1], [], []>} : vector<16x16xbf16>, vector<16x512xbf16>, vector<16x512xf32> -> vector<16x512xf32>
    %c0_4 = arith.constant 0 : index
    %c0_5 = arith.constant 0 : index
    %7 = vector.load %arg5[%c0_4, %c0_5] : memref<1x512xf32, #tpu.memory_space<vmem>>, vector<1x512xf32>
    %8 = vector.broadcast %7 : vector<1x512xf32> to vector<16x512xf32>
    %9 = arith.addf %6, %8 : vector<16x512xf32>
    %c0_i32_6 = arith.constant 0 : i32
    %10 = tpu.assume_multiple %c0_i32_6, 16 : i32
    %11 = arith.index_cast %10 : i32 to index
    %c0_7 = arith.constant 0 : index
    %12 = vector.load %arg12[%11, %c0_7] : memref<16x512xf32, #tpu.memory_space<vmem>>, vector<16x512xf32>
    tpu.vector_store %arg12[%11, %c0_7], %9 {strides = array<i32>} : memref<16x512xf32, #tpu.memory_space<vmem>>, vector<16x512xf32>,
    %c0_8 = arith.constant 0 : index
    %c0_9 = arith.constant 0 : index
    %13 = vector.load %arg9[%c0_8, %c0_9] : memref<2x128xf32, #tpu.memory_space<vmem>>, vector<2x128xf32>
    %c0_10 = arith.constant 0 : index
    %c0_11 = arith.constant 0 : index
    %14 = vector.load %arg10[%c0_10, %c0_11] : memref<2x128xf32, #tpu.memory_space<vmem>>, vector<2x128xf32>
    %c0_12 = arith.constant 0 : index
    %c0_13 = arith.constant 0 : index
    %15 = vector.load %arg11[%c0_12, %c0_13] : memref<2x128xf32, #tpu.memory_space<vmem>>, vector<2x128xf32>
    %c0_i32_14 = arith.constant 0 : i32
    %c2_i32 = arith.constant 2 : i32
    %16 = arith.muli %c0_i32_14, %c2_i32 : i32
    %c0_i32_15 = arith.constant 0 : i32
    %17 = arith.addi %c0_i32_15, %16 : i32
    %18 = arith.index_cast %17 : i32 to index
    %c0_16 = arith.constant 0 : index
    %19 = vector.load %arg12[%18, %c0_16] : memref<16x512xf32, #tpu.memory_space<vmem>>, vector<2x512xf32>
    %20 = arith.truncf %13 : vector<2x128xf32> to vector<2x128xbf16>
    %c0_17 = arith.constant 0 : index
    %c0_18 = arith.constant 0 : index
    %21 = vector.load %arg4[%c0_17, %c0_18] : memref<128x512xbf16, #tpu.memory_space<vmem>>, vector<128x512xbf16>
    %cst_19 = arith.constant dense<0.000000e+00> : vector<2x512xf32>
    %22 = tpu.matmul %20, %21, %cst_19 {dimension_numbers = #tpu.dot_dimension_numbers<[1], [0], [0], [1], [0, 0, 1, 1], [], []>} : vector<2x128xbf16>, vector<128x512xbf16>, vector<2x512xf32> -> vector<2x512xf32>
    %23 = arith.addf %19, %22 : vector<2x512xf32>
    %24 = vector.extract_strided_slice %23 {offsets = [0, 0], sizes = [2, 128], strides = [1, 1]} : vector<2x512xf32> to vector<2x128xf32>
    %25 = arith.negf %24 : vector<2x128xf32>
    %26 = math.exp %25 : vector<2x128xf32>
    %cst_20 = arith.constant 1.000000e+00 : f32
    %27 = vector.broadcast %cst_20 : f32 to vector<2x128xf32>
    %28 = arith.addf %27, %26 : vector<2x128xf32>
    %29 = arith.divf %27, %28 : vector<2x128xf32>
    %30 = vector.extract_strided_slice %23 {offsets = [0, 128], sizes = [2, 128], strides = [1, 1]} : vector<2x512xf32> to vector<2x128xf32>
    %31 = arith.negf %30 : vector<2x128xf32>
    %32 = math.exp %31 : vector<2x128xf32>
    %cst_21 = arith.constant 1.000000e+00 : f32
    %33 = vector.broadcast %cst_21 : f32 to vector<2x128xf32>
    %34 = arith.addf %33, %32 : vector<2x128xf32>
    %35 = arith.divf %33, %34 : vector<2x128xf32>
    %36 = vector.extract_strided_slice %23 {offsets = [0, 256], sizes = [2, 128], strides = [1, 1]} : vector<2x512xf32> to vector<2x128xf32>
    %37 = math.tanh %36 : vector<2x128xf32>
    %38 = vector.extract_strided_slice %23 {offsets = [0, 384], sizes = [2, 128], strides = [1, 1]} : vector<2x512xf32> to vector<2x128xf32>
    %39 = arith.negf %38 : vector<2x128xf32>
    %40 = math.exp %39 : vector<2x128xf32>
    %cst_22 = arith.constant 1.000000e+00 : f32
    %41 = vector.broadcast %cst_22 : f32 to vector<2x128xf32>
    %42 = arith.addf %41, %40 : vector<2x128xf32>
    %43 = arith.divf %41, %42 : vector<2x128xf32>
    %44 = arith.mulf %35, %14 : vector<2x128xf32>
    %45 = arith.mulf %29, %37 : vector<2x128xf32>
    %46 = arith.addf %44, %45 : vector<2x128xf32>
    %47 = math.tanh %46 : vector<2x128xf32>
    %48 = arith.mulf %43, %47 : vector<2x128xf32>
    %49 = arith.addf %15, %48 : vector<2x128xf32>
    %c1_i32 = arith.constant 1 : i32
    %c2_i32_23 = arith.constant 2 : i32
    %50 = arith.muli %c1_i32, %c2_i32_23 : i32
    %c0_i32_24 = arith.constant 0 : i32
    %51 = arith.addi %c0_i32_24, %50 : i32
    %52 = arith.index_cast %51 : i32 to index
    %c0_25 = arith.constant 0 : index
    %53 = vector.load %arg12[%52, %c0_25] : memref<16x512xf32, #tpu.memory_space<vmem>>, vector<2x512xf32>
    %54 = arith.truncf %48 : vector<2x128xf32> to vector<2x128xbf16>
    %c0_26 = arith.constant 0 : index
    %c0_27 = arith.constant 0 : index
    %55 = vector.load %arg4[%c0_26, %c0_27] : memref<128x512xbf16, #tpu.memory_space<vmem>>, vector<128x512xbf16>
    %cst_28 = arith.constant dense<0.000000e+00> : vector<2x512xf32>
    %56 = tpu.matmul %54, %55, %cst_28 {dimension_numbers = #tpu.dot_dimension_numbers<[1], [0], [0], [1], [0, 0, 1, 1], [], []>} : vector<2x128xbf16>, vector<128x512xbf16>, vector<2x512xf32> -> vector<2x512xf32>
    %57 = arith.addf %53, %56 : vector<2x512xf32>
    %58 = vector.extract_strided_slice %57 {offsets = [0, 0], sizes = [2, 128], strides = [1, 1]} : vector<2x512xf32> to vector<2x128xf32>
    %59 = arith.negf %58 : vector<2x128xf32>
    %60 = math.exp %59 : vector<2x128xf32>
    %cst_29 = arith.constant 1.000000e+00 : f32
    %61 = vector.broadcast %cst_29 : f32 to vector<2x128xf32>
    %62 = arith.addf %61, %60 : vector<2x128xf32>
    %63 = arith.divf %61, %62 : vector<2x128xf32>
    %64 = vector.extract_strided_slice %57 {offsets = [0, 128], sizes = [2, 128], strides = [1, 1]} : vector<2x512xf32> to vector<2x128xf32>
    %65 = arith.negf %64 : vector<2x128xf32>
    %66 = math.exp %65 : vector<2x128xf32>
    %cst_30 = arith.constant 1.000000e+00 : f32
    %67 = vector.broadcast %cst_30 : f32 to vector<2x128xf32>
    %68 = arith.addf %67, %66 : vector<2x128xf32>
    %69 = arith.divf %67, %68 : vector<2x128xf32>
    %70 = vector.extract_strided_slice %57 {offsets = [0, 256], sizes = [2, 128], strides = [1, 1]} : vector<2x512xf32> to vector<2x128xf32>
    %71 = math.tanh %70 : vector<2x128xf32>
    %72 = vector.extract_strided_slice %57 {offsets = [0, 384], sizes = [2, 128], strides = [1, 1]} : vector<2x512xf32> to vector<2x128xf32>
    %73 = arith.negf %72 : vector<2x128xf32>
    %74 = math.exp %73 : vector<2x128xf32>
    %cst_31 = arith.constant 1.000000e+00 : f32
    %75 = vector.broadcast %cst_31 : f32 to vector<2x128xf32>
    %76 = arith.addf %75, %74 : vector<2x128xf32>
    %77 = arith.divf %75, %76 : vector<2x128xf32>
    %78 = arith.mulf %69, %46 : vector<2x128xf32>
    %79 = arith.mulf %63, %71 : vector<2x128xf32>
    %80 = arith.addf %78, %79 : vector<2x128xf32>
    %81 = math.tanh %80 : vector<2x128xf32>
    %82 = arith.mulf %77, %81 : vector<2x128xf32>
    %83 = arith.addf %49, %82 : vector<2x128xf32>
    %c2_i32_32 = arith.constant 2 : i32
    %c2_i32_33 = arith.constant 2 : i32
    %84 = arith.muli %c2_i32_32, %c2_i32_33 : i32
    %c0_i32_34 = arith.constant 0 : i32
    %85 = arith.addi %c0_i32_34, %84 : i32
    %86 = arith.index_cast %85 : i32 to index
    %c0_35 = arith.constant 0 : index
    %87 = vector.load %arg12[%86, %c0_35] : memref<16x512xf32, #tpu.memory_space<vmem>>, vector<2x512xf32>
    %88 = arith.truncf %82 : vector<2x128xf32> to vector<2x128xbf16>
    %c0_36 = arith.constant 0 : index
    %c0_37 = arith.constant 0 : index
    %89 = vector.load %arg4[%c0_36, %c0_37] : memref<128x512xbf16, #tpu.memory_space<vmem>>, vector<128x512xbf16>
    %cst_38 = arith.constant dense<0.000000e+00> : vector<2x512xf32>
    %90 = tpu.matmul %88, %89, %cst_38 {dimension_numbers = #tpu.dot_dimension_numbers<[1], [0], [0], [1], [0, 0, 1, 1], [], []>} : vector<2x128xbf16>, vector<128x512xbf16>, vector<2x512xf32> -> vector<2x512xf32>
    %91 = arith.addf %87, %90 : vector<2x512xf32>
    %92 = vector.extract_strided_slice %91 {offsets = [0, 0], sizes = [2, 128], strides = [1, 1]} : vector<2x512xf32> to vector<2x128xf32>
    %93 = arith.negf %92 : vector<2x128xf32>
    %94 = math.exp %93 : vector<2x128xf32>
    %cst_39 = arith.constant 1.000000e+00 : f32
    %95 = vector.broadcast %cst_39 : f32 to vector<2x128xf32>
    %96 = arith.addf %95, %94 : vector<2x128xf32>
    %97 = arith.divf %95, %96 : vector<2x128xf32>
    %98 = vector.extract_strided_slice %91 {offsets = [0, 128], sizes = [2, 128], strides = [1, 1]} : vector<2x512xf32> to vector<2x128xf32>
    %99 = arith.negf %98 : vector<2x128xf32>
    %100 = math.exp %99 : vector<2x128xf32>
    %cst_40 = arith.constant 1.000000e+00 : f32
    %101 = vector.broadcast %cst_40 : f32 to vector<2x128xf32>
    %102 = arith.addf %101, %100 : vector<2x128xf32>
    %103 = arith.divf %101, %102 : vector<2x128xf32>
    %104 = vector.extract_strided_slice %91 {offsets = [0, 256], sizes = [2, 128], strides = [1, 1]} : vector<2x512xf32> to vector<2x128xf32>
    %105 = math.tanh %104 : vector<2x128xf32>
    %106 = vector.extract_strided_slice %91 {offsets = [0, 384], sizes = [2, 128], strides = [1, 1]} : vector<2x512xf32> to vector<2x128xf32>
    %107 = arith.negf %106 : vector<2x128xf32>
    %108 = math.exp %107 : vector<2x128xf32>
    %cst_41 = arith.constant 1.000000e+00 : f32
    %109 = vector.broadcast %cst_41 : f32 to vector<2x128xf32>
    %110 = arith.addf %109, %108 : vector<2x128xf32>
    %111 = arith.divf %109, %110 : vector<2x128xf32>
    %112 = arith.mulf %103, %80 : vector<2x128xf32>
    %113 = arith.mulf %97, %105 : vector<2x128xf32>
    %114 = arith.addf %112, %113 : vector<2x128xf32>
    %115 = math.tanh %114 : vector<2x128xf32>
    %116 = arith.mulf %111, %115 : vector<2x128xf32>
    %117 = arith.addf %83, %116 : vector<2x128xf32>
    %c3_i32 = arith.constant 3 : i32
    %c2_i32_42 = arith.constant 2 : i32
    %118 = arith.muli %c3_i32, %c2_i32_42 : i32
    %c0_i32_43 = arith.constant 0 : i32
    %119 = arith.addi %c0_i32_43, %118 : i32
    %120 = arith.index_cast %119 : i32 to index
    %c0_44 = arith.constant 0 : index
    %121 = vector.load %arg12[%120, %c0_44] : memref<16x512xf32, #tpu.memory_space<vmem>>, vector<2x512xf32>
    %122 = arith.truncf %116 : vector<2x128xf32> to vector<2x128xbf16>
    %c0_45 = arith.constant 0 : index
    %c0_46 = arith.constant 0 : index
    %123 = vector.load %arg4[%c0_45, %c0_46] : memref<128x512xbf16, #tpu.memory_space<vmem>>, vector<128x512xbf16>
    %cst_47 = arith.constant dense<0.000000e+00> : vector<2x512xf32>
    %124 = tpu.matmul %122, %123, %cst_47 {dimension_numbers = #tpu.dot_dimension_numbers<[1], [0], [0], [1], [0, 0, 1, 1], [], []>} : vector<2x128xbf16>, vector<128x512xbf16>, vector<2x512xf32> -> vector<2x512xf32>
    %125 = arith.addf %121, %124 : vector<2x512xf32>
    %126 = vector.extract_strided_slice %125 {offsets = [0, 0], sizes = [2, 128], strides = [1, 1]} : vector<2x512xf32> to vector<2x128xf32>
    %127 = arith.negf %126 : vector<2x128xf32>
    %128 = math.exp %127 : vector<2x128xf32>
    %cst_48 = arith.constant 1.000000e+00 : f32
    %129 = vector.broadcast %cst_48 : f32 to vector<2x128xf32>
    %130 = arith.addf %129, %128 : vector<2x128xf32>
    %131 = arith.divf %129, %130 : vector<2x128xf32>
    %132 = vector.extract_strided_slice %125 {offsets = [0, 128], sizes = [2, 128], strides = [1, 1]} : vector<2x512xf32> to vector<2x128xf32>
    %133 = arith.negf %132 : vector<2x128xf32>
    %134 = math.exp %133 : vector<2x128xf32>
    %cst_49 = arith.constant 1.000000e+00 : f32
    %135 = vector.broadcast %cst_49 : f32 to vector<2x128xf32>
    %136 = arith.addf %135, %134 : vector<2x128xf32>
    %137 = arith.divf %135, %136 : vector<2x128xf32>
    %138 = vector.extract_strided_slice %125 {offsets = [0, 256], sizes = [2, 128], strides = [1, 1]} : vector<2x512xf32> to vector<2x128xf32>
    %139 = math.tanh %138 : vector<2x128xf32>
    %140 = vector.extract_strided_slice %125 {offsets = [0, 384], sizes = [2, 128], strides = [1, 1]} : vector<2x512xf32> to vector<2x128xf32>
    %141 = arith.negf %140 : vector<2x128xf32>
    %142 = math.exp %141 : vector<2x128xf32>
    %cst_50 = arith.constant 1.000000e+00 : f32
    %143 = vector.broadcast %cst_50 : f32 to vector<2x128xf32>
    %144 = arith.addf %143, %142 : vector<2x128xf32>
    %145 = arith.divf %143, %144 : vector<2x128xf32>
    %146 = arith.mulf %137, %114 : vector<2x128xf32>
    %147 = arith.mulf %131, %139 : vector<2x128xf32>
    %148 = arith.addf %146, %147 : vector<2x128xf32>
    %149 = math.tanh %148 : vector<2x128xf32>
    %150 = arith.mulf %145, %149 : vector<2x128xf32>
    %151 = arith.addf %117, %150 : vector<2x128xf32>
    %c4_i32 = arith.constant 4 : i32
    %c2_i32_51 = arith.constant 2 : i32
    %152 = arith.muli %c4_i32, %c2_i32_51 : i32
    %c0_i32_52 = arith.constant 0 : i32
    %153 = arith.addi %c0_i32_52, %152 : i32
    %154 = arith.index_cast %153 : i32 to index
    %c0_53 = arith.constant 0 : index
    %155 = vector.load %arg12[%154, %c0_53] : memref<16x512xf32, #tpu.memory_space<vmem>>, vector<2x512xf32>
    %156 = arith.truncf %150 : vector<2x128xf32> to vector<2x128xbf16>
    %c0_54 = arith.constant 0 : index
    %c0_55 = arith.constant 0 : index
    %157 = vector.load %arg4[%c0_54, %c0_55] : memref<128x512xbf16, #tpu.memory_space<vmem>>, vector<128x512xbf16>
    %cst_56 = arith.constant dense<0.000000e+00> : vector<2x512xf32>
    %158 = tpu.matmul %156, %157, %cst_56 {dimension_numbers = #tpu.dot_dimension_numbers<[1], [0], [0], [1], [0, 0, 1, 1], [], []>} : vector<2x128xbf16>, vector<128x512xbf16>, vector<2x512xf32> -> vector<2x512xf32>
    %159 = arith.addf %155, %158 : vector<2x512xf32>
    %160 = vector.extract_strided_slice %159 {offsets = [0, 0], sizes = [2, 128], strides = [1, 1]} : vector<2x512xf32> to vector<2x128xf32>
    %161 = arith.negf %160 : vector<2x128xf32>
    %162 = math.exp %161 : vector<2x128xf32>
    %cst_57 = arith.constant 1.000000e+00 : f32
    %163 = vector.broadcast %cst_57 : f32 to vector<2x128xf32>
    %164 = arith.addf %163, %162 : vector<2x128xf32>
    %165 = arith.divf %163, %164 : vector<2x128xf32>
    %166 = vector.extract_strided_slice %159 {offsets = [0, 128], sizes = [2, 128], strides = [1, 1]} : vector<2x512xf32> to vector<2x128xf32>
    %167 = arith.negf %166 : vector<2x128xf32>
    %168 = math.exp %167 : vector<2x128xf32>
    %cst_58 = arith.constant 1.000000e+00 : f32
    %169 = vector.broadcast %cst_58 : f32 to vector<2x128xf32>
    %170 = arith.addf %169, %168 : vector<2x128xf32>
    %171 = arith.divf %169, %170 : vector<2x128xf32>
    %172 = vector.extract_strided_slice %159 {offsets = [0, 256], sizes = [2, 128], strides = [1, 1]} : vector<2x512xf32> to vector<2x128xf32>
    %173 = math.tanh %172 : vector<2x128xf32>
    %174 = vector.extract_strided_slice %159 {offsets = [0, 384], sizes = [2, 128], strides = [1, 1]} : vector<2x512xf32> to vector<2x128xf32>
    %175 = arith.negf %174 : vector<2x128xf32>
    %176 = math.exp %175 : vector<2x128xf32>
    %cst_59 = arith.constant 1.000000e+00 : f32
    %177 = vector.broadcast %cst_59 : f32 to vector<2x128xf32>
    %178 = arith.addf %177, %176 : vector<2x128xf32>
    %179 = arith.divf %177, %178 : vector<2x128xf32>
    %180 = arith.mulf %171, %148 : vector<2x128xf32>
    %181 = arith.mulf %165, %173 : vector<2x128xf32>
    %182 = arith.addf %180, %181 : vector<2x128xf32>
    %183 = math.tanh %182 : vector<2x128xf32>
    %184 = arith.mulf %179, %183 : vector<2x128xf32>
    %185 = arith.addf %151, %184 : vector<2x128xf32>
    %c5_i32 = arith.constant 5 : i32
    %c2_i32_60 = arith.constant 2 : i32
    %186 = arith.muli %c5_i32, %c2_i32_60 : i32
    %c0_i32_61 = arith.constant 0 : i32
    %187 = arith.addi %c0_i32_61, %186 : i32
    %188 = arith.index_cast %187 : i32 to index
    %c0_62 = arith.constant 0 : index
    %189 = vector.load %arg12[%188, %c0_62] : memref<16x512xf32, #tpu.memory_space<vmem>>, vector<2x512xf32>
    %190 = arith.truncf %184 : vector<2x128xf32> to vector<2x128xbf16>
    %c0_63 = arith.constant 0 : index
    %c0_64 = arith.constant 0 : index
    %191 = vector.load %arg4[%c0_63, %c0_64] : memref<128x512xbf16, #tpu.memory_space<vmem>>, vector<128x512xbf16>
    %cst_65 = arith.constant dense<0.000000e+00> : vector<2x512xf32>
    %192 = tpu.matmul %190, %191, %cst_65 {dimension_numbers = #tpu.dot_dimension_numbers<[1], [0], [0], [1], [0, 0, 1, 1], [], []>} : vector<2x128xbf16>, vector<128x512xbf16>, vector<2x512xf32> -> vector<2x512xf32>
    %193 = arith.addf %189, %192 : vector<2x512xf32>
    %194 = vector.extract_strided_slice %193 {offsets = [0, 0], sizes = [2, 128], strides = [1, 1]} : vector<2x512xf32> to vector<2x128xf32>
    %195 = arith.negf %194 : vector<2x128xf32>
    %196 = math.exp %195 : vector<2x128xf32>
    %cst_66 = arith.constant 1.000000e+00 : f32
    %197 = vector.broadcast %cst_66 : f32 to vector<2x128xf32>
    %198 = arith.addf %197, %196 : vector<2x128xf32>
    %199 = arith.divf %197, %198 : vector<2x128xf32>
    %200 = vector.extract_strided_slice %193 {offsets = [0, 128], sizes = [2, 128], strides = [1, 1]} : vector<2x512xf32> to vector<2x128xf32>
    %201 = arith.negf %200 : vector<2x128xf32>
    %202 = math.exp %201 : vector<2x128xf32>
    %cst_67 = arith.constant 1.000000e+00 : f32
    %203 = vector.broadcast %cst_67 : f32 to vector<2x128xf32>
    %204 = arith.addf %203, %202 : vector<2x128xf32>
    %205 = arith.divf %203, %204 : vector<2x128xf32>
    %206 = vector.extract_strided_slice %193 {offsets = [0, 256], sizes = [2, 128], strides = [1, 1]} : vector<2x512xf32> to vector<2x128xf32>
    %207 = math.tanh %206 : vector<2x128xf32>
    %208 = vector.extract_strided_slice %193 {offsets = [0, 384], sizes = [2, 128], strides = [1, 1]} : vector<2x512xf32> to vector<2x128xf32>
    %209 = arith.negf %208 : vector<2x128xf32>
    %210 = math.exp %209 : vector<2x128xf32>
    %cst_68 = arith.constant 1.000000e+00 : f32
    %211 = vector.broadcast %cst_68 : f32 to vector<2x128xf32>
    %212 = arith.addf %211, %210 : vector<2x128xf32>
    %213 = arith.divf %211, %212 : vector<2x128xf32>
    %214 = arith.mulf %205, %182 : vector<2x128xf32>
    %215 = arith.mulf %199, %207 : vector<2x128xf32>
    %216 = arith.addf %214, %215 : vector<2x128xf32>
    %217 = math.tanh %216 : vector<2x128xf32>
    %218 = arith.mulf %213, %217 : vector<2x128xf32>
    %219 = arith.addf %185, %218 : vector<2x128xf32>
    %c6_i32 = arith.constant 6 : i32
    %c2_i32_69 = arith.constant 2 : i32
    %220 = arith.muli %c6_i32, %c2_i32_69 : i32
    %c0_i32_70 = arith.constant 0 : i32
    %221 = arith.addi %c0_i32_70, %220 : i32
    %222 = arith.index_cast %221 : i32 to index
    %c0_71 = arith.constant 0 : index
    %223 = vector.load %arg12[%222, %c0_71] : memref<16x512xf32, #tpu.memory_space<vmem>>, vector<2x512xf32>
    %224 = arith.truncf %218 : vector<2x128xf32> to vector<2x128xbf16>
    %c0_72 = arith.constant 0 : index
    %c0_73 = arith.constant 0 : index
    %225 = vector.load %arg4[%c0_72, %c0_73] : memref<128x512xbf16, #tpu.memory_space<vmem>>, vector<128x512xbf16>
    %cst_74 = arith.constant dense<0.000000e+00> : vector<2x512xf32>
    %226 = tpu.matmul %224, %225, %cst_74 {dimension_numbers = #tpu.dot_dimension_numbers<[1], [0], [0], [1], [0, 0, 1, 1], [], []>} : vector<2x128xbf16>, vector<128x512xbf16>, vector<2x512xf32> -> vector<2x512xf32>
    %227 = arith.addf %223, %226 : vector<2x512xf32>
    %228 = vector.extract_strided_slice %227 {offsets = [0, 0], sizes = [2, 128], strides = [1, 1]} : vector<2x512xf32> to vector<2x128xf32>
    %229 = arith.negf %228 : vector<2x128xf32>
    %230 = math.exp %229 : vector<2x128xf32>
    %cst_75 = arith.constant 1.000000e+00 : f32
    %231 = vector.broadcast %cst_75 : f32 to vector<2x128xf32>
    %232 = arith.addf %231, %230 : vector<2x128xf32>
    %233 = arith.divf %231, %232 : vector<2x128xf32>
    %234 = vector.extract_strided_slice %227 {offsets = [0, 128], sizes = [2, 128], strides = [1, 1]} : vector<2x512xf32> to vector<2x128xf32>
    %235 = arith.negf %234 : vector<2x128xf32>
    %236 = math.exp %235 : vector<2x128xf32>
    %cst_76 = arith.constant 1.000000e+00 : f32
    %237 = vector.broadcast %cst_76 : f32 to vector<2x128xf32>
    %238 = arith.addf %237, %236 : vector<2x128xf32>
    %239 = arith.divf %237, %238 : vector<2x128xf32>
    %240 = vector.extract_strided_slice %227 {offsets = [0, 256], sizes = [2, 128], strides = [1, 1]} : vector<2x512xf32> to vector<2x128xf32>
    %241 = math.tanh %240 : vector<2x128xf32>
    %242 = vector.extract_strided_slice %227 {offsets = [0, 384], sizes = [2, 128], strides = [1, 1]} : vector<2x512xf32> to vector<2x128xf32>
    %243 = arith.negf %242 : vector<2x128xf32>
    %244 = math.exp %243 : vector<2x128xf32>
    %cst_77 = arith.constant 1.000000e+00 : f32
    %245 = vector.broadcast %cst_77 : f32 to vector<2x128xf32>
    %246 = arith.addf %245, %244 : vector<2x128xf32>
    %247 = arith.divf %245, %246 : vector<2x128xf32>
    %248 = arith.mulf %239, %216 : vector<2x128xf32>
    %249 = arith.mulf %233, %241 : vector<2x128xf32>
    %250 = arith.addf %248, %249 : vector<2x128xf32>
    %251 = math.tanh %250 : vector<2x128xf32>
    %252 = arith.mulf %247, %251 : vector<2x128xf32>
    %253 = arith.addf %219, %252 : vector<2x128xf32>
    %c7_i32 = arith.constant 7 : i32
    %c2_i32_78 = arith.constant 2 : i32
    %254 = arith.muli %c7_i32, %c2_i32_78 : i32
    %c0_i32_79 = arith.constant 0 : i32
    %255 = arith.addi %c0_i32_79, %254 : i32
    %256 = arith.index_cast %255 : i32 to index
    %c0_80 = arith.constant 0 : index
    %257 = vector.load %arg12[%256, %c0_80] : memref<16x512xf32, #tpu.memory_space<vmem>>, vector<2x512xf32>
    %258 = arith.truncf %252 : vector<2x128xf32> to vector<2x128xbf16>
    %c0_81 = arith.constant 0 : index
    %c0_82 = arith.constant 0 : index
    %259 = vector.load %arg4[%c0_81, %c0_82] : memref<128x512xbf16, #tpu.memory_space<vmem>>, vector<128x512xbf16>
    %cst_83 = arith.constant dense<0.000000e+00> : vector<2x512xf32>
    %260 = tpu.matmul %258, %259, %cst_83 {dimension_numbers = #tpu.dot_dimension_numbers<[1], [0], [0], [1], [0, 0, 1, 1], [], []>} : vector<2x128xbf16>, vector<128x512xbf16>, vector<2x512xf32> -> vector<2x512xf32>
    %261 = arith.addf %257, %260 : vector<2x512xf32>
    %262 = vector.extract_strided_slice %261 {offsets = [0, 0], sizes = [2, 128], strides = [1, 1]} : vector<2x512xf32> to vector<2x128xf32>
    %263 = arith.negf %262 : vector<2x128xf32>
    %264 = math.exp %263 : vector<2x128xf32>
    %cst_84 = arith.constant 1.000000e+00 : f32
    %265 = vector.broadcast %cst_84 : f32 to vector<2x128xf32>
    %266 = arith.addf %265, %264 : vector<2x128xf32>
    %267 = arith.divf %265, %266 : vector<2x128xf32>
    %268 = vector.extract_strided_slice %261 {offsets = [0, 128], sizes = [2, 128], strides = [1, 1]} : vector<2x512xf32> to vector<2x128xf32>
    %269 = arith.negf %268 : vector<2x128xf32>
    %270 = math.exp %269 : vector<2x128xf32>
    %cst_85 = arith.constant 1.000000e+00 : f32
    %271 = vector.broadcast %cst_85 : f32 to vector<2x128xf32>
    %272 = arith.addf %271, %270 : vector<2x128xf32>
    %273 = arith.divf %271, %272 : vector<2x128xf32>
    %274 = vector.extract_strided_slice %261 {offsets = [0, 256], sizes = [2, 128], strides = [1, 1]} : vector<2x512xf32> to vector<2x128xf32>
    %275 = math.tanh %274 : vector<2x128xf32>
    %276 = vector.extract_strided_slice %261 {offsets = [0, 384], sizes = [2, 128], strides = [1, 1]} : vector<2x512xf32> to vector<2x128xf32>
    %277 = arith.negf %276 : vector<2x128xf32>
    %278 = math.exp %277 : vector<2x128xf32>
    %cst_86 = arith.constant 1.000000e+00 : f32
    %279 = vector.broadcast %cst_86 : f32 to vector<2x128xf32>
    %280 = arith.addf %279, %278 : vector<2x128xf32>
    %281 = arith.divf %279, %280 : vector<2x128xf32>
    %282 = arith.mulf %273, %250 : vector<2x128xf32>
    %283 = arith.mulf %267, %275 : vector<2x128xf32>
    %284 = arith.addf %282, %283 : vector<2x128xf32>
    %285 = math.tanh %284 : vector<2x128xf32>
    %286 = arith.mulf %281, %285 : vector<2x128xf32>
    %287 = arith.addf %253, %286 : vector<2x128xf32>
    %c8_i32 = arith.constant 8 : i32
    %c0_87 = arith.constant 0 : index
    %c0_88 = arith.constant 0 : index
    %288 = vector.load %arg9[%c0_87, %c0_88] : memref<2x128xf32, #tpu.memory_space<vmem>>, vector<2x128xf32>
    tpu.vector_store %arg9[%c0_87, %c0_88], %286 {strides = array<i32>} : memref<2x128xf32, #tpu.memory_space<vmem>>, vector<2x128xf32>,
    %c0_89 = arith.constant 0 : index
    %c0_90 = arith.constant 0 : index
    %289 = vector.load %arg10[%c0_89, %c0_90] : memref<2x128xf32, #tpu.memory_space<vmem>>, vector<2x128xf32>
    tpu.vector_store %arg10[%c0_89, %c0_90], %284 {strides = array<i32>} : memref<2x128xf32, #tpu.memory_space<vmem>>, vector<2x128xf32>,
    %c0_91 = arith.constant 0 : index
    %c0_92 = arith.constant 0 : index
    %290 = vector.load %arg11[%c0_91, %c0_92] : memref<2x128xf32, #tpu.memory_space<vmem>>, vector<2x128xf32>
    tpu.vector_store %arg11[%c0_91, %c0_92], %287 {strides = array<i32>} : memref<2x128xf32, #tpu.memory_space<vmem>>, vector<2x128xf32>,
    %c0_i32_93 = arith.constant 0 : i32
    %291 = arith.cmpi eq, %arg1, %c0_i32_93 : i32
    %292 = arith.extui %291 : i1 to i32
    %c0_i32_94 = arith.constant 0 : i32
    %293 = arith.cmpi ne, %292, %c0_i32_94 : i32
    scf.if %293 {
      %c0_95 = arith.constant 0 : index
      %c0_96 = arith.constant 0 : index
      %294 = vector.load %arg11[%c0_95, %c0_96] : memref<2x128xf32, #tpu.memory_space<vmem>>, vector<2x128xf32>
      %cst_97 = arith.constant 1.250000e-01 : f32
      %295 = vector.broadcast %cst_97 : f32 to vector<2x128xf32>
      %296 = arith.mulf %294, %295 : vector<2x128xf32>
      %c0_98 = arith.constant 0 : index
      %c0_99 = arith.constant 0 : index
      %297 = vector.load %arg6[%c0_98, %c0_99] : memref<128x128xf32, #tpu.memory_space<vmem>>, vector<128x128xf32>
      %cst_100 = arith.constant dense<0.000000e+00> : vector<2x128xf32>
      %298 = tpu.matmul %296, %297, %cst_100 {dimension_numbers = #tpu.dot_dimension_numbers<[1], [0], [0], [1], [0, 0, 1, 1], [], []>} : vector<2x128xf32>, vector<128x128xf32>, vector<2x128xf32> -> vector<2x128xf32>
      %c0_101 = arith.constant 0 : index
      %c0_102 = arith.constant 0 : index
      %299 = vector.load %arg7[%c0_101, %c0_102] : memref<1x128xf32, #tpu.memory_space<vmem>>, vector<1x128xf32>
      %300 = vector.broadcast %299 : vector<1x128xf32> to vector<2x128xf32>
      %301 = arith.addf %298, %300 : vector<2x128xf32>
      %c0_103 = arith.constant 0 : index
      %c0_104 = arith.constant 0 : index
      %302 = vector.load %arg8[%c0_103, %c0_104] : memref<2x128xf32, #tpu.memory_space<vmem>>, vector<2x128xf32>
      tpu.vector_store %arg8[%c0_103, %c0_104], %301 {strides = array<i32>} : memref<2x128xf32, #tpu.memory_space<vmem>>, vector<2x128xf32>,
    } else {
    }
    return
  }
  func.func @transform_0(%arg0: i32, %arg1: i32) -> (i32, i32) {
    %c0_i32 = arith.constant 0 : i32
    %c0_i32_0 = arith.constant 0 : i32
    return %arg1, %c0_i32 : i32, i32
  }
  func.func @transform_1(%arg0: i32, %arg1: i32) -> (i32, i32) {
    %c0_i32 = arith.constant 0 : i32
    %c0_i32_0 = arith.constant 0 : i32
    %c0_i32_1 = arith.constant 0 : i32
    return %c0_i32, %c0_i32_0 : i32, i32
  }
  func.func @transform_2(%arg0: i32, %arg1: i32) -> (i32, i32) {
    %c0_i32 = arith.constant 0 : i32
    %c0_i32_0 = arith.constant 0 : i32
    %c0_i32_1 = arith.constant 0 : i32
    return %c0_i32, %c0_i32_0 : i32, i32
  }
  func.func @transform_3(%arg0: i32, %arg1: i32) -> (i32, i32) {
    %c0_i32 = arith.constant 0 : i32
    %c0_i32_0 = arith.constant 0 : i32
    %c0_i32_1 = arith.constant 0 : i32
    return %c0_i32, %c0_i32_0 : i32, i32
  }
  func.func @transform_4(%arg0: i32, %arg1: i32) -> (i32, i32) {
    %c0_i32 = arith.constant 0 : i32
    %c0_i32_0 = arith.constant 0 : i32
    %c0_i32_1 = arith.constant 0 : i32
    return %c0_i32, %c0_i32_0 : i32, i32
  }
  func.func @transform_5(%arg0: i32, %arg1: i32) -> (i32, i32) {
    %c0_i32 = arith.constant 0 : i32
    %c0_i32_0 = arith.constant 0 : i32
    %c0_i32_1 = arith.constant 0 : i32
    return %c0_i32, %c0_i32_0 : i32, i32
  }
  func.func @transform_6(%arg0: i32, %arg1: i32) -> (i32, i32) {
    %c0_i32 = arith.constant 0 : i32
    %c0_i32_0 = arith.constant 0 : i32
    return %arg0, %c0_i32 : i32, i32
  }
}

</mosaic_0001>

<bundles_post_ra>
// kernel: tpu_custom_call.1
= control target key start
LH: loop header
LB: loop body
LE: loop exit
PB: predicated region body
PF: predicated region fallthrough
CT: control target
= control target key end

     0   :  { %11 = vsyncpa [#allocation7], 0  ;;  %s2573_s0 = inlined_call_operand.hbm [shape: f32[16,16], index: 0, kind: input, shape index: {}]   ;;  %s2574_s1 = inlined_call_operand.hbm [shape: bf16[16,512], index: 1, kind: input, shape index: {}]   ;;  %s2575_s2 = inlined_call_operand.hbm [shape: bf16[128,512], index: 2, kind: input, shape index: {}]   ;;  %s2576_s3 = inlined_call_operand.vmem [shape: f32[1,512], index: 3, kind: input, shape index: {}]   ;;  %s2577_s4 = inlined_call_operand.hbm [shape: f32[128,128], index: 4, kind: input, shape index: {}]   ;;  %s2578_s5 = inlined_call_operand.vmem [shape: f32[1,128], index: 5, kind: input, shape index: {}]   ;;  %s2579_s6 = inlined_call_operand.hbm [shape: f32[2,128], index: 6, kind: output, shape index: {}]  }
   0x1   :  { %12 = vsyncpa [#allocation10], 0 }
   0x2   :  { %13 = vsyncpa [#allocation13], 0 }
   0x3   :  { %14 = vsyncpa [#allocation8], 0  ;;  %s2054_s21 = smov [#allocation9]  }
   0x4   :  { %s32_s22 = sshll.u32 %s2054_s21, 4  ;;  %s33_s22 = int_to_ptr.vmem [resolvable:$true] %s32_s22 }
   0x5   :  { %s1954_s23 = scalar_lea.vmem %s33_s22, 512  ;;  %p1959_p1 = scmp.lt.s32.totalorder %s33_s22, %s33_s22 }
   0x6   :  { %p1955_p0 = scmp.ne.s32.totalorder %s33_s22, %s1954_s23  ;;  %p1960_p2 = scmp.lt.s32.totalorder %s1954_s23, %s1954_s23 }
   0x8   :  { %p1961_p3 = por %p1960_p2, %p1959_p1 }
   0xa   :  { %p1962_p4 = pnand %p1961_p3, %p1955_p0 }
   0xc   :  { %1965 = shalt.err (!%p1962_p4)
}
   0xd   :  { %s2055_s24 = smov 256   ;;  %s2056_s25 = smov 16  }
   0xe   :  { %38 = dma.hbm_to_vmem [thread:$0]  %s2574_s1, 512, %s33_s22, [#allocation10], %s2055_s24, %s2055_s24, %s2056_s25  }
   0xf   :  { %s2057_s28 = smov [#allocation6]  }
  0x10   :  { %s20_s29 = sshll.u32 %s2057_s28, 4  ;;  %s21_s29 = int_to_ptr.vmem [resolvable:$true] %s20_s29 }
  0x11   :  { %s1974_s30 = scalar_lea.vmem %s21_s29, 256  ;;  %p1979_p6 = scmp.lt.s32.totalorder %s21_s29, %s21_s29 }
  0x12   :  { %p1975_p5 = scmp.ne.s32.totalorder %s21_s29, %s1974_s30  ;;  %p1980_p7 = scmp.lt.s32.totalorder %s1974_s30, %s1974_s30 }
  0x14   :  { %p1981_p8 = por %p1980_p7, %p1979_p6 }
  0x16   :  { %p1982_p9 = pnand %p1981_p8, %p1975_p5 }
  0x18   :  { %1985 = shalt.err (!%p1982_p9)
}
  0x19   :  { %s2058_s7 = smov 128   ;;  %s2059_s8 = smov 8  }
  0x1a   :  { %26 = dma.hbm_to_vmem [thread:$0]  %s2573_s0, 256, %s21_s29, [#allocation7], %s2058_s7, %s2058_s7, %s2059_s8  }
  0x1b   :  { %s2060_s11 = smov [#allocation11]   ;;  %s2061_s13 = smov [#allocation12]  }
  0x1c   :  { %s44_s12 = sshll.u32 %s2060_s11, 4  ;;  %s58_s1 = sshll.u32 %s2061_s13, 4  ;;  %s45_s12 = int_to_ptr.vmem [resolvable:$true] %s44_s12  ;;  %s59_s1 = int_to_ptr.vmem [resolvable:$true] %s58_s1 }
  0x1d   :  { %s1994_s14 = scalar_lea.vmem %s45_s12, 4096  ;;  %p1999_p11 = scmp.lt.s32.totalorder %s45_s12, %s45_s12 }
  0x1e   :  { %p1995_p10 = scmp.ne.s32.totalorder %s45_s12, %s1994_s14  ;;  %p2000_p12 = scmp.lt.s32.totalorder %s1994_s14, %s1994_s14 }
  0x20   :  { %p2001_p13 = por %p2000_p12, %p1999_p11 }
  0x22   :  { %p2002_p0 = pnand %p2001_p13, %p1995_p10 }
  0x24   :  { %2005 = shalt.err (!%p2002_p0)
}
  0x25   :  { %50 = dma.hbm_to_vmem [thread:$0]  %s2575_s2, 4096, %s45_s12, [#allocation10], %s2055_s24, %s2055_s24, %s2056_s25  }
  0x26   :  { %s2014_s0 = scalar_lea.vmem %s59_s1, 2048  ;;  %p2019_p2 = scmp.lt.s32.totalorder %s59_s1, %s59_s1 }
  0x27   :  { %p2015_p1 = scmp.ne.s32.totalorder %s59_s1, %s2014_s0  ;;  %p2020_p3 = scmp.lt.s32.totalorder %s2014_s0, %s2014_s0 }
  0x29   :  { %p2021_p4 = por %p2020_p3, %p2019_p2 }
  0x2b   :  { %p2022_p5 = pnand %p2021_p4, %p2015_p1 }
  0x2d   :  { %2025 = shalt.err (!%p2022_p5)
}
  0x2e   :  { %64 = dma.hbm_to_vmem [thread:$0]  %s2577_s4, 2048, %s59_s1, [#allocation13], %s2058_s7, %s2058_s7, %s2059_s8  }
  0x2f   :  { %2046 = dma.done.wait [#allocation7], 256  }
  0x30   :  { %2047 = vsyncadd [#allocation7], 4294967040 }
  0x31   :  { %2048 = dma.done.wait [#allocation10], 4608  }
  0x32   :  { %2049 = vsyncadd [#allocation10], 4294962688 }
  0x33   :  { %2050 = dma.done.wait [#allocation13], 2048  }
  0x34   :  { %2051 = vsyncadd [#allocation13], 4294965248  ;;  %v2062_v0 = vmov 0   ;;  %v2063_v1 = vmov 0.0   ;;  %v1732_v2 = vld [vmem:[#allocation9 + $0x4] ss:$16 sps:$4 sm:$0xff]   ;;  %v96_v43 = vlaneseq }
  0x35   :  { %172 = vmatprep.mubr.bf16.mxu1 %v2062_v0  ;;  %469 = vmatprep.mubr.bf16.mxu0 %v2062_v0  ;;  %84 = vst [vmem:[#allocation2] sm:$0x3] %v2063_v1  ;;  %85 = vst [vmem:[#allocation3] sm:$0x3] %v2063_v1  ;;  %v2124_v3 = vld [vmem:[#allocation11 + $0xe4] ss:$16 sps:$4 sm:$0xff]  }
  0x36   :  { %86 = vst [vmem:[#allocation4] sm:$0x3] %v2063_v1  ;;  %154 = vmatprep.subr.bf16.mxu1 %v1732_v2  ;;  %v1736_v4 = vld [vmem:[#allocation9] ss:$16 sps:$4 sm:$0xff]   ;;  %437 = vmatprep.subr.bf16.mxu0 %v2124_v3  ;;  %v88_v7 = vld [vmem:[#allocation6 + $0x8] sm:$0xff]  ;;  %vm136_vm0 = vcmask 130048  }
  0x37   :  { %v2126_v5 = vld [vmem:[#allocation11 + $0xe0] ss:$16 sps:$4 sm:$0xff]   ;;  %155 = vmatpush1.bf16.msra.mxu1 %v1736_v4  ;;  %v2130_v9 = vld [vmem:[#allocation11 + $0xc4] ss:$16 sps:$4 sm:$0xff]   ;;  %v1741_v11 = vld [vmem:[#allocation9 + $0x8] ss:$16 sps:$4 sm:$0xff]  }
  0x38   :  { %v87_v6 = vld [vmem:[#allocation6] sm:$0xff]  ;;  %438 = vmatpush1.bf16.msra.mxu0 %v2126_v5  ;;  %v1743_v12 = vld [vmem:[#allocation9 + $0xc] ss:$16 sps:$4 sm:$0xff]   ;;  %v2148_v17 = vld [vmem:[#allocation11 + $0xe8] ss:$16 sps:$4 sm:$0xff]   ;;  %v97_v44 = vshrl.u32 %v96_v43, 7 }
  0x39   :  { %v89_v8 = vpack.c.bf16 %v88_v7, %v87_v6  ;;  %v2132_v10 = vld [vmem:[#allocation11 + $0xc0] ss:$16 sps:$4 sm:$0xff]   ;;  %439 = vmatprep.subr.bf16.mxu0 %v2130_v9  ;;  %v2135_v13 = vld [vmem:[#allocation11 + $0xa4] ss:$16 sps:$4 sm:$0xff]   ;;  %197 = vmatprep.subr.bf16.mxu1 %v1743_v12  ;;  %v2141_v15 = vld [vmem:[#allocation11 + $0xec] ss:$16 sps:$4 sm:$0xff]  }
  0x3a   :  { %v2138_v14 = vld [vmem:[#allocation11 + $0xa0] ss:$16 sps:$4 sm:$0xff]   ;;  %v2145_v16 = vld [vmem:[#allocation11 + $0x84] ss:$16 sps:$4 sm:$0xff]   ;;  %v2153_v19 = vld [vmem:[#allocation11 + $0xcc] ss:$16 sps:$4 sm:$0xff]  }
  0x3b   :  { %1609 = vmatmul.mubr.msk.bf16.vlgmr.msra.gmra.mxu1 %vm136_vm0, %v89_v8  ;;  %v2151_v18 = vld [vmem:[#allocation11 + $0x80] ss:$16 sps:$4 sm:$0xff]   ;;  %v2156_v20 = vld [vmem:[#allocation11 + $0x64] ss:$16 sps:$4 sm:$0xff]   ;;  %v2159_v21 = vld [vmem:[#allocation11 + $0xc8] ss:$16 sps:$4 sm:$0xff]  }
  0x3c   :  { %440 = vmatpush1.bf16.msra.mxu0 %v2132_v10  ;;  %198 = vmatpush1.bf16.msra.mxu1 %v1741_v11  ;;  %v2163_v22 = vld [vmem:[#allocation11 + $0x60] ss:$16 sps:$4 sm:$0xff]   ;;  %v2167_v23 = vld [vmem:[#allocation11 + $0xac] ss:$16 sps:$4 sm:$0xff]   ;;  %v2169_v24 = vld [vmem:[#allocation11 + $0x44] ss:$16 sps:$4 sm:$0xff]  }
  0x3d   :  { %441 = vmatprep.subr.bf16.mxu0 %v2135_v13  ;;  %215 = vmatprep.mubr.bf16.mxu1 %v2062_v0  ;;  %v2174_v25 = vld [vmem:[#allocation11 + $0xa8] ss:$16 sps:$4 sm:$0xff]   ;;  %v2176_v26 = vld [vmem:[#allocation11 + $0x40] ss:$16 sps:$4 sm:$0xff]   ;;  %v2180_v27 = vld [vmem:[#allocation11 + $0x8c] ss:$16 sps:$4 sm:$0xff]  }
  0x3e   :  { %478 = vmatprep.subr.bf16.mxu1 %v2141_v15  ;;  %v2182_v28 = vld [vmem:[#allocation11 + $0x24] ss:$16 sps:$4 sm:$0xff]   ;;  %v2186_v29 = vld [vmem:[#allocation11 + $0x88] ss:$16 sps:$4 sm:$0xff]   ;;  %v2188_v30 = vld [vmem:[#allocation11 + $0x20] ss:$16 sps:$4 sm:$0xff]  }
  0x3f   :  { %v2192_v31 = vld [vmem:[#allocation11 + $0x6c] ss:$16 sps:$4 sm:$0xff]   ;;  %v2194_v32 = vld [vmem:[#allocation11 + $0x4] ss:$16 sps:$4 sm:$0xff]   ;;  %v2198_v33 = vld [vmem:[#allocation11 + $0x68] ss:$16 sps:$4 sm:$0xff]  }
  0x40   :  { %442 = vmatpush1.bf16.msra.mxu0 %v2138_v14  ;;  %v2200_v34 = vld [vmem:[#allocation11] ss:$16 sps:$4 sm:$0xff]   ;;  %v237_v35 = vld [vmem:[#allocation2] sm:$0x3]  ;;  %v2204_v36 = vld [vmem:[#allocation11 + $0x4c] ss:$16 sps:$4 sm:$0xff]  }
  0x41   :  { %443 = vmatprep.subr.bf16.mxu0 %v2145_v16  ;;  %v244_v37 = vpack.c.bf16 %v237_v35, %v237_v35  ;;  %v2208_v38 = vld [vmem:[#allocation11 + $0x48] ss:$16 sps:$4 sm:$0xff]   ;;  %v2211_v39 = vld [vmem:[#allocation11 + $0x2c] ss:$16 sps:$4 sm:$0xff]   ;;  %v98_v45 = vsub.s32 0, %v97_v44  ;;  %v102_v47 = vsub.s32 1, %v97_v44 }
  0x42   :  { %v2215_v40 = vld [vmem:[#allocation11 + $0x28] ss:$16 sps:$4 sm:$0xff]   ;;  %v2219_v41 = vld [vmem:[#allocation11 + $0xc] ss:$16 sps:$4 sm:$0xff]   ;;  %v106_v52 = vsub.s32 2, %v97_v44  ;;  %v110_v55 = vsub.s32 3, %v97_v44 }
  0x43   :  { %1610 = vmatmul.mubr.msk.bf16.vlgmr.msra.gmra.mxu1 %vm136_vm0, %v89_v8  ;;  %v2224_v42 = vld [vmem:[#allocation11 + $0x8] ss:$16 sps:$4 sm:$0xff]   ;;  %vm2064_vm1 = vmmov 0   ;;  %s2065_s20 = smov [#allocation14]  }
  0x44   :  { %479 = vmatpush1.bf16.msra.mxu1 %v2148_v17  ;;  %444 = vmatpush1.bf16.msra.mxu0 %v2151_v18  ;;  %v94_v46 = vld [vmem:[%s2576_s3] sm:$0xf]  ;;  %s1594_s21 = sshll.u32 %s2065_s20, 4  ;;  %s1595_s21 = int_to_ptr.vmem [resolvable:$true] %s1594_s21 }
  0x45   :  { %480 = vmatprep.subr.bf16.mxu1 %v2153_v19  ;;  %445 = vmatprep.subr.bf16.mxu0 %v2156_v20  ;;  %v99_v48 = vrot.slane %v94_v46, %v98_v45  ;;  %v103_v49 = vrot.slane %v94_v46, %v102_v47  ;;  %v107_v58 = vrot.slane %v94_v46, %v106_v52  ;;  %s2026_s22 = scalar_lea.vmem %s1595_s21, 32  ;;  %p2031_p7 = scmp.lt.s32.totalorder %s1595_s21, %s1595_s21 }
  0x46   :  { %510 = vmatprep.mubr.bf16.mxu1 %v2062_v0  ;;  %v111_v61 = vrot.slane %v94_v46, %v110_v55  ;;  %p2027_p6 = scmp.ne.s32.totalorder %s1595_s21, %s2026_s22  ;;  %p2032_p8 = scmp.lt.s32.totalorder %s2026_s22, %s2026_s22 }
  0x48   :  { %481 = vmatpush1.bf16.msra.mxu1 %v2159_v21  ;;  %446 = vmatpush1.bf16.msra.mxu0 %v2163_v22  ;;  %p2033_p9 = por %p2032_p8, %p2031_p7 }
  0x49   :  { %482 = vmatprep.subr.bf16.mxu1 %v2167_v23  ;;  %447 = vmatprep.subr.bf16.mxu0 %v2169_v24 }
  0x4a   :  { %p2034_p10 = pnand %p2033_p9, %p2027_p6 }
  0x4c   :  { %483 = vmatpush1.bf16.msra.mxu1 %v2174_v25  ;;  %448 = vmatpush1.bf16.msra.mxu0 %v2176_v26 }
  0x4d   :  { %484 = vmatprep.subr.bf16.mxu1 %v2180_v27  ;;  %449 = vmatprep.subr.bf16.mxu0 %v2182_v28 }
  0x50   :  { %485 = vmatpush1.bf16.msra.mxu1 %v2186_v29  ;;  %450 = vmatpush1.bf16.msra.mxu0 %v2188_v30 }
  0x51   :  { %486 = vmatprep.subr.bf16.mxu1 %v2192_v31  ;;  %451 = vmatprep.subr.bf16.mxu0 %v2194_v32 }
  0x54   :  { %487 = vmatpush1.bf16.msra.mxu1 %v2198_v33  ;;  %452 = vmatpush1.bf16.msra.mxu0 %v2200_v34 }
  0x55   :  { %488 = vmatprep.subr.bf16.mxu1 %v2204_v36  ;;  %553 = vmatprep.subr.bf16.mxu0 %v2124_v3 }
  0x57   :  { %470 = vmatmul.mubr.bf16.vlgmr.msra.gmra.mxu0 %v244_v37 }
  0x58   :  { %489 = vmatpush1.bf16.msra.mxu1 %v2208_v38  ;;  %554 = vmatpush1.bf16.msra.mxu0 %v2126_v5 }
  0x59   :  { %490 = vmatprep.subr.bf16.mxu1 %v2211_v39  ;;  %555 = vmatprep.subr.bf16.mxu0 %v2130_v9 }
  0x5a   :  { %585 = vmatprep.mubr.bf16.mxu0 %v2062_v0 }
  0x5c   :  { %491 = vmatpush1.bf16.msra.mxu1 %v2215_v40  ;;  %556 = vmatpush1.bf16.msra.mxu0 %v2132_v10 }
  0x5d   :  { %492 = vmatprep.subr.bf16.mxu1 %v2219_v41  ;;  %557 = vmatprep.subr.bf16.mxu0 %v2135_v13 }
  0x60   :  { %493 = vmatpush1.bf16.msra.mxu1 %v2224_v42  ;;  %558 = vmatpush1.bf16.msra.mxu0 %v2138_v14 }
  0x61   :  { %594 = vmatprep.subr.bf16.mxu1 %v2141_v15  ;;  %559 = vmatprep.subr.bf16.mxu0 %v2145_v16 }
  0x63   :  { %511 = vmatmul.mubr.bf16.vlgmr.msra.gmra.mxu1 %v244_v37 }
  0x64   :  { %595 = vmatpush1.bf16.msra.mxu1 %v2148_v17  ;;  %560 = vmatpush1.bf16.msra.mxu0 %v2151_v18 }
  0x65   :  { %596 = vmatprep.subr.bf16.mxu1 %v2153_v19  ;;  %561 = vmatprep.subr.bf16.mxu0 %v2156_v20 }
  0x66   :  { %626 = vmatprep.mubr.bf16.mxu1 %v2062_v0 }
  0x68   :  { %597 = vmatpush1.bf16.msra.mxu1 %v2159_v21  ;;  %562 = vmatpush1.bf16.msra.mxu0 %v2163_v22 }
  0x69   :  { %598 = vmatprep.subr.bf16.mxu1 %v2167_v23  ;;  %563 = vmatprep.subr.bf16.mxu0 %v2169_v24 }
  0x6c   :  { %599 = vmatpush1.bf16.msra.mxu1 %v2174_v25  ;;  %564 = vmatpush1.bf16.msra.mxu0 %v2176_v26 }
  0x6d   :  { %600 = vmatprep.subr.bf16.mxu1 %v2180_v27  ;;  %565 = vmatprep.subr.bf16.mxu0 %v2182_v28 }
  0x70   :  { %601 = vmatpush1.bf16.msra.mxu1 %v2186_v29  ;;  %566 = vmatpush1.bf16.msra.mxu0 %v2188_v30 }
  0x71   :  { %602 = vmatprep.subr.bf16.mxu1 %v2192_v31  ;;  %567 = vmatprep.subr.bf16.mxu0 %v2194_v32 }
  0x74   :  { %603 = vmatpush1.bf16.msra.mxu1 %v2198_v33  ;;  %568 = vmatpush1.bf16.msra.mxu0 %v2200_v34 }
  0x75   :  { %604 = vmatprep.subr.bf16.mxu1 %v2204_v36  ;;  %690 = vmatprep.subr.bf16.mxu0 %v2124_v3 }
  0x78   :  { %605 = vmatpush1.bf16.msra.mxu1 %v2208_v38 }
  0x79   :  { %606 = vmatprep.subr.bf16.mxu1 %v2211_v39 }
  0x7c   :  { %607 = vmatpush1.bf16.msra.mxu1 %v2215_v40 }
  0x7d   :  { %608 = vmatprep.subr.bf16.mxu1 %v2219_v41 }
  0x80   :  { %609 = vmatpush1.bf16.msra.mxu1 %v2224_v42 }
  0x81   :  { %731 = vmatprep.subr.bf16.mxu1 %v2141_v15 }
  0xfb   :  { %v174_v50 = vpop.f32.mrf.mxu1 }
  0xfc   :  { %v175_v51 = vadd.f32 %v174_v50, %v99_v48 }
  0xfd   :  { %v176_v53 = vpop.f32.mrf.mxu1 }
  0xfe   :  { %229 = vst [vmem:[#allocation5 + $0x30] sm:$0xff] %v175_v51  ;;  %v177_v54 = vadd.f32 %v176_v53, %v103_v49 }
  0xff   :  { %v178_v56 = vpop.f32.mrf.mxu1 }
 0x100   :  { %230 = vst [vmem:[#allocation5] sm:$0xff] %v177_v54  ;;  %v179_v57 = vadd.f32 %v178_v56, %v99_v48 }
 0x101   :  { %v180_v59 = vpop.f32.mrf.mxu1 }
 0x102   :  { %233 = vst [vmem:[#allocation5 + $0x8] sm:$0xff] %v179_v57  ;;  %v181_v60 = vadd.f32 %v180_v59, %v103_v49 }
 0x103   :  { %v217_v62 = vpop.f32.mrf.mxu1 }
 0x104   :  { %234 = vst [vmem:[#allocation5 + $0x20] sm:$0xff] %v181_v60  ;;  %v218_v63 = vadd.f32 %v217_v62, %v107_v58 }
 0x105   :  { %v219_v2 = vpop.f32.mrf.mxu1  ;;  %v240_v12 = vld [vmem:[#allocation5 + $0x30] sm:$0x3] }
 0x106   :  { %231 = vst [vmem:[#allocation5 + $0x18] sm:$0xff] %v218_v63  ;;  %v220_v4 = vadd.f32 %v219_v2, %v111_v61 }
 0x107   :  { %v221_v6 = vpop.f32.mrf.mxu1  ;;  %v241_v43 = vld [vmem:[#allocation5] sm:$0x3] }
 0x108   :  { %232 = vst [vmem:[#allocation5 + $0x10] sm:$0xff] %v220_v4  ;;  %v222_v7 = vadd.f32 %v221_v6, %v107_v58  ;;  %v238_v4 = vld [vmem:[#allocation3] sm:$0x3] }
 0x109   :  { %v223_v8 = vpop.f32.mrf.mxu1 }
 0x10a   :  { %235 = vst [vmem:[#allocation5 + $0x28] sm:$0xff] %v222_v7  ;;  %v224_v11 = vadd.f32 %v223_v8, %v111_v61 }
 0x10c   :  { %236 = vst [vmem:[#allocation5 + $0x38] sm:$0xff] %v224_v11 }
 0x10d   :  { %v242_v55 = vld [vmem:[#allocation5 + $0x18] sm:$0x3] }
 0x10f   :  { %v243_v51 = vld [vmem:[#allocation5 + $0x10] sm:$0x3] }
 0x117   :  { %v471_v35 = vpop.f32.mrf.mxu0 }
 0x118   :  { %v519_v37 = vadd.f32 %v471_v35, %v240_v12 }
 0x119   :  { %v473_v44 = vpop.f32.mrf.mxu0 }
 0x11a   :  { %v1643_v45 = vmul.f32 -1.442695, %v519_v37  ;;  %v520_v46 = vadd.f32 %v473_v44, %v241_v43 }
 0x11b   :  { %v475_v47 = vpop.f32.mrf.mxu0 }
 0x11c   :  { %1786 = vpow2.f32 %v1643_v45  ;;  %v1644_v48 = vmul.f32 -1.442695, %v520_v46 }
 0x11d   :  { %v476_v49 = vpop.f32.mrf.mxu0 }
 0x11e   :  { %1788 = vpow2.f32 %v1644_v48  ;;  %v548_v49 = vld [vmem:[#allocation5 + $0x30] sm:$0xc] }
 0x123   :  { %v512_v50 = vpop.f32.mrf.mxu1 }
 0x124   :  { %v521_v58 = vadd.f32 %v512_v50, %v242_v55 }
 0x125   :  { %v514_v52 = vpop.f32.mrf.mxu1 }
 0x126   :  { %v522_v53 = vadd.f32 %v514_v52, %v243_v51 }
 0x127   :  { %v516_v54 = vpop.f32.mrf.mxu1 }
 0x128   :  { %v1645_v56 = vmul.f32 -1.442695, %v522_v53  ;;  %v549_v54 = vld [vmem:[#allocation5] sm:$0xc] }
 0x129   :  { %v1787_v57 = vpop.eup %1786  ;;  %v517_v59 = vpop.f32.mrf.mxu1 }
 0x12a   :  { %v526_v60 = vadd.f32 1.0, %v1787_v57  ;;  %1790 = vpow2.f32 %v1645_v56 }
 0x12b   :  { %v1789_v61 = vpop.eup %1788 }
 0x12c   :  { %1792 = vrcp.f32 %v526_v60  ;;  %v532_v62 = vadd.f32 1.0, %v1789_v61 }
 0x12d   :  { %1794 = vtanh.f32 %v521_v58 }
 0x12e   :  { %1796 = vrcp.f32 %v532_v62 }
 0x137   :  { %v1791_v63 = vpop.eup %1790 }
 0x138   :  { %v539_v8 = vadd.f32 1.0, %v1791_v63  ;;  %v551_v63 = vld [vmem:[#allocation5 + $0x10] sm:$0xc] }
 0x139   :  { %v1793_v2 = vpop.eup %1792 }
 0x13a   :  { %v1795_v6 = vpop.eup %1794  ;;  %1798 = vrcp.f32 %v539_v8 }
 0x13b   :  { %v1797_v7 = vpop.eup %1796  ;;  %v543_v12 = vmul.f32 %v1795_v6, %v1793_v2 }
 0x13c   :  { %v542_v11 = vmul.f32 %v1797_v7, %v238_v4  ;;  %v550_v7 = vld [vmem:[#allocation5 + $0x18] sm:$0xc] }
 0x13e   :  { %v2263_v35 = vadd.f32 %v543_v12, %v542_v11 }
 0x140   :  { %1800 = vtanh.f32 %v2263_v35 }
 0x147   :  { %v1799_v37 = vpop.eup %1798 }
 0x14d   :  { %v1801_v43 = vpop.eup %1800 }
 0x14e   :  { %v2266_v44 = vmul.f32 %v1801_v43, %v1799_v37 }
 0x150   :  { %v552_v45 = vpack.c.bf16 %v2266_v44, %v2266_v44 }
 0x152   :  { %586 = vmatmul.mubr.bf16.vlgmr.msra.gmra.mxu0 %v552_v45  ;;  %627 = vmatmul.mubr.bf16.vlgmr.msra.gmra.mxu1 %v552_v45 }
 0x153   :  { %691 = vmatpush1.bf16.msra.mxu0 %v2126_v5  ;;  %732 = vmatpush1.bf16.msra.mxu1 %v2148_v17 }
 0x154   :  { %692 = vmatprep.subr.bf16.mxu0 %v2130_v9  ;;  %733 = vmatprep.subr.bf16.mxu1 %v2153_v19 }
 0x155   :  { %722 = vmatprep.mubr.bf16.mxu0 %v2062_v0  ;;  %763 = vmatprep.mubr.bf16.mxu1 %v2062_v0 }
 0x157   :  { %693 = vmatpush1.bf16.msra.mxu0 %v2132_v10  ;;  %734 = vmatpush1.bf16.msra.mxu1 %v2159_v21 }
 0x158   :  { %694 = vmatprep.subr.bf16.mxu0 %v2135_v13  ;;  %735 = vmatprep.subr.bf16.mxu1 %v2167_v23 }
 0x15b   :  { %695 = vmatpush1.bf16.msra.mxu0 %v2138_v14  ;;  %736 = vmatpush1.bf16.msra.mxu1 %v2174_v25 }
 0x15c   :  { %696 = vmatprep.subr.bf16.mxu0 %v2145_v16  ;;  %737 = vmatprep.subr.bf16.mxu1 %v2180_v27 }
 0x15f   :  { %697 = vmatpush1.bf16.msra.mxu0 %v2151_v18  ;;  %738 = vmatpush1.bf16.msra.mxu1 %v2186_v29 }
 0x160   :  { %698 = vmatprep.subr.bf16.mxu0 %v2156_v20  ;;  %739 = vmatprep.subr.bf16.mxu1 %v2192_v31 }
 0x163   :  { %699 = vmatpush1.bf16.msra.mxu0 %v2163_v22  ;;  %740 = vmatpush1.bf16.msra.mxu1 %v2198_v33 }
 0x164   :  { %700 = vmatprep.subr.bf16.mxu0 %v2169_v24  ;;  %741 = vmatprep.subr.bf16.mxu1 %v2204_v36 }
 0x167   :  { %701 = vmatpush1.bf16.msra.mxu0 %v2176_v26  ;;  %742 = vmatpush1.bf16.msra.mxu1 %v2208_v38 }
 0x168   :  { %702 = vmatprep.subr.bf16.mxu0 %v2182_v28  ;;  %743 = vmatprep.subr.bf16.mxu1 %v2211_v39 }
 0x16b   :  { %703 = vmatpush1.bf16.msra.mxu0 %v2188_v30  ;;  %744 = vmatpush1.bf16.msra.mxu1 %v2215_v40 }
 0x16c   :  { %704 = vmatprep.subr.bf16.mxu0 %v2194_v32  ;;  %745 = vmatprep.subr.bf16.mxu1 %v2219_v41 }
 0x16f   :  { %705 = vmatpush1.bf16.msra.mxu0 %v2200_v34  ;;  %746 = vmatpush1.bf16.msra.mxu1 %v2224_v42 }
 0x170   :  { %827 = vmatprep.subr.bf16.mxu0 %v2124_v3  ;;  %868 = vmatprep.subr.bf16.mxu1 %v2141_v15 }
 0x212   :  { %v587_v46 = vpop.f32.mrf.mxu0  ;;  %v628_v47 = vpop.f32.mrf.mxu1 }
 0x213   :  { %v639_v48 = vrot.slane %v587_v46, 6  ;;  %v641_v4 = vrot.slane %v628_v47, 6 }
 0x214   :  { %v589_v50 = vpop.f32.mrf.mxu0  ;;  %v630_v51 = vpop.f32.mrf.mxu1 }
 0x215   :  { %v647_v52 = vadd.f32 %v639_v48, %v548_v49  ;;  %v640_v53 = vrot.slane %v589_v50, 6  ;;  %v642_v62 = vrot.slane %v630_v51, 6  ;;  %v649_v11 = vadd.f32 %v641_v4, %v550_v7 }
 0x216   :  { %v591_v55 = vpop.f32.mrf.mxu0  ;;  %v632_v56 = vpop.f32.mrf.mxu1  ;;  %v671_v49 = vrot.slane %v2263_v35, 6 }
 0x217   :  { %v1646_v57 = vmul.f32 -1.442695, %v647_v52  ;;  %v648_v58 = vadd.f32 %v640_v53, %v549_v54  ;;  %v650_v2 = vadd.f32 %v642_v62, %v551_v63  ;;  %v239_v56 = vld [vmem:[#allocation4] sm:$0x3] }
 0x218   :  { %v592_v59 = vpop.f32.mrf.mxu0  ;;  %v633_v60 = vpop.f32.mrf.mxu1 }
 0x219   :  { %1802 = vpow2.f32 %v1646_v57  ;;  %v1647_v61 = vmul.f32 -1.442695, %v648_v58  ;;  %v1648_v6 = vmul.f32 -1.442695, %v650_v2  ;;  %v547_v58 = vadd.f32 %v2266_v44, %v239_v56  ;;  %v682_v2 = vld [vmem:[#allocation5 + $0x30] sm:$0x30] }
 0x21b   :  { %1804 = vpow2.f32 %v1647_v61 }
 0x21c   :  { %1806 = vpow2.f32 %v1648_v6 }
 0x226   :  { %v1803_v8 = vpop.eup %1802 }
 0x227   :  { %v654_v12 = vadd.f32 1.0, %v1803_v8 }
 0x228   :  { %v1805_v37 = vpop.eup %1804 }
 0x229   :  { %1808 = vrcp.f32 %v654_v12  ;;  %v660_v43 = vadd.f32 1.0, %v1805_v37  ;;  %v1807_v45 = vpop.eup %1806 }
 0x22a   :  { %1810 = vtanh.f32 %v649_v11  ;;  %v667_v51 = vadd.f32 1.0, %v1807_v45  ;;  %v683_v11 = vld [vmem:[#allocation5] sm:$0x30] }
 0x22b   :  { %1812 = vrcp.f32 %v660_v43 }
 0x22c   :  { %1814 = vrcp.f32 %v667_v51  ;;  %v685_v51 = vld [vmem:[#allocation5 + $0x10] sm:$0x30] }
 0x236   :  { %v1809_v46 = vpop.eup %1808 }
 0x237   :  { %v1811_v48 = vpop.eup %1810 }
 0x238   :  { %v1813_v50 = vpop.eup %1812  ;;  %v674_v52 = vmul.f32 %v1811_v48, %v1809_v46 }
 0x239   :  { %v673_v47 = vmul.f32 %v1813_v50, %v671_v49  ;;  %v1815_v54 = vpop.eup %1814 }
 0x23b   :  { %v2305_v53 = vadd.f32 %v674_v52, %v673_v47 }
 0x23d   :  { %1816 = vtanh.f32 %v2305_v53 }
 0x24a   :  { %v1817_v55 = vpop.eup %1816 }
 0x24b   :  { %v677_v57 = vmul.f32 %v1817_v55, %v1815_v54  ;;  %v684_v55 = vld [vmem:[#allocation5 + $0x18] sm:$0x30] }
 0x24d   :  { %v679_v59 = vrot.slane %v677_v57, 2  ;;  %v686_v60 = vpack.c.bf16 %v677_v57, %v677_v57 }
 0x24f   :  { %v2309_v61 = vadd.f32 %v679_v59, %v547_v58  ;;  %v688_v35 = vrot.slane %v686_v60, 1 }
 0x251   :  { %723 = vmatmul.mubr.bf16.vlgmr.msra.gmra.mxu0 %v688_v35  ;;  %764 = vmatmul.mubr.bf16.vlgmr.msra.gmra.mxu1 %v688_v35 }
 0x252   :  { %828 = vmatpush1.bf16.msra.mxu0 %v2126_v5  ;;  %869 = vmatpush1.bf16.msra.mxu1 %v2148_v17 }
 0x253   :  { %829 = vmatprep.subr.bf16.mxu0 %v2130_v9  ;;  %870 = vmatprep.subr.bf16.mxu1 %v2153_v19 }
 0x254   :  { %859 = vmatprep.mubr.bf16.mxu0 %v2062_v0  ;;  %900 = vmatprep.mubr.bf16.mxu1 %v2062_v0 }
 0x256   :  { %830 = vmatpush1.bf16.msra.mxu0 %v2132_v10  ;;  %871 = vmatpush1.bf16.msra.mxu1 %v2159_v21 }
 0x257   :  { %831 = vmatprep.subr.bf16.mxu0 %v2135_v13  ;;  %872 = vmatprep.subr.bf16.mxu1 %v2167_v23 }
 0x25a   :  { %832 = vmatpush1.bf16.msra.mxu0 %v2138_v14  ;;  %873 = vmatpush1.bf16.msra.mxu1 %v2174_v25 }
 0x25b   :  { %833 = vmatprep.subr.bf16.mxu0 %v2145_v16  ;;  %874 = vmatprep.subr.bf16.mxu1 %v2180_v27 }
 0x25e   :  { %834 = vmatpush1.bf16.msra.mxu0 %v2151_v18  ;;  %875 = vmatpush1.bf16.msra.mxu1 %v2186_v29 }
 0x25f   :  { %835 = vmatprep.subr.bf16.mxu0 %v2156_v20  ;;  %876 = vmatprep.subr.bf16.mxu1 %v2192_v31 }
 0x262   :  { %836 = vmatpush1.bf16.msra.mxu0 %v2163_v22  ;;  %877 = vmatpush1.bf16.msra.mxu1 %v2198_v33 }
 0x263   :  { %837 = vmatprep.subr.bf16.mxu0 %v2169_v24  ;;  %878 = vmatprep.subr.bf16.mxu1 %v2204_v36 }
 0x266   :  { %838 = vmatpush1.bf16.msra.mxu0 %v2176_v26  ;;  %879 = vmatpush1.bf16.msra.mxu1 %v2208_v38 }
 0x267   :  { %839 = vmatprep.subr.bf16.mxu0 %v2182_v28  ;;  %880 = vmatprep.subr.bf16.mxu1 %v2211_v39 }
 0x26a   :  { %840 = vmatpush1.bf16.msra.mxu0 %v2188_v30  ;;  %881 = vmatpush1.bf16.msra.mxu1 %v2215_v40 }
 0x26b   :  { %841 = vmatprep.subr.bf16.mxu0 %v2194_v32  ;;  %882 = vmatprep.subr.bf16.mxu1 %v2219_v41 }
 0x26e   :  { %842 = vmatpush1.bf16.msra.mxu0 %v2200_v34  ;;  %883 = vmatpush1.bf16.msra.mxu1 %v2224_v42 }
 0x26f   :  { %964 = vmatprep.subr.bf16.mxu0 %v2124_v3  ;;  %1005 = vmatprep.subr.bf16.mxu1 %v2141_v15 }
 0x311   :  { %v724_v44 = vpop.f32.mrf.mxu0  ;;  %v765_v62 = vpop.f32.mrf.mxu1 }
 0x312   :  { %v776_v63 = vrot.slane %v724_v44, 4  ;;  %v778_v47 = vrot.slane %v765_v62, 4 }
 0x313   :  { %v726_v4 = vpop.f32.mrf.mxu0  ;;  %v767_v6 = vpop.f32.mrf.mxu1 }
 0x314   :  { %v784_v7 = vadd.f32 %v776_v63, %v682_v2  ;;  %v777_v8 = vrot.slane %v726_v4, 4  ;;  %v779_v50 = vrot.slane %v767_v6, 4  ;;  %v786_v57 = vadd.f32 %v778_v47, %v684_v55  ;;  %v820_v55 = vld [vmem:[#allocation5] sm:$0xc0] }
 0x315   :  { %v728_v12 = vpop.f32.mrf.mxu0  ;;  %v769_v37 = vpop.f32.mrf.mxu1  ;;  %v808_v2 = vrot.slane %v2305_v53, 6 }
 0x316   :  { %v1649_v43 = vmul.f32 -1.442695, %v784_v7  ;;  %v785_v45 = vadd.f32 %v777_v8, %v683_v11  ;;  %v787_v52 = vadd.f32 %v779_v50, %v685_v51  ;;  %v819_v50 = vld [vmem:[#allocation5 + $0x30] sm:$0xc0] }
 0x317   :  { %v729_v46 = vpop.f32.mrf.mxu0  ;;  %v770_v48 = vpop.f32.mrf.mxu1 }
 0x318   :  { %1818 = vpow2.f32 %v1649_v43  ;;  %v1650_v49 = vmul.f32 -1.442695, %v785_v45  ;;  %v1651_v54 = vmul.f32 -1.442695, %v787_v52 }
 0x31a   :  { %1820 = vpow2.f32 %v1650_v49 }
 0x31b   :  { %1822 = vpow2.f32 %v1651_v54 }
 0x325   :  { %v1819_v56 = vpop.eup %1818 }
 0x326   :  { %v791_v58 = vadd.f32 1.0, %v1819_v56 }
 0x327   :  { %v1821_v59 = vpop.eup %1820 }
 0x328   :  { %1824 = vrcp.f32 %v791_v58  ;;  %v797_v60 = vadd.f32 1.0, %v1821_v59  ;;  %v1823_v35 = vpop.eup %1822 }
 0x329   :  { %1826 = vtanh.f32 %v786_v57  ;;  %v804_v6 = vadd.f32 1.0, %v1823_v35 }
 0x32a   :  { %1828 = vrcp.f32 %v797_v60 }
 0x32b   :  { %1830 = vrcp.f32 %v804_v6 }
 0x335   :  { %v1825_v44 = vpop.eup %1824 }
 0x336   :  { %v1827_v63 = vpop.eup %1826 }
 0x337   :  { %v1829_v4 = vpop.eup %1828  ;;  %v811_v7 = vmul.f32 %v1827_v63, %v1825_v44  ;;  %v822_v63 = vld [vmem:[#allocation5 + $0x10] sm:$0xc0] }
 0x338   :  { %v810_v62 = vmul.f32 %v1829_v4, %v808_v2  ;;  %v1831_v11 = vpop.eup %1830 }
 0x33a   :  { %v2346_v8 = vadd.f32 %v811_v7, %v810_v62  ;;  %v821_v7 = vld [vmem:[#allocation5 + $0x18] sm:$0xc0] }
 0x33c   :  { %1832 = vtanh.f32 %v2346_v8 }
 0x349   :  { %v1833_v12 = vpop.eup %1832 }
 0x34a   :  { %v814_v37 = vmul.f32 %v1833_v12, %v1831_v11 }
 0x34c   :  { %v816_v43 = vrot.slane %v814_v37, 4  ;;  %v823_v45 = vpack.c.bf16 %v814_v37, %v814_v37 }
 0x34e   :  { %v2350_v46 = vadd.f32 %v816_v43, %v2309_v61  ;;  %v825_v48 = vrot.slane %v823_v45, 2 }
 0x350   :  { %860 = vmatmul.mubr.bf16.vlgmr.msra.gmra.mxu0 %v825_v48  ;;  %901 = vmatmul.mubr.bf16.vlgmr.msra.gmra.mxu1 %v825_v48 }
 0x351   :  { %965 = vmatpush1.bf16.msra.mxu0 %v2126_v5  ;;  %1006 = vmatpush1.bf16.msra.mxu1 %v2148_v17 }
 0x352   :  { %966 = vmatprep.subr.bf16.mxu0 %v2130_v9  ;;  %1007 = vmatprep.subr.bf16.mxu1 %v2153_v19 }
 0x353   :  { %996 = vmatprep.mubr.bf16.mxu0 %v2062_v0  ;;  %1037 = vmatprep.mubr.bf16.mxu1 %v2062_v0 }
 0x355   :  { %967 = vmatpush1.bf16.msra.mxu0 %v2132_v10  ;;  %1008 = vmatpush1.bf16.msra.mxu1 %v2159_v21 }
 0x356   :  { %968 = vmatprep.subr.bf16.mxu0 %v2135_v13  ;;  %1009 = vmatprep.subr.bf16.mxu1 %v2167_v23 }
 0x359   :  { %969 = vmatpush1.bf16.msra.mxu0 %v2138_v14  ;;  %1010 = vmatpush1.bf16.msra.mxu1 %v2174_v25 }
 0x35a   :  { %970 = vmatprep.subr.bf16.mxu0 %v2145_v16  ;;  %1011 = vmatprep.subr.bf16.mxu1 %v2180_v27 }
 0x35d   :  { %971 = vmatpush1.bf16.msra.mxu0 %v2151_v18  ;;  %1012 = vmatpush1.bf16.msra.mxu1 %v2186_v29 }
 0x35e   :  { %972 = vmatprep.subr.bf16.mxu0 %v2156_v20  ;;  %1013 = vmatprep.subr.bf16.mxu1 %v2192_v31 }
 0x361   :  { %973 = vmatpush1.bf16.msra.mxu0 %v2163_v22  ;;  %1014 = vmatpush1.bf16.msra.mxu1 %v2198_v33 }
 0x362   :  { %974 = vmatprep.subr.bf16.mxu0 %v2169_v24  ;;  %1015 = vmatprep.subr.bf16.mxu1 %v2204_v36 }
 0x365   :  { %975 = vmatpush1.bf16.msra.mxu0 %v2176_v26  ;;  %1016 = vmatpush1.bf16.msra.mxu1 %v2208_v38 }
 0x366   :  { %976 = vmatprep.subr.bf16.mxu0 %v2182_v28  ;;  %1017 = vmatprep.subr.bf16.mxu1 %v2211_v39 }
 0x369   :  { %977 = vmatpush1.bf16.msra.mxu0 %v2188_v30  ;;  %1018 = vmatpush1.bf16.msra.mxu1 %v2215_v40 }
 0x36a   :  { %978 = vmatprep.subr.bf16.mxu0 %v2194_v32  ;;  %1019 = vmatprep.subr.bf16.mxu1 %v2219_v41 }
 0x36d   :  { %979 = vmatpush1.bf16.msra.mxu0 %v2200_v34  ;;  %1020 = vmatpush1.bf16.msra.mxu1 %v2224_v42 }
 0x36e   :  { %1083 = vmatprep.subr.bf16.mxu0 %v2124_v3  ;;  %1124 = vmatprep.subr.bf16.mxu1 %v2141_v15 }
 0x410   :  { %v861_v53 = vpop.f32.mrf.mxu0  ;;  %v902_v61 = vpop.f32.mrf.mxu1 }
 0x411   :  { %v913_v49 = vrot.slane %v861_v53, 2  ;;  %v915_v4 = vrot.slane %v902_v61, 2 }
 0x412   :  { %v863_v51 = vpop.f32.mrf.mxu0  ;;  %v904_v52 = vpop.f32.mrf.mxu1 }
 0x413   :  { %v921_v47 = vadd.f32 %v913_v49, %v819_v50  ;;  %v914_v54 = vrot.slane %v863_v51, 2  ;;  %v916_v3 = vrot.slane %v904_v52, 2  ;;  %v923_v11 = vadd.f32 %v915_v4, %v821_v7 }
 0x414   :  { %v865_v56 = vpop.f32.mrf.mxu0  ;;  %v906_v57 = vpop.f32.mrf.mxu1  ;;  %v945_v49 = vrot.slane %v2346_v8, 6 }
 0x415   :  { %v1652_v58 = vmul.f32 -1.442695, %v921_v47  ;;  %v922_v59 = vadd.f32 %v914_v54, %v820_v55  ;;  %v924_v2 = vadd.f32 %v916_v3, %v822_v63 }
 0x416   :  { %v866_v60 = vpop.f32.mrf.mxu0  ;;  %v907_v35 = vpop.f32.mrf.mxu1 }
 0x417   :  { %1834 = vpow2.f32 %v1652_v58  ;;  %v1653_v44 = vmul.f32 -1.442695, %v922_v59  ;;  %v1654_v6 = vmul.f32 -1.442695, %v924_v2 }
 0x419   :  { %1836 = vpow2.f32 %v1653_v44 }
 0x41a   :  { %1838 = vpow2.f32 %v1654_v6 }
 0x424   :  { %v1835_v62 = vpop.eup %1834 }
 0x425   :  { %v928_v12 = vadd.f32 1.0, %v1835_v62 }
 0x426   :  { %v1837_v37 = vpop.eup %1836 }
 0x427   :  { %1840 = vrcp.f32 %v928_v12  ;;  %v934_v43 = vadd.f32 1.0, %v1837_v37  ;;  %v1839_v45 = vpop.eup %1838 }
 0x428   :  { %1842 = vtanh.f32 %v923_v11  ;;  %v941_v51 = vadd.f32 1.0, %v1839_v45 }
 0x429   :  { %1844 = vrcp.f32 %v934_v43 }
 0x42a   :  { %1846 = vrcp.f32 %v941_v51  ;;  %v2450_v51 = vld [vmem:[#allocation11 + $0xc0] ss:$16 sps:$4 sm:$0xff]  }
 0x434   :  { %v1841_v48 = vpop.eup %1840 }
 0x435   :  { %v1843_v53 = vpop.eup %1842 }
 0x436   :  { %v1845_v50 = vpop.eup %1844  ;;  %v948_v52 = vmul.f32 %v1843_v53, %v1841_v48  ;;  %v2436_v48 = vld [vmem:[#allocation11 + $0xe0] ss:$16 sps:$4 sm:$0xff]   ;;  %v2439_v53 = vld [vmem:[#allocation11 + $0xe8] ss:$16 sps:$4 sm:$0xff]  }
 0x437   :  { %v947_v61 = vmul.f32 %v1845_v50, %v945_v49  ;;  %v1847_v54 = vpop.eup %1846  ;;  %v2442_v49 = vld [vmem:[#allocation11 + $0xc4] ss:$16 sps:$4 sm:$0xff]   ;;  %v2445_v50 = vld [vmem:[#allocation11 + $0xcc] ss:$16 sps:$4 sm:$0xff]  }
 0x439   :  { %v2387_v47 = vadd.f32 %v948_v52, %v947_v61  ;;  %v2453_v52 = vld [vmem:[#allocation11 + $0xc8] ss:$16 sps:$4 sm:$0xff]   ;;  %v2456_v61 = vld [vmem:[#allocation11 + $0xa4] ss:$16 sps:$4 sm:$0xff]  }
 0x43b   :  { %1848 = vtanh.f32 %v2387_v47  ;;  %v1070_v63 = vrot.slane %v2387_v47, 6  ;;  %v2459_v47 = vld [vmem:[#allocation11 + $0xac] ss:$16 sps:$4 sm:$0xff]  }
 0x448   :  { %v1849_v55 = vpop.eup %1848 }
 0x449   :  { %v951_v56 = vmul.f32 %v1849_v55, %v1847_v54  ;;  %v2462_v54 = vld [vmem:[#allocation11 + $0xa0] ss:$16 sps:$4 sm:$0xff]   ;;  %v2465_v55 = vld [vmem:[#allocation11 + $0xa8] ss:$16 sps:$4 sm:$0xff]  }
 0x44b   :  { %v953_v57 = vrot.slane %v951_v56, 6  ;;  %v960_v58 = vpack.c.bf16 %v951_v56, %v951_v56  ;;  %v2468_v56 = vld [vmem:[#allocation11 + $0x84] ss:$16 sps:$4 sm:$0xff]  }
 0x44d   :  { %v962_v59 = vrot.slane %v960_v58, 3  ;;  %v2391_v60 = vadd.f32 %v953_v57, %v2350_v46  ;;  %v2471_v57 = vld [vmem:[#allocation11 + $0x8c] ss:$16 sps:$4 sm:$0xff]   ;;  %v2474_v58 = vld [vmem:[#allocation11 + $0x80] ss:$16 sps:$4 sm:$0xff]  }
 0x44f   :  { %997 = vmatmul.mubr.bf16.vlgmr.msra.gmra.mxu0 %v962_v59  ;;  %1038 = vmatmul.mubr.bf16.vlgmr.msra.gmra.mxu1 %v962_v59  ;;  %v2478_v59 = vld [vmem:[#allocation11 + $0x64] ss:$16 sps:$4 sm:$0xff]  }
 0x450   :  { %1084 = vmatpush1.bf16.msra.mxu0 %v2126_v5  ;;  %1125 = vmatpush1.bf16.msra.mxu1 %v2148_v17  ;;  %v2425_v5 = vld [vmem:[#allocation11 + $0xe4] ss:$16 sps:$4 sm:$0xff]  }
 0x451   :  { %1085 = vmatprep.subr.bf16.mxu0 %v2130_v9  ;;  %1126 = vmatprep.subr.bf16.mxu1 %v2153_v19  ;;  %v956_v9 = vld [vmem:[#allocation5 + $0x8] sm:$0x3] }
 0x452   :  { %1115 = vmatprep.mubr.bf16.mxu0 %v2062_v0  ;;  %1156 = vmatprep.mubr.bf16.mxu1 %v2062_v0 }
 0x454   :  { %1086 = vmatpush1.bf16.msra.mxu0 %v2132_v10  ;;  %1127 = vmatpush1.bf16.msra.mxu1 %v2159_v21 }
 0x455   :  { %1087 = vmatprep.subr.bf16.mxu0 %v2135_v13  ;;  %1128 = vmatprep.subr.bf16.mxu1 %v2167_v23 }
 0x458   :  { %1088 = vmatpush1.bf16.msra.mxu0 %v2138_v14  ;;  %1129 = vmatpush1.bf16.msra.mxu1 %v2174_v25 }
 0x459   :  { %1089 = vmatprep.subr.bf16.mxu0 %v2145_v16  ;;  %1130 = vmatprep.subr.bf16.mxu1 %v2180_v27  ;;  %v957_v16 = vld [vmem:[#allocation5 + $0x20] sm:$0x3] }
 0x45c   :  { %1090 = vmatpush1.bf16.msra.mxu0 %v2151_v18  ;;  %1131 = vmatpush1.bf16.msra.mxu1 %v2186_v29 }
 0x45d   :  { %1091 = vmatprep.subr.bf16.mxu0 %v2156_v20  ;;  %1132 = vmatprep.subr.bf16.mxu1 %v2192_v31 }
 0x460   :  { %1092 = vmatpush1.bf16.msra.mxu0 %v2163_v22  ;;  %1133 = vmatpush1.bf16.msra.mxu1 %v2198_v33 }
 0x461   :  { %1093 = vmatprep.subr.bf16.mxu0 %v2169_v24  ;;  %1134 = vmatprep.subr.bf16.mxu1 %v2204_v36 }
 0x464   :  { %1094 = vmatpush1.bf16.msra.mxu0 %v2176_v26  ;;  %1135 = vmatpush1.bf16.msra.mxu1 %v2208_v38  ;;  %v959_v26 = vld [vmem:[#allocation5 + $0x38] sm:$0x3] }
 0x465   :  { %1095 = vmatprep.subr.bf16.mxu0 %v2182_v28  ;;  %1136 = vmatprep.subr.bf16.mxu1 %v2211_v39 }
 0x468   :  { %1096 = vmatpush1.bf16.msra.mxu0 %v2188_v30  ;;  %1137 = vmatpush1.bf16.msra.mxu1 %v2215_v40 }
 0x469   :  { %1097 = vmatprep.subr.bf16.mxu0 %v2194_v32  ;;  %1138 = vmatprep.subr.bf16.mxu1 %v2219_v41 }
 0x46c   :  { %1098 = vmatpush1.bf16.msra.mxu0 %v2200_v34  ;;  %1139 = vmatpush1.bf16.msra.mxu1 %v2224_v42 }
 0x46d   :  { %1220 = vmatprep.subr.bf16.mxu0 %v2425_v5  ;;  %1261 = vmatprep.subr.bf16.mxu1 %v2141_v15  ;;  %v958_v15 = vld [vmem:[#allocation5 + $0x28] sm:$0x3] }
 0x50f   :  { %v998_v10 = vpop.f32.mrf.mxu0  ;;  %v1039_v13 = vpop.f32.mrf.mxu1 }
 0x510   :  { %v1046_v14 = vadd.f32 %v998_v10, %v956_v9  ;;  %v1048_v32 = vadd.f32 %v1039_v13, %v958_v15  ;;  %v2486_v9 = vld [vmem:[#allocation11 + $0x44] ss:$16 sps:$4 sm:$0xff]   ;;  %v2490_v10 = vld [vmem:[#allocation11 + $0x40] ss:$16 sps:$4 sm:$0xff]  }
 0x511   :  { %v1000_v17 = vpop.f32.mrf.mxu0  ;;  %v1041_v18 = vpop.f32.mrf.mxu1 }
 0x512   :  { %v1655_v19 = vmul.f32 -1.442695, %v1046_v14  ;;  %v1047_v20 = vadd.f32 %v1000_v17, %v957_v16  ;;  %v1049_v27 = vadd.f32 %v1041_v18, %v959_v26  ;;  %v1081_v26 = vld [vmem:[#allocation5 + $0x38] sm:$0xc] }
 0x513   :  { %v1002_v21 = vpop.f32.mrf.mxu0  ;;  %v1043_v22 = vpop.f32.mrf.mxu1 }
 0x514   :  { %1850 = vpow2.f32 %v1655_v19  ;;  %v1656_v23 = vmul.f32 -1.442695, %v1047_v20  ;;  %v1657_v28 = vmul.f32 -1.442695, %v1049_v27  ;;  %v1079_v20 = vld [vmem:[#allocation5 + $0x20] sm:$0xc] }
 0x515   :  { %v1003_v24 = vpop.f32.mrf.mxu0  ;;  %v1044_v25 = vpop.f32.mrf.mxu1 }
 0x516   :  { %1852 = vpow2.f32 %v1656_v23 }
 0x517   :  { %1854 = vpow2.f32 %v1657_v28 }
 0x521   :  { %v1851_v30 = vpop.eup %1850 }
 0x522   :  { %v1053_v34 = vadd.f32 1.0, %v1851_v30  ;;  %v1080_v30 = vld [vmem:[#allocation5 + $0x28] sm:$0xc] }
 0x523   :  { %v1853_v8 = vpop.eup %1852 }
 0x524   :  { %1856 = vrcp.f32 %v1053_v34  ;;  %v1059_v46 = vadd.f32 1.0, %v1853_v8  ;;  %v1855_v35 = vpop.eup %1854 }
 0x525   :  { %1858 = vtanh.f32 %v1048_v32  ;;  %v1066_v4 = vadd.f32 1.0, %v1855_v35 }
 0x526   :  { %1860 = vrcp.f32 %v1059_v46 }
 0x527   :  { %1862 = vrcp.f32 %v1066_v4 }
 0x531   :  { %v1857_v44 = vpop.eup %1856 }
 0x532   :  { %v1859_v3 = vpop.eup %1858 }
 0x533   :  { %v1861_v2 = vpop.eup %1860  ;;  %v1073_v6 = vmul.f32 %v1859_v3, %v1857_v44 }
 0x534   :  { %v1072_v7 = vmul.f32 %v1861_v2, %v1070_v63  ;;  %v1863_v11 = vpop.eup %1862 }
 0x536   :  { %v2430_v62 = vadd.f32 %v1073_v6, %v1072_v7 }
 0x538   :  { %1864 = vtanh.f32 %v2430_v62  ;;  %v1201_v2 = vrot.slane %v2430_v62, 6  ;;  %v1937_v62 = vld [vmem:[#allocation11 + $0x88] ss:$16 sps:$4 sm:$0xff]  }
 0x545   :  { %v1865_v12 = vpop.eup %1864 }
 0x546   :  { %v1076_v37 = vmul.f32 %v1865_v12, %v1863_v11 }
 0x548   :  { %v2434_v43 = vadd.f32 %v1076_v37, %v2391_v60  ;;  %v1082_v45 = vpack.c.bf16 %v1076_v37, %v1076_v37  ;;  %v2482_v60 = vld [vmem:[#allocation11 + $0x60] ss:$16 sps:$4 sm:$0xff]  }
 0x54a   :  { %1116 = vmatmul.mubr.bf16.vlgmr.msra.gmra.mxu0 %v1082_v45  ;;  %1157 = vmatmul.mubr.bf16.vlgmr.msra.gmra.mxu1 %v1082_v45 }
 0x54b   :  { %1221 = vmatpush1.bf16.msra.mxu0 %v2436_v48  ;;  %1262 = vmatpush1.bf16.msra.mxu1 %v2439_v53 }
 0x54c   :  { %1222 = vmatprep.subr.bf16.mxu0 %v2442_v49  ;;  %1263 = vmatprep.subr.bf16.mxu1 %v2445_v50 }
 0x54d   :  { %1252 = vmatprep.mubr.bf16.mxu0 %v2062_v0  ;;  %1293 = vmatprep.mubr.bf16.mxu1 %v2062_v0 }
 0x54f   :  { %1223 = vmatpush1.bf16.msra.mxu0 %v2450_v51  ;;  %1264 = vmatpush1.bf16.msra.mxu1 %v2453_v52 }
 0x550   :  { %1224 = vmatprep.subr.bf16.mxu0 %v2456_v61  ;;  %1265 = vmatprep.subr.bf16.mxu1 %v2459_v47 }
 0x553   :  { %1225 = vmatpush1.bf16.msra.mxu0 %v2462_v54  ;;  %1266 = vmatpush1.bf16.msra.mxu1 %v2465_v55 }
 0x554   :  { %1226 = vmatprep.subr.bf16.mxu0 %v2468_v56  ;;  %1267 = vmatprep.subr.bf16.mxu1 %v2471_v57 }
 0x557   :  { %1227 = vmatpush1.bf16.msra.mxu0 %v2474_v58  ;;  %1268 = vmatpush1.bf16.msra.mxu1 %v2186_v29  ;;  %v2494_v29 = vld [vmem:[#allocation11 + $0x24] ss:$16 sps:$4 sm:$0xff]  }
 0x558   :  { %1228 = vmatprep.subr.bf16.mxu0 %v2478_v59  ;;  %1269 = vmatprep.subr.bf16.mxu1 %v2192_v31  ;;  %v2498_v31 = vld [vmem:[#allocation11 + $0x20] ss:$16 sps:$4 sm:$0xff]  }
 0x55b   :  { %1229 = vmatpush1.bf16.msra.mxu0 %v2482_v60  ;;  %1270 = vmatpush1.bf16.msra.mxu1 %v2198_v33  ;;  %v2502_v33 = vld [vmem:[#allocation11 + $0x4] ss:$16 sps:$4 sm:$0xff]  }
 0x55c   :  { %1230 = vmatprep.subr.bf16.mxu0 %v2486_v9  ;;  %1271 = vmatprep.subr.bf16.mxu1 %v2204_v36  ;;  %v2506_v36 = vld [vmem:[#allocation11] ss:$16 sps:$4 sm:$0xff]  }
 0x55f   :  { %1231 = vmatpush1.bf16.msra.mxu0 %v2490_v10  ;;  %1272 = vmatpush1.bf16.msra.mxu1 %v2208_v38  ;;  %v1936_v38 = vld [vmem:[#allocation11 + $0xec] ss:$16 sps:$4 sm:$0xff]  }
 0x560   :  { %1232 = vmatprep.subr.bf16.mxu0 %v2494_v29  ;;  %1273 = vmatprep.subr.bf16.mxu1 %v2211_v39 }
 0x563   :  { %1233 = vmatpush1.bf16.msra.mxu0 %v2498_v31  ;;  %1274 = vmatpush1.bf16.msra.mxu1 %v2215_v40  ;;  %v1078_v40 = vld [vmem:[#allocation5 + $0x8] sm:$0xc] }
 0x564   :  { %1234 = vmatprep.subr.bf16.mxu0 %v2502_v33  ;;  %1275 = vmatprep.subr.bf16.mxu1 %v2219_v41 }
 0x567   :  { %1235 = vmatpush1.bf16.msra.mxu0 %v2506_v36  ;;  %1276 = vmatpush1.bf16.msra.mxu1 %v2224_v42 }
 0x568   :  { %1357 = vmatprep.subr.bf16.mxu0 %v2425_v5  ;;  %1398 = vmatprep.subr.bf16.mxu1 %v1936_v38 }
 0x60a   :  { %v1117_v39 = vpop.f32.mrf.mxu0  ;;  %v1158_v13 = vpop.f32.mrf.mxu1 }
 0x60b   :  { %v1169_v14 = vrot.slane %v1117_v39, 6  ;;  %v1171_v28 = vrot.slane %v1158_v13, 6 }
 0x60c   :  { %v1119_v16 = vpop.f32.mrf.mxu0  ;;  %v1160_v17 = vpop.f32.mrf.mxu1 }
 0x60d   :  { %v1177_v18 = vadd.f32 %v1169_v14, %v1078_v40  ;;  %v1170_v19 = vrot.slane %v1119_v16, 6  ;;  %v1172_v5 = vrot.slane %v1160_v17, 6  ;;  %v1179_v34 = vadd.f32 %v1171_v28, %v1080_v30 }
 0x60e   :  { %v1121_v41 = vpop.f32.mrf.mxu0  ;;  %v1162_v21 = vpop.f32.mrf.mxu1 }
 0x60f   :  { %v1658_v22 = vmul.f32 -1.442695, %v1177_v18  ;;  %v1178_v23 = vadd.f32 %v1170_v19, %v1079_v20  ;;  %v1180_v27 = vadd.f32 %v1172_v5, %v1081_v26  ;;  %v1215_v18 = vld [vmem:[#allocation5 + $0x38] sm:$0x30]  ;;  %v1214_v21 = vld [vmem:[#allocation5 + $0x28] sm:$0x30] }
 0x610   :  { %v1122_v24 = vpop.f32.mrf.mxu0  ;;  %v1163_v25 = vpop.f32.mrf.mxu1 }
 0x611   :  { %1866 = vpow2.f32 %v1658_v22  ;;  %v1659_v42 = vmul.f32 -1.442695, %v1178_v23  ;;  %v1660_v15 = vmul.f32 -1.442695, %v1180_v27 }
 0x613   :  { %1868 = vpow2.f32 %v1659_v42 }
 0x614   :  { %1870 = vpow2.f32 %v1660_v15 }
 0x61e   :  { %v1867_v32 = vpop.eup %1866 }
 0x61f   :  { %v1184_v8 = vadd.f32 1.0, %v1867_v32 }
 0x620   :  { %v1869_v46 = vpop.eup %1868 }
 0x621   :  { %1872 = vrcp.f32 %v1184_v8  ;;  %v1190_v35 = vadd.f32 1.0, %v1869_v46  ;;  %v1871_v44 = vpop.eup %1870 }
 0x622   :  { %1874 = vtanh.f32 %v1179_v34  ;;  %v1197_v6 = vadd.f32 1.0, %v1871_v44 }
 0x623   :  { %1876 = vrcp.f32 %v1190_v35 }
 0x624   :  { %1878 = vrcp.f32 %v1197_v6  ;;  %v1509_v6 = vld [vmem:[#allocation12 + $0x78] sm:$0xff] }
 0x62e   :  { %v1873_v3 = vpop.eup %1872 }
 0x62f   :  { %v1875_v63 = vpop.eup %1874 }
 0x630   :  { %v1877_v4 = vpop.eup %1876  ;;  %v1204_v7 = vmul.f32 %v1875_v63, %v1873_v3 }
 0x631   :  { %v1203_v11 = vmul.f32 %v1877_v4, %v1201_v2  ;;  %v1879_v37 = vpop.eup %1878 }
 0x633   :  { %v2512_v12 = vadd.f32 %v1204_v7, %v1203_v11  ;;  %v1508_v7 = vld [vmem:[#allocation12 + $0x70] sm:$0xff]  ;;  %v1507_v11 = vld [vmem:[#allocation12 + $0x68] sm:$0xff] }
 0x635   :  { %1880 = vtanh.f32 %v2512_v12  ;;  %v1338_v28 = vrot.slane %v2512_v12, 6  ;;  %v1506_v12 = vld [vmem:[#allocation12 + $0x60] sm:$0xff] }
 0x642   :  { %v1881_v45 = vpop.eup %1880 }
 0x643   :  { %v1207_v38 = vmul.f32 %v1881_v45, %v1879_v37  ;;  %v1505_v37 = vld [vmem:[#allocation12 + $0x58] sm:$0xff]  ;;  %v1504_v45 = vld [vmem:[#allocation12 + $0x50] sm:$0xff] }
 0x645   :  { %v1209_v39 = vrot.slane %v1207_v38, 2  ;;  %v1216_v13 = vpack.c.bf16 %v1207_v38, %v1207_v38  ;;  %v1503_v38 = vld [vmem:[#allocation12 + $0x48] sm:$0xff] }
 0x647   :  { %v2516_v14 = vadd.f32 %v1209_v39, %v2434_v43  ;;  %v1218_v40 = vrot.slane %v1216_v13, 1  ;;  %v1939_v43 = vld [vmem:[#allocation11 + $0x68] ss:$16 sps:$4 sm:$0xff]   ;;  %v1502_v39 = vld [vmem:[#allocation12 + $0x40] sm:$0xff] }
 0x648   :  { %v1501_v13 = vld [vmem:[#allocation12 + $0x38] sm:$0xff] }
 0x649   :  { %1253 = vmatmul.mubr.bf16.vlgmr.msra.gmra.mxu0 %v1218_v40  ;;  %1294 = vmatmul.mubr.bf16.vlgmr.msra.gmra.mxu1 %v1218_v40  ;;  %v1499_v40 = vld [vmem:[#allocation12 + $0x28] sm:$0xff] }
 0x64a   :  { %1358 = vmatpush1.bf16.msra.mxu0 %v2436_v48  ;;  %1399 = vmatpush1.bf16.msra.mxu1 %v2439_v53  ;;  %v1940_v48 = vld [vmem:[#allocation11 + $0x4c] ss:$16 sps:$4 sm:$0xff]   ;;  %v1941_v53 = vld [vmem:[#allocation11 + $0x48] ss:$16 sps:$4 sm:$0xff]  }
 0x64b   :  { %1359 = vmatprep.subr.bf16.mxu0 %v2442_v49  ;;  %1400 = vmatprep.subr.bf16.mxu1 %v2445_v50  ;;  %v1942_v49 = vld [vmem:[#allocation11 + $0x2c] ss:$16 sps:$4 sm:$0xff]   ;;  %v1943_v50 = vld [vmem:[#allocation11 + $0x28] ss:$16 sps:$4 sm:$0xff]  }
 0x64c   :  { %1389 = vmatprep.mubr.bf16.mxu0 %v2062_v0  ;;  %1430 = vmatprep.mubr.bf16.mxu1 %v2062_v0  ;;  %v1938_v0 = vld [vmem:[#allocation11 + $0x6c] ss:$16 sps:$4 sm:$0xff]  }
 0x64e   :  { %1360 = vmatpush1.bf16.msra.mxu0 %v2450_v51  ;;  %1401 = vmatpush1.bf16.msra.mxu1 %v2453_v52  ;;  %v1944_v51 = vld [vmem:[#allocation11 + $0xc] ss:$16 sps:$4 sm:$0xff]   ;;  %v1945_v52 = vld [vmem:[#allocation11 + $0x8] ss:$16 sps:$4 sm:$0xff]  }
 0x64f   :  { %1361 = vmatprep.subr.bf16.mxu0 %v2456_v61  ;;  %1402 = vmatprep.subr.bf16.mxu1 %v2459_v47 }
 0x652   :  { %1362 = vmatpush1.bf16.msra.mxu0 %v2462_v54  ;;  %1403 = vmatpush1.bf16.msra.mxu1 %v2465_v55  ;;  %v1212_v55 = vld [vmem:[#allocation5 + $0x8] sm:$0x30] }
 0x653   :  { %1363 = vmatprep.subr.bf16.mxu0 %v2468_v56  ;;  %1404 = vmatprep.subr.bf16.mxu1 %v2471_v57 }
 0x656   :  { %1364 = vmatpush1.bf16.msra.mxu0 %v2474_v58  ;;  %1405 = vmatpush1.bf16.msra.mxu1 %v1937_v62  ;;  %v1498_v62 = vld [vmem:[#allocation12 + $0x20] sm:$0xff] }
 0x657   :  { %1365 = vmatprep.subr.bf16.mxu0 %v2478_v59  ;;  %1406 = vmatprep.subr.bf16.mxu1 %v1938_v0  ;;  %v1497_v0 = vld [vmem:[#allocation12 + $0x18] sm:$0xff] }
 0x65a   :  { %1366 = vmatpush1.bf16.msra.mxu0 %v2482_v60  ;;  %1407 = vmatpush1.bf16.msra.mxu1 %v1939_v43  ;;  %v1213_v60 = vld [vmem:[#allocation5 + $0x20] sm:$0x30] }
 0x65b   :  { %1367 = vmatprep.subr.bf16.mxu0 %v2486_v9  ;;  %1408 = vmatprep.subr.bf16.mxu1 %v1940_v48  ;;  %v1496_v43 = vld [vmem:[#allocation12 + $0x10] sm:$0xff]  ;;  %v1495_v48 = vld [vmem:[#allocation12 + $0x8] sm:$0xff] }
 0x65e   :  { %1368 = vmatpush1.bf16.msra.mxu0 %v2490_v10  ;;  %1409 = vmatpush1.bf16.msra.mxu1 %v1941_v53  ;;  %v1494_v53 = vld [vmem:[#allocation12] sm:$0xff] }
 0x65f   :  { %1369 = vmatprep.subr.bf16.mxu0 %v2494_v29  ;;  %1410 = vmatprep.subr.bf16.mxu1 %v1942_v49 }
 0x662   :  { %1370 = vmatpush1.bf16.msra.mxu0 %v2498_v31  ;;  %1411 = vmatpush1.bf16.msra.mxu1 %v1943_v50 }
 0x663   :  { %1371 = vmatprep.subr.bf16.mxu0 %v2502_v33  ;;  %1412 = vmatprep.subr.bf16.mxu1 %v1944_v51 }
 0x666   :  { %1372 = vmatpush1.bf16.msra.mxu0 %v2506_v36  ;;  %1413 = vmatpush1.bf16.msra.mxu1 %v1945_v52  ;;  %v1349_v52 = vld [vmem:[#allocation5 + $0x8] sm:$0xc0] }
 0x667   :  { %1685 = vmatprep.subr.mxu0 %v2063_v1 }
 0x709   :  { %v1254_v61 = vpop.f32.mrf.mxu0  ;;  %v1295_v47 = vpop.f32.mrf.mxu1 }
 0x70a   :  { %v1306_v54 = vrot.slane %v1254_v61, 4  ;;  %v1308_v20 = vrot.slane %v1295_v47, 4 }
 0x70b   :  { %v1256_v56 = vpop.f32.mrf.mxu0  ;;  %v1297_v57 = vpop.f32.mrf.mxu1 }
 0x70c   :  { %v1314_v58 = vadd.f32 %v1306_v54, %v1212_v55  ;;  %v1307_v59 = vrot.slane %v1256_v56, 4  ;;  %v1309_v17 = vrot.slane %v1297_v57, 4  ;;  %v1316_v23 = vadd.f32 %v1308_v20, %v1214_v21  ;;  %v1350_v56 = vld [vmem:[#allocation5 + $0x20] sm:$0xc0] }
 0x70d   :  { %v1258_v9 = vpop.f32.mrf.mxu0  ;;  %v1299_v10 = vpop.f32.mrf.mxu1 }
 0x70e   :  { %v1661_v29 = vmul.f32 -1.442695, %v1314_v58  ;;  %v1315_v31 = vadd.f32 %v1307_v59, %v1213_v60  ;;  %v1317_v19 = vadd.f32 %v1309_v17, %v1215_v18  ;;  %v1351_v17 = vld [vmem:[#allocation5 + $0x28] sm:$0xc0] }
 0x70f   :  { %v1259_v33 = vpop.f32.mrf.mxu0  ;;  %v1300_v16 = vpop.f32.mrf.mxu1 }
 0x710   :  { %1882 = vpow2.f32 %v1661_v29  ;;  %v1662_v36 = vmul.f32 -1.442695, %v1315_v31  ;;  %v1663_v41 = vmul.f32 -1.442695, %v1317_v19  ;;  %v1352_v31 = vld [vmem:[#allocation5 + $0x38] sm:$0xc0] }
 0x712   :  { %1884 = vpow2.f32 %v1662_v36 }
 0x713   :  { %1886 = vpow2.f32 %v1663_v41 }
 0x71d   :  { %v1883_v22 = vpop.eup %1882 }
 0x71e   :  { %v1321_v24 = vadd.f32 1.0, %v1883_v22 }
 0x71f   :  { %v1885_v25 = vpop.eup %1884 }
 0x720   :  { %1888 = vrcp.f32 %v1321_v24  ;;  %v1327_v42 = vadd.f32 1.0, %v1885_v25  ;;  %v1887_v5 = vpop.eup %1886 }
 0x721   :  { %1890 = vtanh.f32 %v1316_v23  ;;  %v1334_v30 = vadd.f32 1.0, %v1887_v5 }
 0x722   :  { %1892 = vrcp.f32 %v1327_v42 }
 0x723   :  { %1894 = vrcp.f32 %v1334_v30 }
 0x72d   :  { %v1889_v26 = vpop.eup %1888 }
 0x72e   :  { %v1891_v27 = vpop.eup %1890 }
 0x72f   :  { %v1893_v15 = vpop.eup %1892  ;;  %v1341_v32 = vmul.f32 %v1891_v27, %v1889_v26 }
 0x730   :  { %v1340_v34 = vmul.f32 %v1893_v15, %v1338_v28  ;;  %v1895_v46 = vpop.eup %1894 }
 0x732   :  { %v2543_v8 = vadd.f32 %v1341_v32, %v1340_v34 }
 0x734   :  { %1896 = vtanh.f32 %v2543_v8  ;;  %v1475_v25 = vrot.slane %v2543_v8, 6  ;;  %v1667_v8 = vld [vmem:[%s2578_s5] ss:$0 sm:$0xff] }
 0x741   :  { %v1897_v35 = vpop.eup %1896 }
 0x742   :  { %v1344_v44 = vmul.f32 %v1897_v35, %v1895_v46 }
 0x744   :  { %v1346_v3 = vrot.slane %v1344_v44, 4  ;;  %v1353_v63 = vpack.c.bf16 %v1344_v44, %v1344_v44 }
 0x746   :  { %v2547_v2 = vadd.f32 %v1346_v3, %v2516_v14  ;;  %v1355_v4 = vrot.slane %v1353_v63, 2  ;;  %v1500_v14 = vld [vmem:[#allocation12 + $0x30] sm:$0xff] }
 0x748   :  { %1390 = vmatmul.mubr.bf16.vlgmr.msra.gmra.mxu0 %v1355_v4  ;;  %1431 = vmatmul.mubr.bf16.vlgmr.msra.gmra.mxu1 %v1355_v4 }
 0x749   :  { %1686 = vmatpush3.msra.mxu0 %v1509_v6  ;;  %1717 = vmatprep.mubr.msk.f32.mxu0 %vm2064_vm1, %v2063_v1 }
 0x74a   :  { %1687 = vmatprep.subr.mxu0 %v2063_v1 }
 0x74b   :  { %1688 = vmatpush3.msra.mxu0 %v1508_v7 }
 0x74c   :  { %1689 = vmatprep.subr.mxu0 %v2063_v1 }
 0x74d   :  { %1690 = vmatpush3.msra.mxu0 %v1507_v11 }
 0x74e   :  { %1691 = vmatprep.subr.mxu0 %v2063_v1 }
 0x74f   :  { %1692 = vmatpush3.msra.mxu0 %v1506_v12 }
 0x750   :  { %1693 = vmatprep.subr.mxu0 %v2063_v1 }
 0x751   :  { %1694 = vmatpush3.msra.mxu0 %v1505_v37 }
 0x752   :  { %1695 = vmatprep.subr.mxu0 %v2063_v1 }
 0x753   :  { %1696 = vmatpush3.msra.mxu0 %v1504_v45 }
 0x754   :  { %1697 = vmatprep.subr.mxu0 %v2063_v1 }
 0x755   :  { %1698 = vmatpush3.msra.mxu0 %v1503_v38 }
 0x756   :  { %1699 = vmatprep.subr.mxu0 %v2063_v1 }
 0x757   :  { %1700 = vmatpush3.msra.mxu0 %v1502_v39 }
 0x758   :  { %1701 = vmatprep.subr.mxu0 %v2063_v1 }
 0x759   :  { %1702 = vmatpush3.msra.mxu0 %v1501_v13 }
 0x75a   :  { %1703 = vmatprep.subr.mxu0 %v2063_v1 }
 0x75b   :  { %1704 = vmatpush3.msra.mxu0 %v1500_v14 }
 0x75c   :  { %1705 = vmatprep.subr.mxu0 %v2063_v1 }
 0x75d   :  { %1706 = vmatpush3.msra.mxu0 %v1499_v40 }
 0x75e   :  { %1707 = vmatprep.subr.mxu0 %v2063_v1 }
 0x75f   :  { %1708 = vmatpush3.msra.mxu0 %v1498_v62 }
 0x760   :  { %1709 = vmatprep.subr.mxu0 %v2063_v1 }
 0x761   :  { %1710 = vmatpush3.msra.mxu0 %v1497_v0 }
 0x762   :  { %1711 = vmatprep.subr.mxu0 %v2063_v1 }
 0x763   :  { %1712 = vmatpush3.msra.mxu0 %v1496_v43 }
 0x764   :  { %1713 = vmatprep.subr.mxu0 %v2063_v1 }
 0x765   :  { %1714 = vmatpush3.msra.mxu0 %v1495_v48 }
 0x766   :  { %1715 = vmatprep.subr.mxu0 %v2063_v1 }
 0x767   :  { %1716 = vmatpush3.msra.mxu0 %v1494_v53 }
 0x808   :  { %v1391_v49 = vpop.f32.mrf.mxu0  ;;  %v1432_v50 = vpop.f32.mrf.mxu1 }
 0x809   :  { %v1443_v51 = vrot.slane %v1391_v49, 2  ;;  %v1445_v16 = vrot.slane %v1432_v50, 2 }
 0x80a   :  { %v1393_v61 = vpop.f32.mrf.mxu0  ;;  %v1434_v47 = vpop.f32.mrf.mxu1 }
 0x80b   :  { %v1451_v54 = vadd.f32 %v1443_v51, %v1349_v52  ;;  %v1444_v55 = vrot.slane %v1393_v61, 2  ;;  %v1446_v1 = vrot.slane %v1434_v47, 2  ;;  %v1453_v19 = vadd.f32 %v1445_v16, %v1351_v17 }
 0x80c   :  { %v1395_v57 = vpop.f32.mrf.mxu0  ;;  %v1436_v58 = vpop.f32.mrf.mxu1 }
 0x80d   :  { %v1664_v59 = vmul.f32 -1.442695, %v1451_v54  ;;  %v1452_v60 = vadd.f32 %v1444_v55, %v1350_v56  ;;  %v1454_v33 = vadd.f32 %v1446_v1, %v1352_v31 }
 0x80e   :  { %v1396_v9 = vpop.f32.mrf.mxu0  ;;  %v1437_v10 = vpop.f32.mrf.mxu1 }
 0x80f   :  { %1898 = vpow2.f32 %v1664_v59  ;;  %v1665_v29 = vmul.f32 -1.442695, %v1452_v60  ;;  %v1666_v36 = vmul.f32 -1.442695, %v1454_v33 }
 0x811   :  { %1900 = vpow2.f32 %v1665_v29 }
 0x812   :  { %1902 = vpow2.f32 %v1666_v36 }
 0x81c   :  { %v1899_v18 = vpop.eup %1898 }
 0x81d   :  { %v1458_v20 = vadd.f32 1.0, %v1899_v18 }
 0x81e   :  { %v1901_v41 = vpop.eup %1900 }
 0x81f   :  { %1904 = vrcp.f32 %v1458_v20  ;;  %v1464_v21 = vadd.f32 1.0, %v1901_v41  ;;  %v1903_v22 = vpop.eup %1902 }
 0x820   :  { %1906 = vtanh.f32 %v1453_v19  ;;  %v1471_v5 = vadd.f32 1.0, %v1903_v22 }
 0x821   :  { %1908 = vrcp.f32 %v1464_v21 }
 0x822   :  { %1910 = vrcp.f32 %v1471_v5 }
 0x82c   :  { %v1905_v23 = vpop.eup %1904 }
 0x82d   :  { %v1907_v24 = vpop.eup %1906 }
 0x82e   :  { %v1909_v42 = vpop.eup %1908  ;;  %v1478_v26 = vmul.f32 %v1907_v24, %v1905_v23 }
 0x82f   :  { %v1477_v27 = vmul.f32 %v1909_v42, %v1475_v25  ;;  %v1911_v15 = vpop.eup %1910 }
 0x831   :  { %v1479_v28 = vadd.f32 %v1478_v26, %v1477_v27 }
 0x833   :  { %1912 = vtanh.f32 %v1479_v28  ;;  %1487 = vst [vmem:[#allocation3 - $0x6] sm:$0xc0] %v1479_v28 }
 0x840   :  { %v1913_v30 = vpop.eup %1912 }
 0x841   :  { %v1481_v32 = vmul.f32 %v1913_v30, %v1911_v15 }
 0x843   :  { %v1483_v34 = vrot.slane %v1481_v32, 6  ;;  %1486 = vst [vmem:[#allocation2 - $0x6] sm:$0xc0] %v1481_v32 }
 0x845   :  { %v1485_v46 = vadd.f32 %v1483_v34, %v2547_v2 }
 0x847   :  { %1488 = vst [vmem:[#allocation4] sm:$0x3] %v1485_v46 }
 0x84e   :  { %v1492_v35 = vld [vmem:[#allocation4] sm:$0x3] }
 0x84f   :  { %v1493_v44 = vmul.f32 0.125, %v1492_v35 }
 0x851   :  { %1718 = vmatmul.mubr.f32.vlgmr.msra.gmra.mxu0 %v1493_v44 }
 0x911   :  { %v1583_v3 = vpop.f32.mrf.mxu0 }
 0x912   :  { %v1584_v63 = vadd.f32 %v1667_v8, %v1583_v3 }
 0x913   :  { %v1719_v4 = vpop.f32.mrf.mxu0 }
 0x914   :  { %1587 = vst [vmem:[#allocation14] sm:$0x3] %v1584_v63 }
 0x915   :  { %2037 = shalt.err (!%p2034_p10)
}
 0x916   :  { %1597 = dma.vmem_to_hbm [thread:$0]  %s1595_s21, 32, %s2579_s6, [#allocation8]  }
 0x917   :  { %2052 = dma.done.wait [#allocation8], 32  }
 0x918   :  { %2053 = vsyncadd [#allocation8], 4294967264 }
 0x919   :  { %1601 = vsyncpa [#allocation7], 1 }
 0x91a   :  { %1602 = vsyncpa [#allocation10], 1 }
 0x91b   :  { %1603 = vsyncpa [#allocation13], 1 }
 0x91c   :  { %1604 = vsyncpa [#allocation8], 1 }

// kernel: tpu_custom_call.1
= control target key start
LH: loop header
LB: loop body
LE: loop exit
PB: predicated region body
PF: predicated region fallthrough
CT: control target
= control target key end

     0   :  { %11 = vsyncpa [#allocation7], 0  ;;  %s2573_s0 = inlined_call_operand.hbm [shape: f32[16,16], index: 0, kind: input, shape index: {}]   ;;  %s2574_s1 = inlined_call_operand.hbm [shape: bf16[16,512], index: 1, kind: input, shape index: {}]   ;;  %s2575_s2 = inlined_call_operand.hbm [shape: bf16[128,512], index: 2, kind: input, shape index: {}]   ;;  %s2576_s3 = inlined_call_operand.vmem [shape: f32[1,512], index: 3, kind: input, shape index: {}]   ;;  %s2577_s4 = inlined_call_operand.hbm [shape: f32[128,128], index: 4, kind: input, shape index: {}]   ;;  %s2578_s5 = inlined_call_operand.vmem [shape: f32[1,128], index: 5, kind: input, shape index: {}]   ;;  %s2579_s6 = inlined_call_operand.hbm [shape: f32[2,128], index: 6, kind: output, shape index: {}]  }
   0x1   :  { %12 = vsyncpa [#allocation10], 0 }
   0x2   :  { %13 = vsyncpa [#allocation13], 0 }
   0x3   :  { %14 = vsyncpa [#allocation8], 0  ;;  %s2054_s21 = smov [#allocation9]  }
   0x4   :  { %s32_s22 = sshll.u32 %s2054_s21, 4  ;;  %s33_s22 = int_to_ptr.vmem [resolvable:$true] %s32_s22 }
   0x5   :  { %s1954_s23 = scalar_lea.vmem %s33_s22, 512  ;;  %p1959_p1 = scmp.lt.s32.totalorder %s33_s22, %s33_s22 }
   0x6   :  { %p1955_p0 = scmp.ne.s32.totalorder %s33_s22, %s1954_s23  ;;  %p1960_p2 = scmp.lt.s32.totalorder %s1954_s23, %s1954_s23 }
   0x8   :  { %p1961_p3 = por %p1960_p2, %p1959_p1 }
   0xa   :  { %p1962_p4 = pnand %p1961_p3, %p1955_p0 }
   0xc   :  { %1965 = shalt.err (!%p1962_p4)
}
   0xd   :  { %s2055_s24 = smov 256   ;;  %s2056_s25 = smov 16  }
   0xe   :  { %38 = dma.hbm_to_vmem [thread:$0]  %s2574_s1, 512, %s33_s22, [#allocation10], %s2055_s24, %s2055_s24, %s2056_s25  }
   0xf   :  { %s2057_s28 = smov [#allocation6]  }
  0x10   :  { %s20_s29 = sshll.u32 %s2057_s28, 4  ;;  %s21_s29 = int_to_ptr.vmem [resolvable:$true] %s20_s29 }
  0x11   :  { %s1974_s30 = scalar_lea.vmem %s21_s29, 256  ;;  %p1979_p6 = scmp.lt.s32.totalorder %s21_s29, %s21_s29 }
  0x12   :  { %p1975_p5 = scmp.ne.s32.totalorder %s21_s29, %s1974_s30  ;;  %p1980_p7 = scmp.lt.s32.totalorder %s1974_s30, %s1974_s30 }
  0x14   :  { %p1981_p8 = por %p1980_p7, %p1979_p6 }
  0x16   :  { %p1982_p9 = pnand %p1981_p8, %p1975_p5 }
  0x18   :  { %1985 = shalt.err (!%p1982_p9)
}
  0x19   :  { %s2058_s7 = smov 128   ;;  %s2059_s8 = smov 8  }
  0x1a   :  { %26 = dma.hbm_to_vmem [thread:$0]  %s2573_s0, 256, %s21_s29, [#allocation7], %s2058_s7, %s2058_s7, %s2059_s8  }
  0x1b   :  { %s2060_s11 = smov [#allocation11]   ;;  %s2061_s13 = smov [#allocation12]  }
  0x1c   :  { %s44_s12 = sshll.u32 %s2060_s11, 4  ;;  %s58_s1 = sshll.u32 %s2061_s13, 4  ;;  %s45_s12 = int_to_ptr.vmem [resolvable:$true] %s44_s12  ;;  %s59_s1 = int_to_ptr.vmem [resolvable:$true] %s58_s1 }
  0x1d   :  { %s1994_s14 = scalar_lea.vmem %s45_s12, 4096  ;;  %p1999_p11 = scmp.lt.s32.totalorder %s45_s12, %s45_s12 }
  0x1e   :  { %p1995_p10 = scmp.ne.s32.totalorder %s45_s12, %s1994_s14  ;;  %p2000_p12 = scmp.lt.s32.totalorder %s1994_s14, %s1994_s14 }
  0x20   :  { %p2001_p13 = por %p2000_p12, %p1999_p11 }
  0x22   :  { %p2002_p0 = pnand %p2001_p13, %p1995_p10 }
  0x24   :  { %2005 = shalt.err (!%p2002_p0)
}
  0x25   :  { %50 = dma.hbm_to_vmem [thread:$0]  %s2575_s2, 4096, %s45_s12, [#allocation10], %s2055_s24, %s2055_s24, %s2056_s25  }
  0x26   :  { %s2014_s0 = scalar_lea.vmem %s59_s1, 2048  ;;  %p2019_p2 = scmp.lt.s32.totalorder %s59_s1, %s59_s1 }
  0x27   :  { %p2015_p1 = scmp.ne.s32.totalorder %s59_s1, %s2014_s0  ;;  %p2020_p3 = scmp.lt.s32.totalorder %s2014_s0, %s2014_s0 }
  0x29   :  { %p2021_p4 = por %p2020_p3, %p2019_p2 }
  0x2b   :  { %p2022_p5 = pnand %p2021_p4, %p2015_p1 }
  0x2d   :  { %2025 = shalt.err (!%p2022_p5)
}
  0x2e   :  { %64 = dma.hbm_to_vmem [thread:$0]  %s2577_s4, 2048, %s59_s1, [#allocation13], %s2058_s7, %s2058_s7, %s2059_s8  }
  0x2f   :  { %2046 = dma.done.wait [#allocation7], 256  }
  0x30   :  { %2047 = vsyncadd [#allocation7], 4294967040 }
  0x31   :  { %2048 = dma.done.wait [#allocation10], 4608  }
  0x32   :  { %2049 = vsyncadd [#allocation10], 4294962688 }
  0x33   :  { %2050 = dma.done.wait [#allocation13], 2048  }
  0x34   :  { %2051 = vsyncadd [#allocation13], 4294965248  ;;  %v2062_v0 = vmov 0   ;;  %v2063_v1 = vmov 0.0   ;;  %v1732_v2 = vld [vmem:[#allocation9 + $0x4] ss:$16 sps:$4 sm:$0xff]   ;;  %v96_v43 = vlaneseq }
  0x35   :  { %172 = vmatprep.mubr.bf16.mxu1 %v2062_v0  ;;  %469 = vmatprep.mubr.bf16.mxu0 %v2062_v0  ;;  %84 = vst [vmem:[#allocation2] sm:$0x3] %v2063_v1  ;;  %85 = vst [vmem:[#allocation3] sm:$0x3] %v2063_v1  ;;  %v2124_v3 = vld [vmem:[#allocation11 + $0xe4] ss:$16 sps:$4 sm:$0xff]  }
  0x36   :  { %86 = vst [vmem:[#allocation4] sm:$0x3] %v2063_v1  ;;  %154 = vmatprep.subr.bf16.mxu1 %v1732_v2  ;;  %v1736_v4 = vld [vmem:[#allocation9] ss:$16 sps:$4 sm:$0xff]   ;;  %437 = vmatprep.subr.bf16.mxu0 %v2124_v3  ;;  %v88_v7 = vld [vmem:[#allocation6 + $0x8] sm:$0xff]  ;;  %vm136_vm0 = vcmask 130048  }
  0x37   :  { %v2126_v5 = vld [vmem:[#allocation11 + $0xe0] ss:$16 sps:$4 sm:$0xff]   ;;  %155 = vmatpush1.bf16.msra.mxu1 %v1736_v4  ;;  %v2130_v9 = vld [vmem:[#allocation11 + $0xc4] ss:$16 sps:$4 sm:$0xff]   ;;  %v1741_v11 = vld [vmem:[#allocation9 + $0x8] ss:$16 sps:$4 sm:$0xff]  }
  0x38   :  { %v87_v6 = vld [vmem:[#allocation6] sm:$0xff]  ;;  %438 = vmatpush1.bf16.msra.mxu0 %v2126_v5  ;;  %v1743_v12 = vld [vmem:[#allocation9 + $0xc] ss:$16 sps:$4 sm:$0xff]   ;;  %v2148_v17 = vld [vmem:[#allocation11 + $0xe8] ss:$16 sps:$4 sm:$0xff]   ;;  %v97_v44 = vshrl.u32 %v96_v43, 7 }
  0x39   :  { %v89_v8 = vpack.c.bf16 %v88_v7, %v87_v6  ;;  %v2132_v10 = vld [vmem:[#allocation11 + $0xc0] ss:$16 sps:$4 sm:$0xff]   ;;  %439 = vmatprep.subr.bf16.mxu0 %v2130_v9  ;;  %v2135_v13 = vld [vmem:[#allocation11 + $0xa4] ss:$16 sps:$4 sm:$0xff]   ;;  %197 = vmatprep.subr.bf16.mxu1 %v1743_v12  ;;  %v2141_v15 = vld [vmem:[#allocation11 + $0xec] ss:$16 sps:$4 sm:$0xff]  }
  0x3a   :  { %v2138_v14 = vld [vmem:[#allocation11 + $0xa0] ss:$16 sps:$4 sm:$0xff]   ;;  %v2145_v16 = vld [vmem:[#allocation11 + $0x84] ss:$16 sps:$4 sm:$0xff]   ;;  %v2153_v19 = vld [vmem:[#allocation11 + $0xcc] ss:$16 sps:$4 sm:$0xff]  }
  0x3b   :  { %1609 = vmatmul.mubr.msk.bf16.vlgmr.msra.gmra.mxu1 %vm136_vm0, %v89_v8  ;;  %v2151_v18 = vld [vmem:[#allocation11 + $0x80] ss:$16 sps:$4 sm:$0xff]   ;;  %v2156_v20 = vld [vmem:[#allocation11 + $0x64] ss:$16 sps:$4 sm:$0xff]   ;;  %v2159_v21 = vld [vmem:[#allocation11 + $0xc8] ss:$16 sps:$4 sm:$0xff]  }
  0x3c   :  { %440 = vmatpush1.bf16.msra.mxu0 %v2132_v10  ;;  %198 = vmatpush1.bf16.msra.mxu1 %v1741_v11  ;;  %v2163_v22 = vld [vmem:[#allocation11 + $0x60] ss:$16 sps:$4 sm:$0xff]   ;;  %v2167_v23 = vld [vmem:[#allocation11 + $0xac] ss:$16 sps:$4 sm:$0xff]   ;;  %v2169_v24 = vld [vmem:[#allocation11 + $0x44] ss:$16 sps:$4 sm:$0xff]  }
  0x3d   :  { %441 = vmatprep.subr.bf16.mxu0 %v2135_v13  ;;  %215 = vmatprep.mubr.bf16.mxu1 %v2062_v0  ;;  %v2174_v25 = vld [vmem:[#allocation11 + $0xa8] ss:$16 sps:$4 sm:$0xff]   ;;  %v2176_v26 = vld [vmem:[#allocation11 + $0x40] ss:$16 sps:$4 sm:$0xff]   ;;  %v2180_v27 = vld [vmem:[#allocation11 + $0x8c] ss:$16 sps:$4 sm:$0xff]  }
  0x3e   :  { %478 = vmatprep.subr.bf16.mxu1 %v2141_v15  ;;  %v2182_v28 = vld [vmem:[#allocation11 + $0x24] ss:$16 sps:$4 sm:$0xff]   ;;  %v2186_v29 = vld [vmem:[#allocation11 + $0x88] ss:$16 sps:$4 sm:$0xff]   ;;  %v2188_v30 = vld [vmem:[#allocation11 + $0x20] ss:$16 sps:$4 sm:$0xff]  }
  0x3f   :  { %v2192_v31 = vld [vmem:[#allocation11 + $0x6c] ss:$16 sps:$4 sm:$0xff]   ;;  %v2194_v32 = vld [vmem:[#allocation11 + $0x4] ss:$16 sps:$4 sm:$0xff]   ;;  %v2198_v33 = vld [vmem:[#allocation11 + $0x68] ss:$16 sps:$4 sm:$0xff]  }
  0x40   :  { %442 = vmatpush1.bf16.msra.mxu0 %v2138_v14  ;;  %v2200_v34 = vld [vmem:[#allocation11] ss:$16 sps:$4 sm:$0xff]   ;;  %v237_v35 = vld [vmem:[#allocation2] sm:$0x3]  ;;  %v2204_v36 = vld [vmem:[#allocation11 + $0x4c] ss:$16 sps:$4 sm:$0xff]  }
  0x41   :  { %443 = vmatprep.subr.bf16.mxu0 %v2145_v16  ;;  %v244_v37 = vpack.c.bf16 %v237_v35, %v237_v35  ;;  %v2208_v38 = vld [vmem:[#allocation11 + $0x48] ss:$16 sps:$4 sm:$0xff]   ;;  %v2211_v39 = vld [vmem:[#allocation11 + $0x2c] ss:$16 sps:$4 sm:$0xff]   ;;  %v98_v45 = vsub.s32 0, %v97_v44  ;;  %v102_v47 = vsub.s32 1, %v97_v44 }
  0x42   :  { %v2215_v40 = vld [vmem:[#allocation11 + $0x28] ss:$16 sps:$4 sm:$0xff]   ;;  %v2219_v41 = vld [vmem:[#allocation11 + $0xc] ss:$16 sps:$4 sm:$0xff]   ;;  %v106_v52 = vsub.s32 2, %v97_v44  ;;  %v110_v55 = vsub.s32 3, %v97_v44 }
  0x43   :  { %1610 = vmatmul.mubr.msk.bf16.vlgmr.msra.gmra.mxu1 %vm136_vm0, %v89_v8  ;;  %v2224_v42 = vld [vmem:[#allocation11 + $0x8] ss:$16 sps:$4 sm:$0xff]   ;;  %vm2064_vm1 = vmmov 0   ;;  %s2065_s20 = smov [#allocation14]  }
  0x44   :  { %479 = vmatpush1.bf16.msra.mxu1 %v2148_v17  ;;  %444 = vmatpush1.bf16.msra.mxu0 %v2151_v18  ;;  %v94_v46 = vld [vmem:[%s2576_s3] sm:$0xf]  ;;  %s1594_s21 = sshll.u32 %s2065_s20, 4  ;;  %s1595_s21 = int_to_ptr.vmem [resolvable:$true] %s1594_s21 }
  0x45   :  { %480 = vmatprep.subr.bf16.mxu1 %v2153_v19  ;;  %445 = vmatprep.subr.bf16.mxu0 %v2156_v20  ;;  %v99_v48 = vrot.slane %v94_v46, %v98_v45  ;;  %v103_v49 = vrot.slane %v94_v46, %v102_v47  ;;  %v107_v58 = vrot.slane %v94_v46, %v106_v52  ;;  %s2026_s22 = scalar_lea.vmem %s1595_s21, 32  ;;  %p2031_p7 = scmp.lt.s32.totalorder %s1595_s21, %s1595_s21 }
  0x46   :  { %510 = vmatprep.mubr.bf16.mxu1 %v2062_v0  ;;  %v111_v61 = vrot.slane %v94_v46, %v110_v55  ;;  %p2027_p6 = scmp.ne.s32.totalorder %s1595_s21, %s2026_s22  ;;  %p2032_p8 = scmp.lt.s32.totalorder %s2026_s22, %s2026_s22 }
  0x48   :  { %481 = vmatpush1.bf16.msra.mxu1 %v2159_v21  ;;  %446 = vmatpush1.bf16.msra.mxu0 %v2163_v22  ;;  %p2033_p9 = por %p2032_p8, %p2031_p7 }
  0x49   :  { %482 = vmatprep.subr.bf16.mxu1 %v2167_v23  ;;  %447 = vmatprep.subr.bf16.mxu0 %v2169_v24 }
  0x4a   :  { %p2034_p10 = pnand %p2033_p9, %p2027_p6 }
  0x4c   :  { %483 = vmatpush1.bf16.msra.mxu1 %v2174_v25  ;;  %448 = vmatpush1.bf16.msra.mxu0 %v2176_v26 }
  0x4d   :  { %484 = vmatprep.subr.bf16.mxu1 %v2180_v27  ;;  %449 = vmatprep.subr.bf16.mxu0 %v2182_v28 }
  0x50   :  { %485 = vmatpush1.bf16.msra.mxu1 %v2186_v29  ;;  %450 = vmatpush1.bf16.msra.mxu0 %v2188_v30 }
  0x51   :  { %486 = vmatprep.subr.bf16.mxu1 %v2192_v31  ;;  %451 = vmatprep.subr.bf16.mxu0 %v2194_v32 }
  0x54   :  { %487 = vmatpush1.bf16.msra.mxu1 %v2198_v33  ;;  %452 = vmatpush1.bf16.msra.mxu0 %v2200_v34 }
  0x55   :  { %488 = vmatprep.subr.bf16.mxu1 %v2204_v36  ;;  %553 = vmatprep.subr.bf16.mxu0 %v2124_v3 }
  0x57   :  { %470 = vmatmul.mubr.bf16.vlgmr.msra.gmra.mxu0 %v244_v37 }
  0x58   :  { %489 = vmatpush1.bf16.msra.mxu1 %v2208_v38  ;;  %554 = vmatpush1.bf16.msra.mxu0 %v2126_v5 }
  0x59   :  { %490 = vmatprep.subr.bf16.mxu1 %v2211_v39  ;;  %555 = vmatprep.subr.bf16.mxu0 %v2130_v9 }
  0x5a   :  { %585 = vmatprep.mubr.bf16.mxu0 %v2062_v0 }
  0x5c   :  { %491 = vmatpush1.bf16.msra.mxu1 %v2215_v40  ;;  %556 = vmatpush1.bf16.msra.mxu0 %v2132_v10 }
  0x5d   :  { %492 = vmatprep.subr.bf16.mxu1 %v2219_v41  ;;  %557 = vmatprep.subr.bf16.mxu0 %v2135_v13 }
  0x60   :  { %493 = vmatpush1.bf16.msra.mxu1 %v2224_v42  ;;  %558 = vmatpush1.bf16.msra.mxu0 %v2138_v14 }
  0x61   :  { %594 = vmatprep.subr.bf16.mxu1 %v2141_v15  ;;  %559 = vmatprep.subr.bf16.mxu0 %v2145_v16 }
  0x63   :  { %511 = vmatmul.mubr.bf16.vlgmr.msra.gmra.mxu1 %v244_v37 }
  0x64   :  { %595 = vmatpush1.bf16.msra.mxu1 %v2148_v17  ;;  %560 = vmatpush1.bf16.msra.mxu0 %v2151_v18 }
  0x65   :  { %596 = vmatprep.subr.bf16.mxu1 %v2153_v19  ;;  %561 = vmatprep.subr.bf16.mxu0 %v2156_v20 }
  0x66   :  { %626 = vmatprep.mubr.bf16.mxu1 %v2062_v0 }
  0x68   :  { %597 = vmatpush1.bf16.msra.mxu1 %v2159_v21  ;;  %562 = vmatpush1.bf16.msra.mxu0 %v2163_v22 }
  0x69   :  { %598 = vmatprep.subr.bf16.mxu1 %v2167_v23  ;;  %563 = vmatprep.subr.bf16.mxu0 %v2169_v24 }
  0x6c   :  { %599 = vmatpush1.bf16.msra.mxu1 %v2174_v25  ;;  %564 = vmatpush1.bf16.msra.mxu0 %v2176_v26 }
  0x6d   :  { %600 = vmatprep.subr.bf16.mxu1 %v2180_v27  ;;  %565 = vmatprep.subr.bf16.mxu0 %v2182_v28 }
  0x70   :  { %601 = vmatpush1.bf16.msra.mxu1 %v2186_v29  ;;  %566 = vmatpush1.bf16.msra.mxu0 %v2188_v30 }
  0x71   :  { %602 = vmatprep.subr.bf16.mxu1 %v2192_v31  ;;  %567 = vmatprep.subr.bf16.mxu0 %v2194_v32 }
  0x74   :  { %603 = vmatpush1.bf16.msra.mxu1 %v2198_v33  ;;  %568 = vmatpush1.bf16.msra.mxu0 %v2200_v34 }
  0x75   :  { %604 = vmatprep.subr.bf16.mxu1 %v2204_v36  ;;  %690 = vmatprep.subr.bf16.mxu0 %v2124_v3 }
  0x78   :  { %605 = vmatpush1.bf16.msra.mxu1 %v2208_v38 }
  0x79   :  { %606 = vmatprep.subr.bf16.mxu1 %v2211_v39 }
  0x7c   :  { %607 = vmatpush1.bf16.msra.mxu1 %v2215_v40 }
  0x7d   :  { %608 = vmatprep.subr.bf16.mxu1 %v2219_v41 }
  0x80   :  { %609 = vmatpush1.bf16.msra.mxu1 %v2224_v42 }
  0x81   :  { %731 = vmatprep.subr.bf16.mxu1 %v2141_v15 }
  0xfb   :  { %v174_v50 = vpop.f32.mrf.mxu1 }
  0xfc   :  { %v175_v51 = vadd.f32 %v174_v50, %v99_v48 }
  0xfd   :  { %v176_v53 = vpop.f32.mrf.mxu1 }
  0xfe   :  { %229 = vst [vmem:[#allocation5 + $0x30] sm:$0xff] %v175_v51  ;;  %v177_v54 = vadd.f32 %v176_v53, %v103_v49 }
  0xff   :  { %v178_v56 = vpop.f32.mrf.mxu1 }
 0x100   :  { %230 = vst [vmem:[#allocation5] sm:$0xff] %v177_v54  ;;  %v179_v57 = vadd.f32 %v178_v56, %v99_v48 }
 0x101   :  { %v180_v59 = vpop.f32.mrf.mxu1 }
 0x102   :  { %233 = vst [vmem:[#allocation5 + $0x8] sm:$0xff] %v179_v57  ;;  %v181_v60 = vadd.f32 %v180_v59, %v103_v49 }
 0x103   :  { %v217_v62 = vpop.f32.mrf.mxu1 }
 0x104   :  { %234 = vst [vmem:[#allocation5 + $0x20] sm:$0xff] %v181_v60  ;;  %v218_v63 = vadd.f32 %v217_v62, %v107_v58 }
 0x105   :  { %v219_v2 = vpop.f32.mrf.mxu1  ;;  %v240_v12 = vld [vmem:[#allocation5 + $0x30] sm:$0x3] }
 0x106   :  { %231 = vst [vmem:[#allocation5 + $0x18] sm:$0xff] %v218_v63  ;;  %v220_v4 = vadd.f32 %v219_v2, %v111_v61 }
 0x107   :  { %v221_v6 = vpop.f32.mrf.mxu1  ;;  %v241_v43 = vld [vmem:[#allocation5] sm:$0x3] }
 0x108   :  { %232 = vst [vmem:[#allocation5 + $0x10] sm:$0xff] %v220_v4  ;;  %v222_v7 = vadd.f32 %v221_v6, %v107_v58  ;;  %v238_v4 = vld [vmem:[#allocation3] sm:$0x3] }
 0x109   :  { %v223_v8 = vpop.f32.mrf.mxu1 }
 0x10a   :  { %235 = vst [vmem:[#allocation5 + $0x28] sm:$0xff] %v222_v7  ;;  %v224_v11 = vadd.f32 %v223_v8, %v111_v61 }
 0x10c   :  { %236 = vst [vmem:[#allocation5 + $0x38] sm:$0xff] %v224_v11 }
 0x10d   :  { %v242_v55 = vld [vmem:[#allocation5 + $0x18] sm:$0x3] }
 0x10f   :  { %v243_v51 = vld [vmem:[#allocation5 + $0x10] sm:$0x3] }
 0x117   :  { %v471_v35 = vpop.f32.mrf.mxu0 }
 0x118   :  { %v519_v37 = vadd.f32 %v471_v35, %v240_v12 }
 0x119   :  { %v473_v44 = vpop.f32.mrf.mxu0 }
 0x11a   :  { %v1643_v45 = vmul.f32 -1.442695, %v519_v37  ;;  %v520_v46 = vadd.f32 %v473_v44, %v241_v43 }
 0x11b   :  { %v475_v47 = vpop.f32.mrf.mxu0 }
 0x11c   :  { %1786 = vpow2.f32 %v1643_v45  ;;  %v1644_v48 = vmul.f32 -1.442695, %v520_v46 }
 0x11d   :  { %v476_v49 = vpop.f32.mrf.mxu0 }
 0x11e   :  { %1788 = vpow2.f32 %v1644_v48  ;;  %v548_v49 = vld [vmem:[#allocation5 + $0x30] sm:$0xc] }
 0x123   :  { %v512_v50 = vpop.f32.mrf.mxu1 }
 0x124   :  { %v521_v58 = vadd.f32 %v512_v50, %v242_v55 }
 0x125   :  { %v514_v52 = vpop.f32.mrf.mxu1 }
 0x126   :  { %v522_v53 = vadd.f32 %v514_v52, %v243_v51 }
 0x127   :  { %v516_v54 = vpop.f32.mrf.mxu1 }
 0x128   :  { %v1645_v56 = vmul.f32 -1.442695, %v522_v53  ;;  %v549_v54 = vld [vmem:[#allocation5] sm:$0xc] }
 0x129   :  { %v1787_v57 = vpop.eup %1786  ;;  %v517_v59 = vpop.f32.mrf.mxu1 }
 0x12a   :  { %v526_v60 = vadd.f32 1.0, %v1787_v57  ;;  %1790 = vpow2.f32 %v1645_v56 }
 0x12b   :  { %v1789_v61 = vpop.eup %1788 }
 0x12c   :  { %1792 = vrcp.f32 %v526_v60  ;;  %v532_v62 = vadd.f32 1.0, %v1789_v61 }
 0x12d   :  { %1794 = vtanh.f32 %v521_v58 }
 0x12e   :  { %1796 = vrcp.f32 %v532_v62 }
 0x137   :  { %v1791_v63 = vpop.eup %1790 }
 0x138   :  { %v539_v8 = vadd.f32 1.0, %v1791_v63  ;;  %v551_v63 = vld [vmem:[#allocation5 + $0x10] sm:$0xc] }
 0x139   :  { %v1793_v2 = vpop.eup %1792 }
 0x13a   :  { %v1795_v6 = vpop.eup %1794  ;;  %1798 = vrcp.f32 %v539_v8 }
 0x13b   :  { %v1797_v7 = vpop.eup %1796  ;;  %v543_v12 = vmul.f32 %v1795_v6, %v1793_v2 }
 0x13c   :  { %v542_v11 = vmul.f32 %v1797_v7, %v238_v4  ;;  %v550_v7 = vld [vmem:[#allocation5 + $0x18] sm:$0xc] }
 0x13e   :  { %v2263_v35 = vadd.f32 %v543_v12, %v542_v11 }
 0x140   :  { %1800 = vtanh.f32 %v2263_v35 }
 0x147   :  { %v1799_v37 = vpop.eup %1798 }
 0x14d   :  { %v1801_v43 = vpop.eup %1800 }
 0x14e   :  { %v2266_v44 = vmul.f32 %v1801_v43, %v1799_v37 }
 0x150   :  { %v552_v45 = vpack.c.bf16 %v2266_v44, %v2266_v44 }
 0x152   :  { %586 = vmatmul.mubr.bf16.vlgmr.msra.gmra.mxu0 %v552_v45  ;;  %627 = vmatmul.mubr.bf16.vlgmr.msra.gmra.mxu1 %v552_v45 }
 0x153   :  { %691 = vmatpush1.bf16.msra.mxu0 %v2126_v5  ;;  %732 = vmatpush1.bf16.msra.mxu1 %v2148_v17 }
 0x154   :  { %692 = vmatprep.subr.bf16.mxu0 %v2130_v9  ;;  %733 = vmatprep.subr.bf16.mxu1 %v2153_v19 }
 0x155   :  { %722 = vmatprep.mubr.bf16.mxu0 %v2062_v0  ;;  %763 = vmatprep.mubr.bf16.mxu1 %v2062_v0 }
 0x157   :  { %693 = vmatpush1.bf16.msra.mxu0 %v2132_v10  ;;  %734 = vmatpush1.bf16.msra.mxu1 %v2159_v21 }
 0x158   :  { %694 = vmatprep.subr.bf16.mxu0 %v2135_v13  ;;  %735 = vmatprep.subr.bf16.mxu1 %v2167_v23 }
 0x15b   :  { %695 = vmatpush1.bf16.msra.mxu0 %v2138_v14  ;;  %736 = vmatpush1.bf16.msra.mxu1 %v2174_v25 }
 0x15c   :  { %696 = vmatprep.subr.bf16.mxu0 %v2145_v16  ;;  %737 = vmatprep.subr.bf16.mxu1 %v2180_v27 }
 0x15f   :  { %697 = vmatpush1.bf16.msra.mxu0 %v2151_v18  ;;  %738 = vmatpush1.bf16.msra.mxu1 %v2186_v29 }
 0x160   :  { %698 = vmatprep.subr.bf16.mxu0 %v2156_v20  ;;  %739 = vmatprep.subr.bf16.mxu1 %v2192_v31 }
 0x163   :  { %699 = vmatpush1.bf16.msra.mxu0 %v2163_v22  ;;  %740 = vmatpush1.bf16.msra.mxu1 %v2198_v33 }
 0x164   :  { %700 = vmatprep.subr.bf16.mxu0 %v2169_v24  ;;  %741 = vmatprep.subr.bf16.mxu1 %v2204_v36 }
 0x167   :  { %701 = vmatpush1.bf16.msra.mxu0 %v2176_v26  ;;  %742 = vmatpush1.bf16.msra.mxu1 %v2208_v38 }
 0x168   :  { %702 = vmatprep.subr.bf16.mxu0 %v2182_v28  ;;  %743 = vmatprep.subr.bf16.mxu1 %v2211_v39 }
 0x16b   :  { %703 = vmatpush1.bf16.msra.mxu0 %v2188_v30  ;;  %744 = vmatpush1.bf16.msra.mxu1 %v2215_v40 }
 0x16c   :  { %704 = vmatprep.subr.bf16.mxu0 %v2194_v32  ;;  %745 = vmatprep.subr.bf16.mxu1 %v2219_v41 }
 0x16f   :  { %705 = vmatpush1.bf16.msra.mxu0 %v2200_v34  ;;  %746 = vmatpush1.bf16.msra.mxu1 %v2224_v42 }
 0x170   :  { %827 = vmatprep.subr.bf16.mxu0 %v2124_v3  ;;  %868 = vmatprep.subr.bf16.mxu1 %v2141_v15 }
 0x212   :  { %v587_v46 = vpop.f32.mrf.mxu0  ;;  %v628_v47 = vpop.f32.mrf.mxu1 }
 0x213   :  { %v639_v48 = vrot.slane %v587_v46, 6  ;;  %v641_v4 = vrot.slane %v628_v47, 6 }
 0x214   :  { %v589_v50 = vpop.f32.mrf.mxu0  ;;  %v630_v51 = vpop.f32.mrf.mxu1 }
 0x215   :  { %v647_v52 = vadd.f32 %v639_v48, %v548_v49  ;;  %v640_v53 = vrot.slane %v589_v50, 6  ;;  %v642_v62 = vrot.slane %v630_v51, 6  ;;  %v649_v11 = vadd.f32 %v641_v4, %v550_v7 }
 0x216   :  { %v591_v55 = vpop.f32.mrf.mxu0  ;;  %v632_v56 = vpop.f32.mrf.mxu1  ;;  %v671_v49 = vrot.slane %v2263_v35, 6 }
 0x217   :  { %v1646_v57 = vmul.f32 -1.442695, %v647_v52  ;;  %v648_v58 = vadd.f32 %v640_v53, %v549_v54  ;;  %v650_v2 = vadd.f32 %v642_v62, %v551_v63  ;;  %v239_v56 = vld [vmem:[#allocation4] sm:$0x3] }
 0x218   :  { %v592_v59 = vpop.f32.mrf.mxu0  ;;  %v633_v60 = vpop.f32.mrf.mxu1 }
 0x219   :  { %1802 = vpow2.f32 %v1646_v57  ;;  %v1647_v61 = vmul.f32 -1.442695, %v648_v58  ;;  %v1648_v6 = vmul.f32 -1.442695, %v650_v2  ;;  %v547_v58 = vadd.f32 %v2266_v44, %v239_v56  ;;  %v682_v2 = vld [vmem:[#allocation5 + $0x30] sm:$0x30] }
 0x21b   :  { %1804 = vpow2.f32 %v1647_v61 }
 0x21c   :  { %1806 = vpow2.f32 %v1648_v6 }
 0x226   :  { %v1803_v8 = vpop.eup %1802 }
 0x227   :  { %v654_v12 = vadd.f32 1.0, %v1803_v8 }
 0x228   :  { %v1805_v37 = vpop.eup %1804 }
 0x229   :  { %1808 = vrcp.f32 %v654_v12  ;;  %v660_v43 = vadd.f32 1.0, %v1805_v37  ;;  %v1807_v45 = vpop.eup %1806 }
 0x22a   :  { %1810 = vtanh.f32 %v649_v11  ;;  %v667_v51 = vadd.f32 1.0, %v1807_v45  ;;  %v683_v11 = vld [vmem:[#allocation5] sm:$0x30] }
 0x22b   :  { %1812 = vrcp.f32 %v660_v43 }
 0x22c   :  { %1814 = vrcp.f32 %v667_v51  ;;  %v685_v51 = vld [vmem:[#allocation5 + $0x10] sm:$0x30] }
 0x236   :  { %v1809_v46 = vpop.eup %1808 }
 0x237   :  { %v1811_v48 = vpop.eup %1810 }
 0x238   :  { %v1813_v50 = vpop.eup %1812  ;;  %v674_v52 = vmul.f32 %v1811_v48, %v1809_v46 }
 0x239   :  { %v673_v47 = vmul.f32 %v1813_v50, %v671_v49  ;;  %v1815_v54 = vpop.eup %1814 }
 0x23b   :  { %v2305_v53 = vadd.f32 %v674_v52, %v673_v47 }
 0x23d   :  { %1816 = vtanh.f32 %v2305_v53 }
 0x24a   :  { %v1817_v55 = vpop.eup %1816 }
 0x24b   :  { %v677_v57 = vmul.f32 %v1817_v55, %v1815_v54  ;;  %v684_v55 = vld [vmem:[#allocation5 + $0x18] sm:$0x30] }
 0x24d   :  { %v679_v59 = vrot.slane %v677_v57, 2  ;;  %v686_v60 = vpack.c.bf16 %v677_v57, %v677_v57 }
 0x24f   :  { %v2309_v61 = vadd.f32 %v679_v59, %v547_v58  ;;  %v688_v35 = vrot.slane %v686_v60, 1 }
 0x251   :  { %723 = vmatmul.mubr.bf16.vlgmr.msra.gmra.mxu0 %v688_v35  ;;  %764 = vmatmul.mubr.bf16.vlgmr.msra.gmra.mxu1 %v688_v35 }
 0x252   :  { %828 = vmatpush1.bf16.msra.mxu0 %v2126_v5  ;;  %869 = vmatpush1.bf16.msra.mxu1 %v2148_v17 }
 0x253   :  { %829 = vmatprep.subr.bf16.mxu0 %v2130_v9  ;;  %870 = vmatprep.subr.bf16.mxu1 %v2153_v19 }
 0x254   :  { %859 = vmatprep.mubr.bf16.mxu0 %v2062_v0  ;;  %900 = vmatprep.mubr.bf16.mxu1 %v2062_v0 }
 0x256   :  { %830 = vmatpush1.bf16.msra.mxu0 %v2132_v10  ;;  %871 = vmatpush1.bf16.msra.mxu1 %v2159_v21 }
 0x257   :  { %831 = vmatprep.subr.bf16.mxu0 %v2135_v13  ;;  %872 = vmatprep.subr.bf16.mxu1 %v2167_v23 }
 0x25a   :  { %832 = vmatpush1.bf16.msra.mxu0 %v2138_v14  ;;  %873 = vmatpush1.bf16.msra.mxu1 %v2174_v25 }
 0x25b   :  { %833 = vmatprep.subr.bf16.mxu0 %v2145_v16  ;;  %874 = vmatprep.subr.bf16.mxu1 %v2180_v27 }
 0x25e   :  { %834 = vmatpush1.bf16.msra.mxu0 %v2151_v18  ;;  %875 = vmatpush1.bf16.msra.mxu1 %v2186_v29 }
 0x25f   :  { %835 = vmatprep.subr.bf16.mxu0 %v2156_v20  ;;  %876 = vmatprep.subr.bf16.mxu1 %v2192_v31 }
 0x262   :  { %836 = vmatpush1.bf16.msra.mxu0 %v2163_v22  ;;  %877 = vmatpush1.bf16.msra.mxu1 %v2198_v33 }
 0x263   :  { %837 = vmatprep.subr.bf16.mxu0 %v2169_v24  ;;  %878 = vmatprep.subr.bf16.mxu1 %v2204_v36 }
 0x266   :  { %838 = vmatpush1.bf16.msra.mxu0 %v2176_v26  ;;  %879 = vmatpush1.bf16.msra.mxu1 %v2208_v38 }
 0x267   :  { %839 = vmatprep.subr.bf16.mxu0 %v2182_v28  ;;  %880 = vmatprep.subr.bf16.mxu1 %v2211_v39 }
 0x26a   :  { %840 = vmatpush1.bf16.msra.mxu0 %v2188_v30  ;;  %881 = vmatpush1.bf16.msra.mxu1 %v2215_v40 }
 0x26b   :  { %841 = vmatprep.subr.bf16.mxu0 %v2194_v32  ;;  %882 = vmatprep.subr.bf16.mxu1 %v2219_v41 }
 0x26e   :  { %842 = vmatpush1.bf16.msra.mxu0 %v2200_v34  ;;  %883 = vmatpush1.bf16.msra.mxu1 %v2224_v42 }
 0x26f   :  { %964 = vmatprep.subr.bf16.mxu0 %v2124_v3  ;;  %1005 = vmatprep.subr.bf16.mxu1 %v2141_v15 }
 0x311   :  { %v724_v44 = vpop.f32.mrf.mxu0  ;;  %v765_v62 = vpop.f32.mrf.mxu1 }
 0x312   :  { %v776_v63 = vrot.slane %v724_v44, 4  ;;  %v778_v47 = vrot.slane %v765_v62, 4 }
 0x313   :  { %v726_v4 = vpop.f32.mrf.mxu0  ;;  %v767_v6 = vpop.f32.mrf.mxu1 }
 0x314   :  { %v784_v7 = vadd.f32 %v776_v63, %v682_v2  ;;  %v777_v8 = vrot.slane %v726_v4, 4  ;;  %v779_v50 = vrot.slane %v767_v6, 4  ;;  %v786_v57 = vadd.f32 %v778_v47, %v684_v55  ;;  %v820_v55 = vld [vmem:[#allocation5] sm:$0xc0] }
 0x315   :  { %v728_v12 = vpop.f32.mrf.mxu0  ;;  %v769_v37 = vpop.f32.mrf.mxu1  ;;  %v808_v2 = vrot.slane %v2305_v53, 6 }
 0x316   :  { %v1649_v43 = vmul.f32 -1.442695, %v784_v7  ;;  %v785_v45 = vadd.f32 %v777_v8, %v683_v11  ;;  %v787_v52 = vadd.f32 %v779_v50, %v685_v51  ;;  %v819_v50 = vld [vmem:[#allocation5 + $0x30] sm:$0xc0] }
 0x317   :  { %v729_v46 = vpop.f32.mrf.mxu0  ;;  %v770_v48 = vpop.f32.mrf.mxu1 }
 0x318   :  { %1818 = vpow2.f32 %v1649_v43  ;;  %v1650_v49 = vmul.f32 -1.442695, %v785_v45  ;;  %v1651_v54 = vmul.f32 -1.442695, %v787_v52 }
 0x31a   :  { %1820 = vpow2.f32 %v1650_v49 }
 0x31b   :  { %1822 = vpow2.f32 %v1651_v54 }
 0x325   :  { %v1819_v56 = vpop.eup %1818 }
 0x326   :  { %v791_v58 = vadd.f32 1.0, %v1819_v56 }
 0x327   :  { %v1821_v59 = vpop.eup %1820 }
 0x328   :  { %1824 = vrcp.f32 %v791_v58  ;;  %v797_v60 = vadd.f32 1.0, %v1821_v59  ;;  %v1823_v35 = vpop.eup %1822 }
 0x329   :  { %1826 = vtanh.f32 %v786_v57  ;;  %v804_v6 = vadd.f32 1.0, %v1823_v35 }
 0x32a   :  { %1828 = vrcp.f32 %v797_v60 }
 0x32b   :  { %1830 = vrcp.f32 %v804_v6 }
 0x335   :  { %v1825_v44 = vpop.eup %1824 }
 0x336   :  { %v1827_v63 = vpop.eup %1826 }
 0x337   :  { %v1829_v4 = vpop.eup %1828  ;;  %v811_v7 = vmul.f32 %v1827_v63, %v1825_v44  ;;  %v822_v63 = vld [vmem:[#allocation5 + $0x10] sm:$0xc0] }
 0x338   :  { %v810_v62 = vmul.f32 %v1829_v4, %v808_v2  ;;  %v1831_v11 = vpop.eup %1830 }
 0x33a   :  { %v2346_v8 = vadd.f32 %v811_v7, %v810_v62  ;;  %v821_v7 = vld [vmem:[#allocation5 + $0x18] sm:$0xc0] }
 0x33c   :  { %1832 = vtanh.f32 %v2346_v8 }
 0x349   :  { %v1833_v12 = vpop.eup %1832 }
 0x34a   :  { %v814_v37 = vmul.f32 %v1833_v12, %v1831_v11 }
 0x34c   :  { %v816_v43 = vrot.slane %v814_v37, 4  ;;  %v823_v45 = vpack.c.bf16 %v814_v37, %v814_v37 }
 0x34e   :  { %v2350_v46 = vadd.f32 %v816_v43, %v2309_v61  ;;  %v825_v48 = vrot.slane %v823_v45, 2 }
 0x350   :  { %860 = vmatmul.mubr.bf16.vlgmr.msra.gmra.mxu0 %v825_v48  ;;  %901 = vmatmul.mubr.bf16.vlgmr.msra.gmra.mxu1 %v825_v48 }
 0x351   :  { %965 = vmatpush1.bf16.msra.mxu0 %v2126_v5  ;;  %1006 = vmatpush1.bf16.msra.mxu1 %v2148_v17 }
 0x352   :  { %966 = vmatprep.subr.bf16.mxu0 %v2130_v9  ;;  %1007 = vmatprep.subr.bf16.mxu1 %v2153_v19 }
 0x353   :  { %996 = vmatprep.mubr.bf16.mxu0 %v2062_v0  ;;  %1037 = vmatprep.mubr.bf16.mxu1 %v2062_v0 }
 0x355   :  { %967 = vmatpush1.bf16.msra.mxu0 %v2132_v10  ;;  %1008 = vmatpush1.bf16.msra.mxu1 %v2159_v21 }
 0x356   :  { %968 = vmatprep.subr.bf16.mxu0 %v2135_v13  ;;  %1009 = vmatprep.subr.bf16.mxu1 %v2167_v23 }
 0x359   :  { %969 = vmatpush1.bf16.msra.mxu0 %v2138_v14  ;;  %1010 = vmatpush1.bf16.msra.mxu1 %v2174_v25 }
 0x35a   :  { %970 = vmatprep.subr.bf16.mxu0 %v2145_v16  ;;  %1011 = vmatprep.subr.bf16.mxu1 %v2180_v27 }
 0x35d   :  { %971 = vmatpush1.bf16.msra.mxu0 %v2151_v18  ;;  %1012 = vmatpush1.bf16.msra.mxu1 %v2186_v29 }
 0x35e   :  { %972 = vmatprep.subr.bf16.mxu0 %v2156_v20  ;;  %1013 = vmatprep.subr.bf16.mxu1 %v2192_v31 }
 0x361   :  { %973 = vmatpush1.bf16.msra.mxu0 %v2163_v22  ;;  %1014 = vmatpush1.bf16.msra.mxu1 %v2198_v33 }
 0x362   :  { %974 = vmatprep.subr.bf16.mxu0 %v2169_v24  ;;  %1015 = vmatprep.subr.bf16.mxu1 %v2204_v36 }
 0x365   :  { %975 = vmatpush1.bf16.msra.mxu0 %v2176_v26  ;;  %1016 = vmatpush1.bf16.msra.mxu1 %v2208_v38 }
 0x366   :  { %976 = vmatprep.subr.bf16.mxu0 %v2182_v28  ;;  %1017 = vmatprep.subr.bf16.mxu1 %v2211_v39 }
 0x369   :  { %977 = vmatpush1.bf16.msra.mxu0 %v2188_v30  ;;  %1018 = vmatpush1.bf16.msra.mxu1 %v2215_v40 }
 0x36a   :  { %978 = vmatprep.subr.bf16.mxu0 %v2194_v32  ;;  %1019 = vmatprep.subr.bf16.mxu1 %v2219_v41 }
 0x36d   :  { %979 = vmatpush1.bf16.msra.mxu0 %v2200_v34  ;;  %1020 = vmatpush1.bf16.msra.mxu1 %v2224_v42 }
 0x36e   :  { %1083 = vmatprep.subr.bf16.mxu0 %v2124_v3  ;;  %1124 = vmatprep.subr.bf16.mxu1 %v2141_v15 }
 0x410   :  { %v861_v53 = vpop.f32.mrf.mxu0  ;;  %v902_v61 = vpop.f32.mrf.mxu1 }
 0x411   :  { %v913_v49 = vrot.slane %v861_v53, 2  ;;  %v915_v4 = vrot.slane %v902_v61, 2 }
 0x412   :  { %v863_v51 = vpop.f32.mrf.mxu0  ;;  %v904_v52 = vpop.f32.mrf.mxu1 }
 0x413   :  { %v921_v47 = vadd.f32 %v913_v49, %v819_v50  ;;  %v914_v54 = vrot.slane %v863_v51, 2  ;;  %v916_v3 = vrot.slane %v904_v52, 2  ;;  %v923_v11 = vadd.f32 %v915_v4, %v821_v7 }
 0x414   :  { %v865_v56 = vpop.f32.mrf.mxu0  ;;  %v906_v57 = vpop.f32.mrf.mxu1  ;;  %v945_v49 = vrot.slane %v2346_v8, 6 }
 0x415   :  { %v1652_v58 = vmul.f32 -1.442695, %v921_v47  ;;  %v922_v59 = vadd.f32 %v914_v54, %v820_v55  ;;  %v924_v2 = vadd.f32 %v916_v3, %v822_v63 }
 0x416   :  { %v866_v60 = vpop.f32.mrf.mxu0  ;;  %v907_v35 = vpop.f32.mrf.mxu1 }
 0x417   :  { %1834 = vpow2.f32 %v1652_v58  ;;  %v1653_v44 = vmul.f32 -1.442695, %v922_v59  ;;  %v1654_v6 = vmul.f32 -1.442695, %v924_v2 }
 0x419   :  { %1836 = vpow2.f32 %v1653_v44 }
 0x41a   :  { %1838 = vpow2.f32 %v1654_v6 }
 0x424   :  { %v1835_v62 = vpop.eup %1834 }
 0x425   :  { %v928_v12 = vadd.f32 1.0, %v1835_v62 }
 0x426   :  { %v1837_v37 = vpop.eup %1836 }
 0x427   :  { %1840 = vrcp.f32 %v928_v12  ;;  %v934_v43 = vadd.f32 1.0, %v1837_v37  ;;  %v1839_v45 = vpop.eup %1838 }
 0x428   :  { %1842 = vtanh.f32 %v923_v11  ;;  %v941_v51 = vadd.f32 1.0, %v1839_v45 }
 0x429   :  { %1844 = vrcp.f32 %v934_v43 }
 0x42a   :  { %1846 = vrcp.f32 %v941_v51  ;;  %v2450_v51 = vld [vmem:[#allocation11 + $0xc0] ss:$16 sps:$4 sm:$0xff]  }
 0x434   :  { %v1841_v48 = vpop.eup %1840 }
 0x435   :  { %v1843_v53 = vpop.eup %1842 }
 0x436   :  { %v1845_v50 = vpop.eup %1844  ;;  %v948_v52 = vmul.f32 %v1843_v53, %v1841_v48  ;;  %v2436_v48 = vld [vmem:[#allocation11 + $0xe0] ss:$16 sps:$4 sm:$0xff]   ;;  %v2439_v53 = vld [vmem:[#allocation11 + $0xe8] ss:$16 sps:$4 sm:$0xff]  }
 0x437   :  { %v947_v61 = vmul.f32 %v1845_v50, %v945_v49  ;;  %v1847_v54 = vpop.eup %1846  ;;  %v2442_v49 = vld [vmem:[#allocation11 + $0xc4] ss:$16 sps:$4 sm:$0xff]   ;;  %v2445_v50 = vld [vmem:[#allocation11 + $0xcc] ss:$16 sps:$4 sm:$0xff]  }
 0x439   :  { %v2387_v47 = vadd.f32 %v948_v52, %v947_v61  ;;  %v2453_v52 = vld [vmem:[#allocation11 + $0xc8] ss:$16 sps:$4 sm:$0xff]   ;;  %v2456_v61 = vld [vmem:[#allocation11 + $0xa4] ss:$16 sps:$4 sm:$0xff]  }
 0x43b   :  { %1848 = vtanh.f32 %v2387_v47  ;;  %v1070_v63 = vrot.slane %v2387_v47, 6  ;;  %v2459_v47 = vld [vmem:[#allocation11 + $0xac] ss:$16 sps:$4 sm:$0xff]  }
 0x448   :  { %v1849_v55 = vpop.eup %1848 }
 0x449   :  { %v951_v56 = vmul.f32 %v1849_v55, %v1847_v54  ;;  %v2462_v54 = vld [vmem:[#allocation11 + $0xa0] ss:$16 sps:$4 sm:$0xff]   ;;  %v2465_v55 = vld [vmem:[#allocation11 + $0xa8] ss:$16 sps:$4 sm:$0xff]  }
 0x44b   :  { %v953_v57 = vrot.slane %v951_v56, 6  ;;  %v960_v58 = vpack.c.bf16 %v951_v56, %v951_v56  ;;  %v2468_v56 = vld [vmem:[#allocation11 + $0x84] ss:$16 sps:$4 sm:$0xff]  }
 0x44d   :  { %v962_v59 = vrot.slane %v960_v58, 3  ;;  %v2391_v60 = vadd.f32 %v953_v57, %v2350_v46  ;;  %v2471_v57 = vld [vmem:[#allocation11 + $0x8c] ss:$16 sps:$4 sm:$0xff]   ;;  %v2474_v58 = vld [vmem:[#allocation11 + $0x80] ss:$16 sps:$4 sm:$0xff]  }
 0x44f   :  { %997 = vmatmul.mubr.bf16.vlgmr.msra.gmra.mxu0 %v962_v59  ;;  %1038 = vmatmul.mubr.bf16.vlgmr.msra.gmra.mxu1 %v962_v59  ;;  %v2478_v59 = vld [vmem:[#allocation11 + $0x64] ss:$16 sps:$4 sm:$0xff]  }
 0x450   :  { %1084 = vmatpush1.bf16.msra.mxu0 %v2126_v5  ;;  %1125 = vmatpush1.bf16.msra.mxu1 %v2148_v17  ;;  %v2425_v5 = vld [vmem:[#allocation11 + $0xe4] ss:$16 sps:$4 sm:$0xff]  }
 0x451   :  { %1085 = vmatprep.subr.bf16.mxu0 %v2130_v9  ;;  %1126 = vmatprep.subr.bf16.mxu1 %v2153_v19  ;;  %v956_v9 = vld [vmem:[#allocation5 + $0x8] sm:$0x3] }
 0x452   :  { %1115 = vmatprep.mubr.bf16.mxu0 %v2062_v0  ;;  %1156 = vmatprep.mubr.bf16.mxu1 %v2062_v0 }
 0x454   :  { %1086 = vmatpush1.bf16.msra.mxu0 %v2132_v10  ;;  %1127 = vmatpush1.bf16.msra.mxu1 %v2159_v21 }
 0x455   :  { %1087 = vmatprep.subr.bf16.mxu0 %v2135_v13  ;;  %1128 = vmatprep.subr.bf16.mxu1 %v2167_v23 }
 0x458   :  { %1088 = vmatpush1.bf16.msra.mxu0 %v2138_v14  ;;  %1129 = vmatpush1.bf16.msra.mxu1 %v2174_v25 }
 0x459   :  { %1089 = vmatprep.subr.bf16.mxu0 %v2145_v16  ;;  %1130 = vmatprep.subr.bf16.mxu1 %v2180_v27  ;;  %v957_v16 = vld [vmem:[#allocation5 + $0x20] sm:$0x3] }
 0x45c   :  { %1090 = vmatpush1.bf16.msra.mxu0 %v2151_v18  ;;  %1131 = vmatpush1.bf16.msra.mxu1 %v2186_v29 }
 0x45d   :  { %1091 = vmatprep.subr.bf16.mxu0 %v2156_v20  ;;  %1132 = vmatprep.subr.bf16.mxu1 %v2192_v31 }
 0x460   :  { %1092 = vmatpush1.bf16.msra.mxu0 %v2163_v22  ;;  %1133 = vmatpush1.bf16.msra.mxu1 %v2198_v33 }
 0x461   :  { %1093 = vmatprep.subr.bf16.mxu0 %v2169_v24  ;;  %1134 = vmatprep.subr.bf16.mxu1 %v2204_v36 }
 0x464   :  { %1094 = vmatpush1.bf16.msra.mxu0 %v2176_v26  ;;  %1135 = vmatpush1.bf16.msra.mxu1 %v2208_v38  ;;  %v959_v26 = vld [vmem:[#allocation5 + $0x38] sm:$0x3] }
 0x465   :  { %1095 = vmatprep.subr.bf16.mxu0 %v2182_v28  ;;  %1136 = vmatprep.subr.bf16.mxu1 %v2211_v39 }
 0x468   :  { %1096 = vmatpush1.bf16.msra.mxu0 %v2188_v30  ;;  %1137 = vmatpush1.bf16.msra.mxu1 %v2215_v40 }
 0x469   :  { %1097 = vmatprep.subr.bf16.mxu0 %v2194_v32  ;;  %1138 = vmatprep.subr.bf16.mxu1 %v2219_v41 }
 0x46c   :  { %1098 = vmatpush1.bf16.msra.mxu0 %v2200_v34  ;;  %1139 = vmatpush1.bf16.msra.mxu1 %v2224_v42 }
 0x46d   :  { %1220 = vmatprep.subr.bf16.mxu0 %v2425_v5  ;;  %1261 = vmatprep.subr.bf16.mxu1 %v2141_v15  ;;  %v958_v15 = vld [vmem:[#allocation5 + $0x28] sm:$0x3] }
 0x50f   :  { %v998_v10 = vpop.f32.mrf.mxu0  ;;  %v1039_v13 = vpop.f32.mrf.mxu1 }
 0x510   :  { %v1046_v14 = vadd.f32 %v998_v10, %v956_v9  ;;  %v1048_v32 = vadd.f32 %v1039_v13, %v958_v15  ;;  %v2486_v9 = vld [vmem:[#allocation11 + $0x44] ss:$16 sps:$4 sm:$0xff]   ;;  %v2490_v10 = vld [vmem:[#allocation11 + $0x40] ss:$16 sps:$4 sm:$0xff]  }
 0x511   :  { %v1000_v17 = vpop.f32.mrf.mxu0  ;;  %v1041_v18 = vpop.f32.mrf.mxu1 }
 0x512   :  { %v1655_v19 = vmul.f32 -1.442695, %v1046_v14  ;;  %v1047_v20 = vadd.f32 %v1000_v17, %v957_v16  ;;  %v1049_v27 = vadd.f32 %v1041_v18, %v959_v26  ;;  %v1081_v26 = vld [vmem:[#allocation5 + $0x38] sm:$0xc] }
 0x513   :  { %v1002_v21 = vpop.f32.mrf.mxu0  ;;  %v1043_v22 = vpop.f32.mrf.mxu1 }
 0x514   :  { %1850 = vpow2.f32 %v1655_v19  ;;  %v1656_v23 = vmul.f32 -1.442695, %v1047_v20  ;;  %v1657_v28 = vmul.f32 -1.442695, %v1049_v27  ;;  %v1079_v20 = vld [vmem:[#allocation5 + $0x20] sm:$0xc] }
 0x515   :  { %v1003_v24 = vpop.f32.mrf.mxu0  ;;  %v1044_v25 = vpop.f32.mrf.mxu1 }
 0x516   :  { %1852 = vpow2.f32 %v1656_v23 }
 0x517   :  { %1854 = vpow2.f32 %v1657_v28 }
 0x521   :  { %v1851_v30 = vpop.eup %1850 }
 0x522   :  { %v1053_v34 = vadd.f32 1.0, %v1851_v30  ;;  %v1080_v30 = vld [vmem:[#allocation5 + $0x28] sm:$0xc] }
 0x523   :  { %v1853_v8 = vpop.eup %1852 }
 0x524   :  { %1856 = vrcp.f32 %v1053_v34  ;;  %v1059_v46 = vadd.f32 1.0, %v1853_v8  ;;  %v1855_v35 = vpop.eup %1854 }
 0x525   :  { %1858 = vtanh.f32 %v1048_v32  ;;  %v1066_v4 = vadd.f32 1.0, %v1855_v35 }
 0x526   :  { %1860 = vrcp.f32 %v1059_v46 }
 0x527   :  { %1862 = vrcp.f32 %v1066_v4 }
 0x531   :  { %v1857_v44 = vpop.eup %1856 }
 0x532   :  { %v1859_v3 = vpop.eup %1858 }
 0x533   :  { %v1861_v2 = vpop.eup %1860  ;;  %v1073_v6 = vmul.f32 %v1859_v3, %v1857_v44 }
 0x534   :  { %v1072_v7 = vmul.f32 %v1861_v2, %v1070_v63  ;;  %v1863_v11 = vpop.eup %1862 }
 0x536   :  { %v2430_v62 = vadd.f32 %v1073_v6, %v1072_v7 }
 0x538   :  { %1864 = vtanh.f32 %v2430_v62  ;;  %v1201_v2 = vrot.slane %v2430_v62, 6  ;;  %v1937_v62 = vld [vmem:[#allocation11 + $0x88] ss:$16 sps:$4 sm:$0xff]  }
 0x545   :  { %v1865_v12 = vpop.eup %1864 }
 0x546   :  { %v1076_v37 = vmul.f32 %v1865_v12, %v1863_v11 }
 0x548   :  { %v2434_v43 = vadd.f32 %v1076_v37, %v2391_v60  ;;  %v1082_v45 = vpack.c.bf16 %v1076_v37, %v1076_v37  ;;  %v2482_v60 = vld [vmem:[#allocation11 + $0x60] ss:$16 sps:$4 sm:$0xff]  }
 0x54a   :  { %1116 = vmatmul.mubr.bf16.vlgmr.msra.gmra.mxu0 %v1082_v45  ;;  %1157 = vmatmul.mubr.bf16.vlgmr.msra.gmra.mxu1 %v1082_v45 }
 0x54b   :  { %1221 = vmatpush1.bf16.msra.mxu0 %v2436_v48  ;;  %1262 = vmatpush1.bf16.msra.mxu1 %v2439_v53 }
 0x54c   :  { %1222 = vmatprep.subr.bf16.mxu0 %v2442_v49  ;;  %1263 = vmatprep.subr.bf16.mxu1 %v2445_v50 }
 0x54d   :  { %1252 = vmatprep.mubr.bf16.mxu0 %v2062_v0  ;;  %1293 = vmatprep.mubr.bf16.mxu1 %v2062_v0 }
 0x54f   :  { %1223 = vmatpush1.bf16.msra.mxu0 %v2450_v51  ;;  %1264 = vmatpush1.bf16.msra.mxu1 %v2453_v52 }
 0x550   :  { %1224 = vmatprep.subr.bf16.mxu0 %v2456_v61  ;;  %1265 = vmatprep.subr.bf16.mxu1 %v2459_v47 }
 0x553   :  { %1225 = vmatpush1.bf16.msra.mxu0 %v2462_v54  ;;  %1266 = vmatpush1.bf16.msra.mxu1 %v2465_v55 }
 0x554   :  { %1226 = vmatprep.subr.bf16.mxu0 %v2468_v56  ;;  %1267 = vmatprep.subr.bf16.mxu1 %v2471_v57 }
 0x557   :  { %1227 = vmatpush1.bf16.msra.mxu0 %v2474_v58  ;;  %1268 = vmatpush1.bf16.msra.mxu1 %v2186_v29  ;;  %v2494_v29 = vld [vmem:[#allocation11 + $0x24] ss:$16 sps:$4 sm:$0xff]  }
 0x558   :  { %1228 = vmatprep.subr.bf16.mxu0 %v2478_v59  ;;  %1269 = vmatprep.subr.bf16.mxu1 %v2192_v31  ;;  %v2498_v31 = vld [vmem:[#allocation11 + $0x20] ss:$16 sps:$4 sm:$0xff]  }
 0x55b   :  { %1229 = vmatpush1.bf16.msra.mxu0 %v2482_v60  ;;  %1270 = vmatpush1.bf16.msra.mxu1 %v2198_v33  ;;  %v2502_v33 = vld [vmem:[#allocation11 + $0x4] ss:$16 sps:$4 sm:$0xff]  }
 0x55c   :  { %1230 = vmatprep.subr.bf16.mxu0 %v2486_v9  ;;  %1271 = vmatprep.subr.bf16.mxu1 %v2204_v36  ;;  %v2506_v36 = vld [vmem:[#allocation11] ss:$16 sps:$4 sm:$0xff]  }
 0x55f   :  { %1231 = vmatpush1.bf16.msra.mxu0 %v2490_v10  ;;  %1272 = vmatpush1.bf16.msra.mxu1 %v2208_v38  ;;  %v1936_v38 = vld [vmem:[#allocation11 + $0xec] ss:$16 sps:$4 sm:$0xff]  }
 0x560   :  { %1232 = vmatprep.subr.bf16.mxu0 %v2494_v29  ;;  %1273 = vmatprep.subr.bf16.mxu1 %v2211_v39 }
 0x563   :  { %1233 = vmatpush1.bf16.msra.mxu0 %v2498_v31  ;;  %1274 = vmatpush1.bf16.msra.mxu1 %v2215_v40  ;;  %v1078_v40 = vld [vmem:[#allocation5 + $0x8] sm:$0xc] }
 0x564   :  { %1234 = vmatprep.subr.bf16.mxu0 %v2502_v33  ;;  %1275 = vmatprep.subr.bf16.mxu1 %v2219_v41 }
 0x567   :  { %1235 = vmatpush1.bf16.msra.mxu0 %v2506_v36  ;;  %1276 = vmatpush1.bf16.msra.mxu1 %v2224_v42 }
 0x568   :  { %1357 = vmatprep.subr.bf16.mxu0 %v2425_v5  ;;  %1398 = vmatprep.subr.bf16.mxu1 %v1936_v38 }
 0x60a   :  { %v1117_v39 = vpop.f32.mrf.mxu0  ;;  %v1158_v13 = vpop.f32.mrf.mxu1 }
 0x60b   :  { %v1169_v14 = vrot.slane %v1117_v39, 6  ;;  %v1171_v28 = vrot.slane %v1158_v13, 6 }
 0x60c   :  { %v1119_v16 = vpop.f32.mrf.mxu0  ;;  %v1160_v17 = vpop.f32.mrf.mxu1 }
 0x60d   :  { %v1177_v18 = vadd.f32 %v1169_v14, %v1078_v40  ;;  %v1170_v19 = vrot.slane %v1119_v16, 6  ;;  %v1172_v5 = vrot.slane %v1160_v17, 6  ;;  %v1179_v34 = vadd.f32 %v1171_v28, %v1080_v30 }
 0x60e   :  { %v1121_v41 = vpop.f32.mrf.mxu0  ;;  %v1162_v21 = vpop.f32.mrf.mxu1 }
 0x60f   :  { %v1658_v22 = vmul.f32 -1.442695, %v1177_v18  ;;  %v1178_v23 = vadd.f32 %v1170_v19, %v1079_v20  ;;  %v1180_v27 = vadd.f32 %v1172_v5, %v1081_v26  ;;  %v1215_v18 = vld [vmem:[#allocation5 + $0x38] sm:$0x30]  ;;  %v1214_v21 = vld [vmem:[#allocation5 + $0x28] sm:$0x30] }
 0x610   :  { %v1122_v24 = vpop.f32.mrf.mxu0  ;;  %v1163_v25 = vpop.f32.mrf.mxu1 }
 0x611   :  { %1866 = vpow2.f32 %v1658_v22  ;;  %v1659_v42 = vmul.f32 -1.442695, %v1178_v23  ;;  %v1660_v15 = vmul.f32 -1.442695, %v1180_v27 }
 0x613   :  { %1868 = vpow2.f32 %v1659_v42 }
 0x614   :  { %1870 = vpow2.f32 %v1660_v15 }
 0x61e   :  { %v1867_v32 = vpop.eup %1866 }
 0x61f   :  { %v1184_v8 = vadd.f32 1.0, %v1867_v32 }
 0x620   :  { %v1869_v46 = vpop.eup %1868 }
 0x621   :  { %1872 = vrcp.f32 %v1184_v8  ;;  %v1190_v35 = vadd.f32 1.0, %v1869_v46  ;;  %v1871_v44 = vpop.eup %1870 }
 0x622   :  { %1874 = vtanh.f32 %v1179_v34  ;;  %v1197_v6 = vadd.f32 1.0, %v1871_v44 }
 0x623   :  { %1876 = vrcp.f32 %v1190_v35 }
 0x624   :  { %1878 = vrcp.f32 %v1197_v6  ;;  %v1509_v6 = vld [vmem:[#allocation12 + $0x78] sm:$0xff] }
 0x62e   :  { %v1873_v3 = vpop.eup %1872 }
 0x62f   :  { %v1875_v63 = vpop.eup %1874 }
 0x630   :  { %v1877_v4 = vpop.eup %1876  ;;  %v1204_v7 = vmul.f32 %v1875_v63, %v1873_v3 }
 0x631   :  { %v1203_v11 = vmul.f32 %v1877_v4, %v1201_v2  ;;  %v1879_v37 = vpop.eup %1878 }
 0x633   :  { %v2512_v12 = vadd.f32 %v1204_v7, %v1203_v11  ;;  %v1508_v7 = vld [vmem:[#allocation12 + $0x70] sm:$0xff]  ;;  %v1507_v11 = vld [vmem:[#allocation12 + $0x68] sm:$0xff] }
 0x635   :  { %1880 = vtanh.f32 %v2512_v12  ;;  %v1338_v28 = vrot.slane %v2512_v12, 6  ;;  %v1506_v12 = vld [vmem:[#allocation12 + $0x60] sm:$0xff] }
 0x642   :  { %v1881_v45 = vpop.eup %1880 }
 0x643   :  { %v1207_v38 = vmul.f32 %v1881_v45, %v1879_v37  ;;  %v1505_v37 = vld [vmem:[#allocation12 + $0x58] sm:$0xff]  ;;  %v1504_v45 = vld [vmem:[#allocation12 + $0x50] sm:$0xff] }
 0x645   :  { %v1209_v39 = vrot.slane %v1207_v38, 2  ;;  %v1216_v13 = vpack.c.bf16 %v1207_v38, %v1207_v38  ;;  %v1503_v38 = vld [vmem:[#allocation12 + $0x48] sm:$0xff] }
 0x647   :  { %v2516_v14 = vadd.f32 %v1209_v39, %v2434_v43  ;;  %v1218_v40 = vrot.slane %v1216_v13, 1  ;;  %v1939_v43 = vld [vmem:[#allocation11 + $0x68] ss:$16 sps:$4 sm:$0xff]   ;;  %v1502_v39 = vld [vmem:[#allocation12 + $0x40] sm:$0xff] }
 0x648   :  { %v1501_v13 = vld [vmem:[#allocation12 + $0x38] sm:$0xff] }
 0x649   :  { %1253 = vmatmul.mubr.bf16.vlgmr.msra.gmra.mxu0 %v1218_v40  ;;  %1294 = vmatmul.mubr.bf16.vlgmr.msra.gmra.mxu1 %v1218_v40  ;;  %v1499_v40 = vld [vmem:[#allocation12 + $0x28] sm:$0xff] }
 0x64a   :  { %1358 = vmatpush1.bf16.msra.mxu0 %v2436_v48  ;;  %1399 = vmatpush1.bf16.msra.mxu1 %v2439_v53  ;;  %v1940_v48 = vld [vmem:[#allocation11 + $0x4c] ss:$16 sps:$4 sm:$0xff]   ;;  %v1941_v53 = vld [vmem:[#allocation11 + $0x48] ss:$16 sps:$4 sm:$0xff]  }
 0x64b   :  { %1359 = vmatprep.subr.bf16.mxu0 %v2442_v49  ;;  %1400 = vmatprep.subr.bf16.mxu1 %v2445_v50  ;;  %v1942_v49 = vld [vmem:[#allocation11 + $0x2c] ss:$16 sps:$4 sm:$0xff]   ;;  %v1943_v50 = vld [vmem:[#allocation11 + $0x28] ss:$16 sps:$4 sm:$0xff]  }
 0x64c   :  { %1389 = vmatprep.mubr.bf16.mxu0 %v2062_v0  ;;  %1430 = vmatprep.mubr.bf16.mxu1 %v2062_v0  ;;  %v1938_v0 = vld [vmem:[#allocation11 + $0x6c] ss:$16 sps:$4 sm:$0xff]  }
 0x64e   :  { %1360 = vmatpush1.bf16.msra.mxu0 %v2450_v51  ;;  %1401 = vmatpush1.bf16.msra.mxu1 %v2453_v52  ;;  %v1944_v51 = vld [vmem:[#allocation11 + $0xc] ss:$16 sps:$4 sm:$0xff]   ;;  %v1945_v52 = vld [vmem:[#allocation11 + $0x8] ss:$16 sps:$4 sm:$0xff]  }
 0x64f   :  { %1361 = vmatprep.subr.bf16.mxu0 %v2456_v61  ;;  %1402 = vmatprep.subr.bf16.mxu1 %v2459_v47 }
 0x652   :  { %1362 = vmatpush1.bf16.msra.mxu0 %v2462_v54  ;;  %1403 = vmatpush1.bf16.msra.mxu1 %v2465_v55  ;;  %v1212_v55 = vld [vmem:[#allocation5 + $0x8] sm:$0x30] }
 0x653   :  { %1363 = vmatprep.subr.bf16.mxu0 %v2468_v56  ;;  %1404 = vmatprep.subr.bf16.mxu1 %v2471_v57 }
 0x656   :  { %1364 = vmatpush1.bf16.msra.mxu0 %v2474_v58  ;;  %1405 = vmatpush1.bf16.msra.mxu1 %v1937_v62  ;;  %v1498_v62 = vld [vmem:[#allocation12 + $0x20] sm:$0xff] }
 0x657   :  { %1365 = vmatprep.subr.bf16.mxu0 %v2478_v59  ;;  %1406 = vmatprep.subr.bf16.mxu1 %v1938_v0  ;;  %v1497_v0 = vld [vmem:[#allocation12 + $0x18] sm:$0xff] }
 0x65a   :  { %1366 = vmatpush1.bf16.msra.mxu0 %v2482_v60  ;;  %1407 = vmatpush1.bf16.msra.mxu1 %v1939_v43  ;;  %v1213_v60 = vld [vmem:[#allocation5 + $0x20] sm:$0x30] }
 0x65b   :  { %1367 = vmatprep.subr.bf16.mxu0 %v2486_v9  ;;  %1408 = vmatprep.subr.bf16.mxu1 %v1940_v48  ;;  %v1496_v43 = vld [vmem:[#allocation12 + $0x10] sm:$0xff]  ;;  %v1495_v48 = vld [vmem:[#allocation12 + $0x8] sm:$0xff] }
 0x65e   :  { %1368 = vmatpush1.bf16.msra.mxu0 %v2490_v10  ;;  %1409 = vmatpush1.bf16.msra.mxu1 %v1941_v53  ;;  %v1494_v53 = vld [vmem:[#allocation12] sm:$0xff] }
 0x65f   :  { %1369 = vmatprep.subr.bf16.mxu0 %v2494_v29  ;;  %1410 = vmatprep.subr.bf16.mxu1 %v1942_v49 }
 0x662   :  { %1370 = vmatpush1.bf16.msra.mxu0 %v2498_v31  ;;  %1411 = vmatpush1.bf16.msra.mxu1 %v1943_v50 }
 0x663   :  { %1371 = vmatprep.subr.bf16.mxu0 %v2502_v33  ;;  %1412 = vmatprep.subr.bf16.mxu1 %v1944_v51 }
 0x666   :  { %1372 = vmatpush1.bf16.msra.mxu0 %v2506_v36  ;;  %1413 = vmatpush1.bf16.msra.mxu1 %v1945_v52  ;;  %v1349_v52 = vld [vmem:[#allocation5 + $0x8] sm:$0xc0] }
 0x667   :  { %1685 = vmatprep.subr.mxu0 %v2063_v1 }
 0x709   :  { %v1254_v61 = vpop.f32.mrf.mxu0  ;;  %v1295_v47 = vpop.f32.mrf.mxu1 }
 0x70a   :  { %v1306_v54 = vrot.slane %v1254_v61, 4  ;;  %v1308_v20 = vrot.slane %v1295_v47, 4 }
 0x70b   :  { %v1256_v56 = vpop.f32.mrf.mxu0  ;;  %v1297_v57 = vpop.f32.mrf.mxu1 }
 0x70c   :  { %v1314_v58 = vadd.f32 %v1306_v54, %v1212_v55  ;;  %v1307_v59 = vrot.slane %v1256_v56, 4  ;;  %v1309_v17 = vrot.slane %v1297_v57, 4  ;;  %v1316_v23 = vadd.f32 %v1308_v20, %v1214_v21  ;;  %v1350_v56 = vld [vmem:[#allocation5 + $0x20] sm:$0xc0] }
 0x70d   :  { %v1258_v9 = vpop.f32.mrf.mxu0  ;;  %v1299_v10 = vpop.f32.mrf.mxu1 }
 0x70e   :  { %v1661_v29 = vmul.f32 -1.442695, %v1314_v58  ;;  %v1315_v31 = vadd.f32 %v1307_v59, %v1213_v60  ;;  %v1317_v19 = vadd.f32 %v1309_v17, %v1215_v18  ;;  %v1351_v17 = vld [vmem:[#allocation5 + $0x28] sm:$0xc0] }
 0x70f   :  { %v1259_v33 = vpop.f32.mrf.mxu0  ;;  %v1300_v16 = vpop.f32.mrf.mxu1 }
 0x710   :  { %1882 = vpow2.f32 %v1661_v29  ;;  %v1662_v36 = vmul.f32 -1.442695, %v1315_v31  ;;  %v1663_v41 = vmul.f32 -1.442695, %v1317_v19  ;;  %v1352_v31 = vld [vmem:[#allocation5 + $0x38] sm:$0xc0] }
 0x712   :  { %1884 = vpow2.f32 %v1662_v36 }
 0x713   :  { %1886 = vpow2.f32 %v1663_v41 }
 0x71d   :  { %v1883_v22 = vpop.eup %1882 }
 0x71e   :  { %v1321_v24 = vadd.f32 1.0, %v1883_v22 }
 0x71f   :  { %v1885_v25 = vpop.eup %1884 }
 0x720   :  { %1888 = vrcp.f32 %v1321_v24  ;;  %v1327_v42 = vadd.f32 1.0, %v1885_v25  ;;  %v1887_v5 = vpop.eup %1886 }
 0x721   :  { %1890 = vtanh.f32 %v1316_v23  ;;  %v1334_v30 = vadd.f32 1.0, %v1887_v5 }
 0x722   :  { %1892 = vrcp.f32 %v1327_v42 }
 0x723   :  { %1894 = vrcp.f32 %v1334_v30 }
 0x72d   :  { %v1889_v26 = vpop.eup %1888 }
 0x72e   :  { %v1891_v27 = vpop.eup %1890 }
 0x72f   :  { %v1893_v15 = vpop.eup %1892  ;;  %v1341_v32 = vmul.f32 %v1891_v27, %v1889_v26 }
 0x730   :  { %v1340_v34 = vmul.f32 %v1893_v15, %v1338_v28  ;;  %v1895_v46 = vpop.eup %1894 }
 0x732   :  { %v2543_v8 = vadd.f32 %v1341_v32, %v1340_v34 }
 0x734   :  { %1896 = vtanh.f32 %v2543_v8  ;;  %v1475_v25 = vrot.slane %v2543_v8, 6  ;;  %v1667_v8 = vld [vmem:[%s2578_s5] ss:$0 sm:$0xff] }
 0x741   :  { %v1897_v35 = vpop.eup %1896 }
 0x742   :  { %v1344_v44 = vmul.f32 %v1897_v35, %v1895_v46 }
 0x744   :  { %v1346_v3 = vrot.slane %v1344_v44, 4  ;;  %v1353_v63 = vpack.c.bf16 %v1344_v44, %v1344_v44 }
 0x746   :  { %v2547_v2 = vadd.f32 %v1346_v3, %v2516_v14  ;;  %v1355_v4 = vrot.slane %v1353_v63, 2  ;;  %v1500_v14 = vld [vmem:[#allocation12 + $0x30] sm:$0xff] }
 0x748   :  { %1390 = vmatmul.mubr.bf16.vlgmr.msra.gmra.mxu0 %v1355_v4  ;;  %1431 = vmatmul.mubr.bf16.vlgmr.msra.gmra.mxu1 %v1355_v4 }
 0x749   :  { %1686 = vmatpush3.msra.mxu0 %v1509_v6  ;;  %1717 = vmatprep.mubr.msk.f32.mxu0 %vm2064_vm1, %v2063_v1 }
 0x74a   :  { %1687 = vmatprep.subr.mxu0 %v2063_v1 }
 0x74b   :  { %1688 = vmatpush3.msra.mxu0 %v1508_v7 }
 0x74c   :  { %1689 = vmatprep.subr.mxu0 %v2063_v1 }
 0x74d   :  { %1690 = vmatpush3.msra.mxu0 %v1507_v11 }
 0x74e   :  { %1691 = vmatprep.subr.mxu0 %v2063_v1 }
 0x74f   :  { %1692 = vmatpush3.msra.mxu0 %v1506_v12 }
 0x750   :  { %1693 = vmatprep.subr.mxu0 %v2063_v1 }
 0x751   :  { %1694 = vmatpush3.msra.mxu0 %v1505_v37 }
 0x752   :  { %1695 = vmatprep.subr.mxu0 %v2063_v1 }
 0x753   :  { %1696 = vmatpush3.msra.mxu0 %v1504_v45 }
 0x754   :  { %1697 = vmatprep.subr.mxu0 %v2063_v1 }
 0x755   :  { %1698 = vmatpush3.msra.mxu0 %v1503_v38 }
 0x756   :  { %1699 = vmatprep.subr.mxu0 %v2063_v1 }
 0x757   :  { %1700 = vmatpush3.msra.mxu0 %v1502_v39 }
 0x758   :  { %1701 = vmatprep.subr.mxu0 %v2063_v1 }
 0x759   :  { %1702 = vmatpush3.msra.mxu0 %v1501_v13 }
 0x75a   :  { %1703 = vmatprep.subr.mxu0 %v2063_v1 }
 0x75b   :  { %1704 = vmatpush3.msra.mxu0 %v1500_v14 }
 0x75c   :  { %1705 = vmatprep.subr.mxu0 %v2063_v1 }
 0x75d   :  { %1706 = vmatpush3.msra.mxu0 %v1499_v40 }
 0x75e   :  { %1707 = vmatprep.subr.mxu0 %v2063_v1 }
 0x75f   :  { %1708 = vmatpush3.msra.mxu0 %v1498_v62 }
 0x760   :  { %1709 = vmatprep.subr.mxu0 %v2063_v1 }
 0x761   :  { %1710 = vmatpush3.msra.mxu0 %v1497_v0 }
 0x762   :  { %1711 = vmatprep.subr.mxu0 %v2063_v1 }
 0x763   :  { %1712 = vmatpush3.msra.mxu0 %v1496_v43 }
 0x764   :  { %1713 = vmatprep.subr.mxu0 %v2063_v1 }
 0x765   :  { %1714 = vmatpush3.msra.mxu0 %v1495_v48 }
 0x766   :  { %1715 = vmatprep.subr.mxu0 %v2063_v1 }
 0x767   :  { %1716 = vmatpush3.msra.mxu0 %v1494_v53 }
 0x808   :  { %v1391_v49 = vpop.f32.mrf.mxu0  ;;  %v1432_v50 = vpop.f32.mrf.mxu1 }
 0x809   :  { %v1443_v51 = vrot.slane %v1391_v49, 2  ;;  %v1445_v16 = vrot.slane %v1432_v50, 2 }
 0x80a   :  { %v1393_v61 = vpop.f32.mrf.mxu0  ;;  %v1434_v47 = vpop.f32.mrf.mxu1 }
 0x80b   :  { %v1451_v54 = vadd.f32 %v1443_v51, %v1349_v52  ;;  %v1444_v55 = vrot.slane %v1393_v61, 2  ;;  %v1446_v1 = vrot.slane %v1434_v47, 2  ;;  %v1453_v19 = vadd.f32 %v1445_v16, %v1351_v17 }
 0x80c   :  { %v1395_v57 = vpop.f32.mrf.mxu0  ;;  %v1436_v58 = vpop.f32.mrf.mxu1 }
 0x80d   :  { %v1664_v59 = vmul.f32 -1.442695, %v1451_v54  ;;  %v1452_v60 = vadd.f32 %v1444_v55, %v1350_v56  ;;  %v1454_v33 = vadd.f32 %v1446_v1, %v1352_v31 }
 0x80e   :  { %v1396_v9 = vpop.f32.mrf.mxu0  ;;  %v1437_v10 = vpop.f32.mrf.mxu1 }
 0x80f   :  { %1898 = vpow2.f32 %v1664_v59  ;;  %v1665_v29 = vmul.f32 -1.442695, %v1452_v60  ;;  %v1666_v36 = vmul.f32 -1.442695, %v1454_v33 }
 0x811   :  { %1900 = vpow2.f32 %v1665_v29 }
 0x812   :  { %1902 = vpow2.f32 %v1666_v36 }
 0x81c   :  { %v1899_v18 = vpop.eup %1898 }
 0x81d   :  { %v1458_v20 = vadd.f32 1.0, %v1899_v18 }
 0x81e   :  { %v1901_v41 = vpop.eup %1900 }
 0x81f   :  { %1904 = vrcp.f32 %v1458_v20  ;;  %v1464_v21 = vadd.f32 1.0, %v1901_v41  ;;  %v1903_v22 = vpop.eup %1902 }
 0x820   :  { %1906 = vtanh.f32 %v1453_v19  ;;  %v1471_v5 = vadd.f32 1.0, %v1903_v22 }
 0x821   :  { %1908 = vrcp.f32 %v1464_v21 }
 0x822   :  { %1910 = vrcp.f32 %v1471_v5 }
 0x82c   :  { %v1905_v23 = vpop.eup %1904 }
 0x82d   :  { %v1907_v24 = vpop.eup %1906 }
 0x82e   :  { %v1909_v42 = vpop.eup %1908  ;;  %v1478_v26 = vmul.f32 %v1907_v24, %v1905_v23 }
 0x82f   :  { %v1477_v27 = vmul.f32 %v1909_v42, %v1475_v25  ;;  %v1911_v15 = vpop.eup %1910 }
 0x831   :  { %v1479_v28 = vadd.f32 %v1478_v26, %v1477_v27 }
 0x833   :  { %1912 = vtanh.f32 %v1479_v28  ;;  %1487 = vst [vmem:[#allocation3 - $0x6] sm:$0xc0] %v1479_v28 }
 0x840   :  { %v1913_v30 = vpop.eup %1912 }
 0x841   :  { %v1481_v32 = vmul.f32 %v1913_v30, %v1911_v15 }
 0x843   :  { %v1483_v34 = vrot.slane %v1481_v32, 6  ;;  %1486 = vst [vmem:[#allocation2 - $0x6] sm:$0xc0] %v1481_v32 }
 0x845   :  { %v1485_v46 = vadd.f32 %v1483_v34, %v2547_v2 }
 0x847   :  { %1488 = vst [vmem:[#allocation4] sm:$0x3] %v1485_v46 }
 0x84e   :  { %v1492_v35 = vld [vmem:[#allocation4] sm:$0x3] }
 0x84f   :  { %v1493_v44 = vmul.f32 0.125, %v1492_v35 }
 0x851   :  { %1718 = vmatmul.mubr.f32.vlgmr.msra.gmra.mxu0 %v1493_v44 }
 0x911   :  { %v1583_v3 = vpop.f32.mrf.mxu0 }
 0x912   :  { %v1584_v63 = vadd.f32 %v1667_v8, %v1583_v3 }
 0x913   :  { %v1719_v4 = vpop.f32.mrf.mxu0 }
 0x914   :  { %1587 = vst [vmem:[#allocation14] sm:$0x3] %v1584_v63 }
 0x915   :  { %2037 = shalt.err (!%p2034_p10)
}
 0x916   :  { %1597 = dma.vmem_to_hbm [thread:$0]  %s1595_s21, 32, %s2579_s6, [#allocation8]  }
 0x917   :  { %2052 = dma.done.wait [#allocation8], 32  }
 0x918   :  { %2053 = vsyncadd [#allocation8], 4294967264 }
 0x919   :  { %1601 = vsyncpa [#allocation7], 1 }
 0x91a   :  { %1602 = vsyncpa [#allocation10], 1 }
 0x91b   :  { %1603 = vsyncpa [#allocation13], 1 }
 0x91c   :  { %1604 = vsyncpa [#allocation8], 1 }

</bundles_post_ra>
